<compile_context>
chip_gen: v6e
topology: v6e:2x2x1
jax: 0.10.0
libtpu: 0.0.40
codegen_flags: <defaults>
</compile_context>

<pallas_src>
import functools
import math

import jax
import jax.numpy as jnp
from jax.experimental import pallas as pl
from jax.experimental.pallas import tpu as pltpu


def _round_up(v, m):
    return ((v + m - 1) // m) * m


# ----------------------------------------------------------------------------
# Pallas kernel: one batch element per grid step (whole layer fused).
# ----------------------------------------------------------------------------
def _mono_flow_kernel(x_ref, mask_ref, wqkv_ref, bqkv_ref, wo_ref, bo_ref,
                      ln_ref, ffn_w_ref, ffn_b_ref, post_w_ref, post_b_ref,
                      xo_ref, ld_ref, *, half, cp, dkp, n_layers, n_heads,
                      ffn_k, kc):
    T = x_ref.shape[-1]
    f32 = jnp.float32
    bf16 = jnp.bfloat16
    pad_l = (ffn_k - 1) // 2
    n_chunks = T // kc
    inv_half = 1.0 / half

    x = x_ref[0]                              # (C, T) f32
    mask_row = mask_ref[0]                    # (1, T)
    mask_t = mask_row.T                       # (T, 1)
    key_bias = (mask_row - 1.0) * 1e4         # additive key-side mask (1, T)

    x0 = x[:half, :]                          # (half, T) original unmasked split
    x1 = x[half:, :]

    def chan_pad_t(a):                        # (half, T) -> (T, cp), zero lanes
        at = a.T
        if cp > half:
            at = jnp.concatenate(
                [at, jnp.zeros((T, cp - half), f32)], axis=1)
        return at

    x0_t = chan_pad_t(x0)                     # (T, cp)
    x1_t = chan_pad_t(x1)

    def mm(a, b):                             # MXU matmul, f32 accumulation
        return jnp.dot(a, b, preferred_element_type=f32)

    def mm_nt(a, b):                          # (M,K) x (N,K)^T, no .T materialized
        return jax.lax.dot_general(a, b, (((1,), (1,)), ((), ())),
                                   preferred_element_type=f32)

    def layer_norm(y, g, b):
        # stats over the `half` real channels; padded lanes are exactly zero
        mu = jnp.sum(y, axis=-1, keepdims=True) * inv_half
        ms = jnp.sum(y * y, axis=-1, keepdims=True) * inv_half
        var = ms - mu * mu
        return (y - mu) * jax.lax.rsqrt(var + 1e-5) * g + b

    t_idx = jax.lax.broadcasted_iota(jnp.int32, (T, 1), 0)

    def shift_time(a, s):                     # out[t] = a[t-s], zero off the ends
        if s == 0:
            return a
        rolled = pltpu.roll(a, shift=s % T, axis=0)
        valid = (t_idx >= s) & (t_idx < T + s)
        return jnp.where(valid, rolled, 0.0)

    h = x0_t * mask_t                         # encoder input (T, cp) f32

    for l in range(n_layers):                 # n_layers == 2, statically unrolled
        # ---------------- masked multi-head self-attention ----------------
        hb = h.astype(bf16)
        y = jnp.zeros((T, cp), f32)
        for hd in range(n_heads):             # per-head weights: no lane slicing
            q = mm(hb, wqkv_ref[l, 0, hd, :, :]) + bqkv_ref[l, 0, hd, :, :]
            k = mm(hb, wqkv_ref[l, 1, hd, :, :]) + bqkv_ref[l, 1, hd, :, :]
            v = mm(hb, wqkv_ref[l, 2, hd, :, :]) + bqkv_ref[l, 2, hd, :, :]
            qb, kb, vb = q.astype(bf16), k.astype(bf16), v.astype(bf16)

            # key-chunked online softmax: working set O(T x kc), never O(T x T)
            m_i = jnp.full((T, 1), -1e30, f32)
            l_i = jnp.zeros((T, 1), f32)
            acc = jnp.zeros((T, dkp), f32)
            for c in range(n_chunks):
                ks = slice(c * kc, (c + 1) * kc)
                scr = mm_nt(qb, kb[ks, :]) + key_bias[:, ks]        # (T, kc) f32
                m_new = jnp.maximum(m_i, jnp.max(scr, axis=-1, keepdims=True))
                alpha = jnp.exp(m_i - m_new)
                p = jnp.exp(scr - m_new)
                l_i = alpha * l_i + jnp.sum(p, axis=-1, keepdims=True)
                acc = alpha * acc + mm(p.astype(bf16), vb[ks, :])
                m_i = m_new
            out_h = acc * pl.reciprocal(l_i, approx=True)           # (T, dkp)
            y = y + mm(out_h.astype(bf16), wo_ref[l, hd, :, :])
        y = y + bo_ref[l, :, :]
        # TODO(synk): dropout (p=0.1) treated as identity (inference mode).
        h = layer_norm(h + y, ln_ref[l, 0, 0, :, :], ln_ref[l, 0, 1, :, :])

        # ---------------- FFN: conv1d(k) -> relu -> conv1d(k) ----------------
        def conv_k(inp, ci):
            acc = jnp.zeros((T, cp), f32)
            for j in range(ffn_k):            # taps shifted via XLU roll
                xs = shift_time(inp, pad_l - j)
                acc = acc + mm(xs.astype(bf16), ffn_w_ref[l, ci, j, :, :])
            return acc + ffn_b_ref[l, ci, :, :]

        z = conv_k(h * mask_t, 0)
        z = jnp.maximum(z, 0.0)
        z = conv_k(z * mask_t, 1) * mask_t
        h = layer_norm(h + z, ln_ref[l, 1, 0, :, :], ln_ref[l, 1, 1, :, :])

    enc = h * mask_t                          # encoder output x0_
    hh = (enc + x0_t).astype(bf16)            # h = x0_ + x0 (original, unmasked)
    m_t = (mm(hh, post_w_ref[0, :, :]) + post_b_ref[0, :, :]) * mask_t
    logs_t = (mm(hh, post_w_ref[1, :, :]) + post_b_ref[1, :, :]) * mask_t
    # TODO(synk): only the reverse=False / residual_connection=False /
    # mean_only=False branch of the PyTorch forward is implemented.

    x1n_t = m_t + x1_t * jnp.exp(logs_t) * mask_t                   # (T, cp)
    x1n = x1n_t.T                                                   # (cp, T)

    xo_ref[0, :half, :] = x0                  # passthrough half, no concat copy
    xo_ref[0, half:, :] = x1n[:half, :]

    ld = jnp.sum(jnp.sum(logs_t, axis=0, keepdims=True), axis=1, keepdims=True)
    ld_ref[0] = ld                            # padded lanes / masked rows are 0


# ----------------------------------------------------------------------------
# Wrapper: pack / pad / pre-transpose weights (bf16), launch one pallas_call.
# ----------------------------------------------------------------------------
def mono_flow_forward(x, x_mask, params, *, n_heads=2):
    B, C, T = x.shape
    half = C // 2
    assert C % 2 == 0 and half % n_heads == 0
    layers = params["layers"]
    L = len(layers)
    ffn_k = layers[0]["ffn_w1"].shape[-1]
    dk = half // n_heads
    LANE = 128
    cp = max(LANE, _round_up(half, LANE))     # padded channel width (lane-dense)
    dkp = max(LANE, _round_up(dk, LANE))      # padded per-head width
    kc = 512 if (T > 512 and T % 512 == 0) else T   # key-chunk size
    f32, bf16 = jnp.float32, jnp.bfloat16

    def pad2(w, r, c):
        return jnp.pad(w, ((0, r - w.shape[0]), (0, c - w.shape[1])))

    def pad1(v, n):
        return jnp.pad(v, (0, n - v.shape[0]))

    def t1x1(w):                              # torch (out, in, 1) -> (in, out)
        return jnp.transpose(w[:, :, 0], (1, 0))

    scale = 1.0 / math.sqrt(dk)               # folded into Wq / bq

    # q/k/v weights per head: (L, 3, H, cp, dkp) bf16; biases (L, 3, H, 1, dkp) f32
    wqkv, bqkv = [], []
    for lyr in layers:
        ws3, bs3 = [], []
        for name_w, name_b, sc in (("wq", "bq", scale), ("wk", "bk", 1.0),
                                   ("wv", "bv", 1.0)):
            w = t1x1(lyr[name_w]) * sc
            b = lyr[name_b] * sc
            ws3.append(jnp.stack([pad2(w[:, h0 * dk:(h0 + 1) * dk], cp, dkp)
                                  for h0 in range(n_heads)]))
            bs3.append(jnp.stack([pad1(b[h0 * dk:(h0 + 1) * dk], dkp).reshape(1, dkp)
                                  for h0 in range(n_heads)]))
        wqkv.append(jnp.stack(ws3))
        bqkv.append(jnp.stack(bs3))
    wqkv = jnp.stack(wqkv).astype(bf16)
    bqkv = jnp.stack(bqkv).astype(f32)

    # output projection per head: (L, H, dkp, cp) bf16; bias (L, 1, cp) f32
    wo = jnp.stack([jnp.stack([pad2(t1x1(lyr["wo"])[h0 * dk:(h0 + 1) * dk, :], dkp, cp)
                               for h0 in range(n_heads)])
                    for lyr in layers]).astype(bf16)
    bo = jnp.stack([pad1(lyr["bo"], cp).reshape(1, cp) for lyr in layers]).astype(f32)

    # channel LayerNorm params (L, 2, 2, 1, cp) f32 (padded lanes stay zero)
    ln = jnp.stack([jnp.stack([
        jnp.stack([pad1(lyr["ln1_g"], cp).reshape(1, cp),
                   pad1(lyr["ln1_b"], cp).reshape(1, cp)]),
        jnp.stack([pad1(lyr["ln2_g"], cp).reshape(1, cp),
                   pad1(lyr["ln2_b"], cp).reshape(1, cp)])])
        for lyr in layers]).astype(f32)

    # FFN conv weights (L, 2, K, cp, cp) bf16, biases (L, 2, 1, cp) f32
    def tconv(w):                             # torch (out, in, K) -> (K, in, out)
        wt = jnp.transpose(w, (2, 1, 0))
        return jnp.stack([pad2(wt[j], cp, cp) for j in range(w.shape[-1])])

    ffn_w = jnp.stack([jnp.stack([tconv(lyr["ffn_w1"]), tconv(lyr["ffn_w2"])])
                       for lyr in layers]).astype(bf16)
    ffn_b = jnp.stack([jnp.stack([pad1(lyr["ffn_b1"], cp).reshape(1, cp),
                                  pad1(lyr["ffn_b2"], cp).reshape(1, cp)])
                       for lyr in layers]).astype(f32)

    # post 1x1 conv split into m / logs heads: (2, cp, cp) bf16 + (2, 1, cp) f32
    pw = t1x1(params["post_w"])               # (half, 2*half)
    post_w = jnp.stack([pad2(pw[:, :half], cp, cp),
                        pad2(pw[:, half:], cp, cp)]).astype(bf16)
    post_b = jnp.stack([pad1(params["post_b"][:half], cp).reshape(1, cp),
                        pad1(params["post_b"][half:], cp).reshape(1, cp)]).astype(f32)

    kern = functools.partial(_mono_flow_kernel, half=half, cp=cp, dkp=dkp,
                             n_layers=L, n_heads=n_heads, ffn_k=ffn_k, kc=kc)

    def full(a):                              # whole-array resident weight block
        return pl.BlockSpec(a.shape, lambda b, _nd=a.ndim: (0,) * _nd)

    x_out, logdet = pl.pallas_call(
        kern,
        grid=(B,),
        in_specs=[
            pl.BlockSpec((1, C, T), lambda b: (b, 0, 0)),
            pl.BlockSpec((1, 1, T), lambda b: (b, 0, 0)),
            full(wqkv), full(bqkv), full(wo), full(bo), full(ln),
            full(ffn_w), full(ffn_b), full(post_w), full(post_b),
        ],
        out_specs=(
            pl.BlockSpec((1, C, T), lambda b: (b, 0, 0)),
            pl.BlockSpec((1, 1, 1), lambda b: (b, 0, 0)),
        ),
        out_shape=(
            jax.ShapeDtypeStruct((B, C, T), jnp.float32),
            jax.ShapeDtypeStruct((B, 1, 1), jnp.float32),
        ),
        compiler_params=pltpu.CompilerParams(
            dimension_semantics=("parallel",),
            vmem_limit_bytes=64 * 1024 * 1024),
    )(x.astype(f32), x_mask.astype(f32), wqkv, bqkv, wo, bo, ln,
      ffn_w, ffn_b, post_w, post_b)
    return x_out, logdet[:, 0, 0]


# ----------------------------------------------------------------------------
# Pure-JAX reference (mirrors the PyTorch math in NCT layout) for verification.
# ----------------------------------------------------------------------------
_HI = jax.lax.Precision.HIGHEST


def _ref_conv1x1(x, w, b):
    return jnp.einsum("oi,bit->bot", w[:, :, 0], x, precision=_HI) + b[None, :, None]


def _ref_conv_same(x, w, b):
    K = w.shape[-1]
    y = jax.lax.conv_general_dilated(
        x, w, window_strides=(1,), padding=[((K - 1) // 2, K // 2)],
        dimension_numbers=("NCH", "OIH", "NCH"), precision=_HI)
    return y + b[None, :, None]


def _ref_layer_norm(x, g, b, eps=1e-5):
    mu = jnp.mean(x, axis=1, keepdims=True)
    var = jnp.mean(jnp.square(x - mu), axis=1, keepdims=True)
    return (x - mu) / jnp.sqrt(var + eps) * g[None, :, None] + b[None, :, None]


def _ref_mha(x, mask, lyr, n_heads):
    B, C, T = x.shape
    dk = C // n_heads
    q = _ref_conv1x1(x, lyr["wq"], lyr["bq"])
    k = _ref_conv1x1(x, lyr["wk"], lyr["bk"])
    v = _ref_conv1x1(x, lyr["wv"], lyr["bv"])
    split = lambda a: a.reshape(B, n_heads, dk, T).transpose(0, 1, 3, 2)
    q, k, v = split(q), split(k), split(v)
    scores = jnp.einsum("bhtd,bhsd->bhts", q / math.sqrt(dk), k, precision=_HI)
    attn_mask = mask[:, :, None, :] * mask[:, :, :, None]
    scores = jnp.where(attn_mask == 0, -1e4, scores)
    p = jax.nn.softmax(scores, axis=-1)
    o = jnp.einsum("bhts,bhsd->bhtd", p, v, precision=_HI)
    o = o.transpose(0, 1, 3, 2).reshape(B, C, T)
    return _ref_conv1x1(o, lyr["wo"], lyr["bo"])


def _ref_ffn(x, mask, lyr):
    y = _ref_conv_same(x * mask, lyr["ffn_w1"], lyr["ffn_b1"])
    y = jnp.maximum(y, 0.0)
    y = _ref_conv_same(y * mask, lyr["ffn_w2"], lyr["ffn_b2"])
    return y * mask


def _ref_encoder(x, mask, layers, n_heads):
    x = x * mask
    for lyr in layers:
        y = _ref_mha(x, mask, lyr, n_heads)
        x = _ref_layer_norm(x + y, lyr["ln1_g"], lyr["ln1_b"])
        y = _ref_ffn(x, mask, lyr)
        x = _ref_layer_norm(x + y, lyr["ln2_g"], lyr["ln2_b"])
    return x * mask


def mono_flow_reference(x, mask, params, n_heads=2):
    C = x.shape[1]
    half = C // 2
    x0, x1 = x[:, :half], x[:, half:]
    x0_ = _ref_encoder(x0 * mask, mask, params["layers"], n_heads)
    h = x0_ + x0
    stats = _ref_conv1x1(h, params["post_w"], params["post_b"]) * mask
    m, logs = stats[:, :half], stats[:, half:]
    x1n = m + x1 * jnp.exp(logs) * mask
    out = jnp.concatenate([x0, x1n], axis=1)
    logdet = jnp.sum(logs, axis=(1, 2))
    return out, logdet


# ----------------------------------------------------------------------------
# Deterministic parameter construction (shapes follow the PyTorch __init__).
# ----------------------------------------------------------------------------
def init_params(key, channels, n_layers=2, kernel_size=3):
    half = channels // 2
    keys = iter(jax.random.split(key, 128))

    def nrm(shape, s=0.2):
        return s * jax.random.normal(next(keys), shape, jnp.float32)

    layers = []
    for _ in range(n_layers):
        layers.append(dict(
            wq=nrm((half, half, 1)), bq=nrm((half,)),
            wk=nrm((half, half, 1)), bk=nrm((half,)),
            wv=nrm((half, half, 1)), bv=nrm((half,)),
            wo=nrm((half, half, 1)), bo=nrm((half,)),
            ln1_g=jnp.ones((half,), jnp.float32) + nrm((half,), 0.05),
            ln1_b=nrm((half,), 0.05),
            ffn_w1=nrm((half, half, kernel_size)), ffn_b1=nrm((half,)),
            ffn_w2=nrm((half, half, kernel_size)), ffn_b2=nrm((half,)),
            ln2_g=jnp.ones((half,), jnp.float32) + nrm((half,), 0.05),
            ln2_b=nrm((half,), 0.05),
        ))
    # NOTE: the PyTorch module zero-initialises `post` (flow == identity at
    # init).  Small random values are used here so the affine / logdet path is
    # actually exercised by the test.
    post_w = nrm((2 * half, half, 1), 0.05)
    post_b = nrm((2 * half,), 0.05)
    return dict(layers=layers, post_w=post_w, post_b=post_b)


if __name__ == "__main__":
    B, C, T = 2, 8, 16           # channels=8 -> half_channels=4, 2 heads
    hidden_channels = 32         # stored by the torch module, unused in forward

    key = jax.random.PRNGKey(0)
    kp, kx = jax.random.split(key)
    params = init_params(kp, C)

    x = jax.random.normal(kx, (B, C, T), jnp.float32)
    lengths = jnp.array([T, 12])
    x_mask = (jnp.arange(T)[None, :] < lengths[:, None]
              ).astype(jnp.float32)[:, None, :]           # (B, 1, T)

    fwd = jax.jit(functools.partial(mono_flow_forward, n_heads=2))
    y, logdet = fwd(x, x_mask, params)
    y, logdet = jax.block_until_ready((y, logdet))

    y_ref, ld_ref = mono_flow_reference(x, x_mask, params)

    assert y.shape == (B, C, T) and logdet.shape == (B,), (y.shape, logdet.shape)
    assert bool(jnp.all(jnp.isfinite(y))) and bool(jnp.all(jnp.isfinite(logdet)))
    # Tolerances account for bf16 MXU operands (f32 accumulation) in the kernel
    # vs. the fully-f32 reference.
    y_err = float(jnp.max(jnp.abs(y - y_ref)))
    assert y_err < 3e-2, y_err
    ld_err = float(jnp.max(jnp.abs(logdet - ld_ref)))
    assert ld_err < 2.5e-1, (logdet, ld_ref)
    print("KERNEL_OK")
</pallas_src>

<mosaic_0001>
module attributes {stable_mosaic.version = 11 : i64} {
  func.func @_mono_flow_kernel(%arg0: i32, %arg1: memref<1x8x16xf32, #tpu.memory_space<vmem>>, %arg2: memref<1x1x16xf32, #tpu.memory_space<vmem>>, %arg3: memref<2x3x2x128x128xbf16, #tpu.memory_space<vmem>>, %arg4: memref<2x3x2x1x128xf32, #tpu.memory_space<vmem>>, %arg5: memref<2x2x128x128xbf16, #tpu.memory_space<vmem>>, %arg6: memref<2x1x128xf32, #tpu.memory_space<vmem>>, %arg7: memref<2x2x2x1x128xf32, #tpu.memory_space<vmem>>, %arg8: memref<2x2x3x128x128xbf16, #tpu.memory_space<vmem>>, %arg9: memref<2x2x1x128xf32, #tpu.memory_space<vmem>>, %arg10: memref<2x128x128xbf16, #tpu.memory_space<vmem>>, %arg11: memref<2x1x128xf32, #tpu.memory_space<vmem>>, %arg12: memref<1x8x16xf32, #tpu.memory_space<vmem>>, %arg13: memref<1x1x1xf32, #tpu.memory_space<vmem>>) attributes {dimension_semantics = [#tpu.dimension_semantics<parallel>], iteration_bounds = array<i64: 2>, scalar_prefetch = 0 : i64, scratch_operands = 0 : i64, tpu.core_type = #tpu.core_type<tc>, window_params = [{transform_indices = @transform_0, window_bounds = array<i64: 1, 8, 16>}, {transform_indices = @transform_1, window_bounds = array<i64: 1, 1, 16>}, {pipeline_mode = #tpu.pipeline_mode<synchronous>, transform_indices = @transform_2, window_bounds = array<i64: 2, 3, 2, 128, 128>}, {pipeline_mode = #tpu.pipeline_mode<synchronous>, transform_indices = @transform_3, window_bounds = array<i64: 2, 3, 2, 1, 128>}, {pipeline_mode = #tpu.pipeline_mode<synchronous>, transform_indices = @transform_4, window_bounds = array<i64: 2, 2, 128, 128>}, {pipeline_mode = #tpu.pipeline_mode<synchronous>, transform_indices = @transform_5, window_bounds = array<i64: 2, 1, 128>}, {pipeline_mode = #tpu.pipeline_mode<synchronous>, transform_indices = @transform_6, window_bounds = array<i64: 2, 2, 2, 1, 128>}, {pipeline_mode = #tpu.pipeline_mode<synchronous>, transform_indices = @transform_7, window_bounds = array<i64: 2, 2, 3, 128, 128>}, {pipeline_mode = #tpu.pipeline_mode<synchronous>, transform_indices = @transform_8, window_bounds = array<i64: 2, 2, 1, 128>}, {pipeline_mode = #tpu.pipeline_mode<synchronous>, transform_indices = @transform_9, window_bounds = array<i64: 2, 128, 128>}, {pipeline_mode = #tpu.pipeline_mode<synchronous>, transform_indices = @transform_10, window_bounds = array<i64: 2, 1, 128>}, {transform_indices = @transform_11, window_bounds = array<i64: 1, 8, 16>}, {transform_indices = @transform_12, window_bounds = array<i64: 1, 1, 1>}]} {
    %c0 = arith.constant 0 : index
    %c0_0 = arith.constant 0 : index
    %c0_1 = arith.constant 0 : index
    %0 = vector.load %arg1[%c0, %c0_0, %c0_1] : memref<1x8x16xf32, #tpu.memory_space<vmem>>, vector<1x8x16xf32>
    %1 = vector.shape_cast %0 : vector<1x8x16xf32> to vector<8x16xf32>
    %c0_2 = arith.constant 0 : index
    %c0_3 = arith.constant 0 : index
    %c0_4 = arith.constant 0 : index
    %2 = vector.load %arg2[%c0_2, %c0_3, %c0_4] : memref<1x1x16xf32, #tpu.memory_space<vmem>>, vector<1x1x16xf32>
    %3 = vector.shape_cast %2 : vector<1x1x16xf32> to vector<1x16xf32>
    %4 = tpu.transpose %3, [1, 0] : vector<1x16xf32> -> vector<16x1xf32>
    %cst = arith.constant 1.000000e+00 : f32
    %5 = vector.broadcast %cst : f32 to vector<1x16xf32>
    %6 = arith.subf %3, %5 : vector<1x16xf32>
    %cst_5 = arith.constant 1.000000e+04 : f32
    %7 = vector.broadcast %cst_5 : f32 to vector<1x16xf32>
    %8 = arith.mulf %6, %7 : vector<1x16xf32>
    %9 = vector.extract_strided_slice %1 {offsets = [0, 0], sizes = [4, 16], strides = [1, 1]} : vector<8x16xf32> to vector<4x16xf32>
    %10 = vector.extract_strided_slice %1 {offsets = [4, 0], sizes = [4, 16], strides = [1, 1]} : vector<8x16xf32> to vector<4x16xf32>
    %11 = tpu.transpose %9, [1, 0] : vector<4x16xf32> -> vector<16x4xf32>
    %cst_6 = arith.constant 0.000000e+00 : f32
    %12 = vector.broadcast %cst_6 : f32 to vector<16x124xf32>
    %13 = tpu.concatenate %11, %12 in 1 : vector<16x4xf32>, vector<16x124xf32> -> vector<16x128xf32>
    %14 = tpu.transpose %10, [1, 0] : vector<4x16xf32> -> vector<16x4xf32>
    %cst_7 = arith.constant 0.000000e+00 : f32
    %15 = vector.broadcast %cst_7 : f32 to vector<16x124xf32>
    %16 = tpu.concatenate %14, %15 in 1 : vector<16x4xf32>, vector<16x124xf32> -> vector<16x128xf32>
    %17 = tpu.iota {dimensions = array<i32: 0>} : vector<16x1xi32>
    %18 = vector.broadcast %4 : vector<16x1xf32> to vector<16x128xf32>
    %19 = arith.mulf %13, %18 : vector<16x128xf32>
    %20 = arith.truncf %19 : vector<16x128xf32> to vector<16x128xbf16>
    %cst_8 = arith.constant 0.000000e+00 : f32
    %21 = vector.broadcast %cst_8 : f32 to vector<16x128xf32>
    %c0_9 = arith.constant 0 : index
    %c0_10 = arith.constant 0 : index
    %c0_11 = arith.constant 0 : index
    %c0_12 = arith.constant 0 : index
    %c0_13 = arith.constant 0 : index
    %22 = vector.load %arg3[%c0_9, %c0_10, %c0_11, %c0_12, %c0_13] : memref<2x3x2x128x128xbf16, #tpu.memory_space<vmem>>, vector<1x1x1x128x128xbf16>
    %23 = vector.shape_cast %22 : vector<1x1x1x128x128xbf16> to vector<128x128xbf16>
    %cst_14 = arith.constant dense<0.000000e+00> : vector<16x128xf32>
    %24 = tpu.matmul %20, %23, %cst_14 {dimension_numbers = #tpu.dot_dimension_numbers<[1], [0], [0], [1], [0, 0, 1, 1], [], []>} : vector<16x128xbf16>, vector<128x128xbf16>, vector<16x128xf32> -> vector<16x128xf32>
    %c0_15 = arith.constant 0 : index
    %c0_16 = arith.constant 0 : index
    %c0_17 = arith.constant 0 : index
    %c0_18 = arith.constant 0 : index
    %c0_19 = arith.constant 0 : index
    %25 = vector.load %arg4[%c0_15, %c0_16, %c0_17, %c0_18, %c0_19] : memref<2x3x2x1x128xf32, #tpu.memory_space<vmem>>, vector<1x1x1x1x128xf32>
    %26 = vector.shape_cast %25 : vector<1x1x1x1x128xf32> to vector<1x128xf32>
    %27 = vector.broadcast %26 : vector<1x128xf32> to vector<16x128xf32>
    %28 = arith.addf %24, %27 : vector<16x128xf32>
    %c0_20 = arith.constant 0 : index
    %c1 = arith.constant 1 : index
    %c0_21 = arith.constant 0 : index
    %c0_22 = arith.constant 0 : index
    %c0_23 = arith.constant 0 : index
    %29 = vector.load %arg3[%c0_20, %c1, %c0_21, %c0_22, %c0_23] : memref<2x3x2x128x128xbf16, #tpu.memory_space<vmem>>, vector<1x1x1x128x128xbf16>
    %30 = vector.shape_cast %29 : vector<1x1x1x128x128xbf16> to vector<128x128xbf16>
    %cst_24 = arith.constant dense<0.000000e+00> : vector<16x128xf32>
    %31 = tpu.matmul %20, %30, %cst_24 {dimension_numbers = #tpu.dot_dimension_numbers<[1], [0], [0], [1], [0, 0, 1, 1], [], []>} : vector<16x128xbf16>, vector<128x128xbf16>, vector<16x128xf32> -> vector<16x128xf32>
    %c0_25 = arith.constant 0 : index
    %c1_26 = arith.constant 1 : index
    %c0_27 = arith.constant 0 : index
    %c0_28 = arith.constant 0 : index
    %c0_29 = arith.constant 0 : index
    %32 = vector.load %arg4[%c0_25, %c1_26, %c0_27, %c0_28, %c0_29] : memref<2x3x2x1x128xf32, #tpu.memory_space<vmem>>, vector<1x1x1x1x128xf32>
    %33 = vector.shape_cast %32 : vector<1x1x1x1x128xf32> to vector<1x128xf32>
    %34 = vector.broadcast %33 : vector<1x128xf32> to vector<16x128xf32>
    %35 = arith.addf %31, %34 : vector<16x128xf32>
    %c0_30 = arith.constant 0 : index
    %c2 = arith.constant 2 : index
    %c0_31 = arith.constant 0 : index
    %c0_32 = arith.constant 0 : index
    %c0_33 = arith.constant 0 : index
    %36 = vector.load %arg3[%c0_30, %c2, %c0_31, %c0_32, %c0_33] : memref<2x3x2x128x128xbf16, #tpu.memory_space<vmem>>, vector<1x1x1x128x128xbf16>
    %37 = vector.shape_cast %36 : vector<1x1x1x128x128xbf16> to vector<128x128xbf16>
    %cst_34 = arith.constant dense<0.000000e+00> : vector<16x128xf32>
    %38 = tpu.matmul %20, %37, %cst_34 {dimension_numbers = #tpu.dot_dimension_numbers<[1], [0], [0], [1], [0, 0, 1, 1], [], []>} : vector<16x128xbf16>, vector<128x128xbf16>, vector<16x128xf32> -> vector<16x128xf32>
    %c0_35 = arith.constant 0 : index
    %c2_36 = arith.constant 2 : index
    %c0_37 = arith.constant 0 : index
    %c0_38 = arith.constant 0 : index
    %c0_39 = arith.constant 0 : index
    %39 = vector.load %arg4[%c0_35, %c2_36, %c0_37, %c0_38, %c0_39] : memref<2x3x2x1x128xf32, #tpu.memory_space<vmem>>, vector<1x1x1x1x128xf32>
    %40 = vector.shape_cast %39 : vector<1x1x1x1x128xf32> to vector<1x128xf32>
    %41 = vector.broadcast %40 : vector<1x128xf32> to vector<16x128xf32>
    %42 = arith.addf %38, %41 : vector<16x128xf32>
    %43 = arith.truncf %28 : vector<16x128xf32> to vector<16x128xbf16>
    %44 = arith.truncf %35 : vector<16x128xf32> to vector<16x128xbf16>
    %45 = arith.truncf %42 : vector<16x128xf32> to vector<16x128xbf16>
    %cst_40 = arith.constant -1.000000e+30 : f32
    %46 = vector.broadcast %cst_40 : f32 to vector<16x1xf32>
    %cst_41 = arith.constant 0.000000e+00 : f32
    %47 = vector.broadcast %cst_41 : f32 to vector<16x1xf32>
    %cst_42 = arith.constant 0.000000e+00 : f32
    %48 = vector.broadcast %cst_42 : f32 to vector<16x128xf32>
    %cst_43 = arith.constant dense<0.000000e+00> : vector<16x16xf32>
    %49 = tpu.matmul %43, %44, %cst_43 {dimension_numbers = #tpu.dot_dimension_numbers<[1], [1], [0], [0], [0, 0, 1, 0], [], []>} : vector<16x128xbf16>, vector<16x128xbf16>, vector<16x16xf32> -> vector<16x16xf32>
    %50 = vector.broadcast %8 : vector<1x16xf32> to vector<16x16xf32>
    %51 = arith.addf %49, %50 : vector<16x16xf32>
    %cst_44 = arith.constant dense<0xFF800000> : vector<16xf32>
    %52 = vector.multi_reduction <maximumf>, %51, %cst_44 [1] : vector<16x16xf32> to vector<16xf32>
    %53 = vector.shape_cast %52 : vector<16xf32> to vector<16x1xf32>
    %54 = arith.maximumf %46, %53 : vector<16x1xf32>
    %55 = arith.subf %46, %54 : vector<16x1xf32>
    %56 = math.exp %55 : vector<16x1xf32>
    %57 = vector.broadcast %54 : vector<16x1xf32> to vector<16x16xf32>
    %58 = arith.subf %51, %57 : vector<16x16xf32>
    %59 = math.exp %58 : vector<16x16xf32>
    %60 = arith.mulf %56, %47 : vector<16x1xf32>
    %cst_45 = arith.constant dense<0.000000e+00> : vector<16xf32>
    %61 = vector.multi_reduction <add>, %59, %cst_45 [1] : vector<16x16xf32> to vector<16xf32>
    %62 = vector.shape_cast %61 : vector<16xf32> to vector<16x1xf32>
    %63 = arith.addf %60, %62 : vector<16x1xf32>
    %64 = vector.broadcast %56 : vector<16x1xf32> to vector<16x128xf32>
    %65 = arith.mulf %64, %48 : vector<16x128xf32>
    %66 = arith.truncf %59 : vector<16x16xf32> to vector<16x16xbf16>
    %cst_46 = arith.constant dense<0.000000e+00> : vector<16x128xf32>
    %67 = tpu.matmul %66, %45, %cst_46 {dimension_numbers = #tpu.dot_dimension_numbers<[1], [0], [0], [1], [0, 0, 1, 1], [], []>} : vector<16x16xbf16>, vector<16x128xbf16>, vector<16x128xf32> -> vector<16x128xf32>
    %68 = arith.addf %65, %67 : vector<16x128xf32>
    %69 = tpu.reciprocal %63 {approx = true} : vector<16x1xf32> -> vector<16x1xf32>
    %70 = vector.broadcast %69 : vector<16x1xf32> to vector<16x128xf32>
    %71 = arith.mulf %68, %70 : vector<16x128xf32>
    %72 = arith.truncf %71 : vector<16x128xf32> to vector<16x128xbf16>
    %c0_47 = arith.constant 0 : index
    %c0_48 = arith.constant 0 : index
    %c0_49 = arith.constant 0 : index
    %c0_50 = arith.constant 0 : index
    %73 = vector.load %arg5[%c0_47, %c0_48, %c0_49, %c0_50] : memref<2x2x128x128xbf16, #tpu.memory_space<vmem>>, vector<1x1x128x128xbf16>
    %74 = vector.shape_cast %73 : vector<1x1x128x128xbf16> to vector<128x128xbf16>
    %cst_51 = arith.constant dense<0.000000e+00> : vector<16x128xf32>
    %75 = tpu.matmul %72, %74, %cst_51 {dimension_numbers = #tpu.dot_dimension_numbers<[1], [0], [0], [1], [0, 0, 1, 1], [], []>} : vector<16x128xbf16>, vector<128x128xbf16>, vector<16x128xf32> -> vector<16x128xf32>
    %76 = arith.addf %21, %75 : vector<16x128xf32>
    %c0_52 = arith.constant 0 : index
    %c0_53 = arith.constant 0 : index
    %c1_54 = arith.constant 1 : index
    %c0_55 = arith.constant 0 : index
    %c0_56 = arith.constant 0 : index
    %77 = vector.load %arg3[%c0_52, %c0_53, %c1_54, %c0_55, %c0_56] : memref<2x3x2x128x128xbf16, #tpu.memory_space<vmem>>, vector<1x1x1x128x128xbf16>
    %78 = vector.shape_cast %77 : vector<1x1x1x128x128xbf16> to vector<128x128xbf16>
    %cst_57 = arith.constant dense<0.000000e+00> : vector<16x128xf32>
    %79 = tpu.matmul %20, %78, %cst_57 {dimension_numbers = #tpu.dot_dimension_numbers<[1], [0], [0], [1], [0, 0, 1, 1], [], []>} : vector<16x128xbf16>, vector<128x128xbf16>, vector<16x128xf32> -> vector<16x128xf32>
    %c0_58 = arith.constant 0 : index
    %c0_59 = arith.constant 0 : index
    %c1_60 = arith.constant 1 : index
    %c0_61 = arith.constant 0 : index
    %c0_62 = arith.constant 0 : index
    %80 = vector.load %arg4[%c0_58, %c0_59, %c1_60, %c0_61, %c0_62] : memref<2x3x2x1x128xf32, #tpu.memory_space<vmem>>, vector<1x1x1x1x128xf32>
    %81 = vector.shape_cast %80 : vector<1x1x1x1x128xf32> to vector<1x128xf32>
    %82 = vector.broadcast %81 : vector<1x128xf32> to vector<16x128xf32>
    %83 = arith.addf %79, %82 : vector<16x128xf32>
    %c0_63 = arith.constant 0 : index
    %c1_64 = arith.constant 1 : index
    %c1_65 = arith.constant 1 : index
    %c0_66 = arith.constant 0 : index
    %c0_67 = arith.constant 0 : index
    %84 = vector.load %arg3[%c0_63, %c1_64, %c1_65, %c0_66, %c0_67] : memref<2x3x2x128x128xbf16, #tpu.memory_space<vmem>>, vector<1x1x1x128x128xbf16>
    %85 = vector.shape_cast %84 : vector<1x1x1x128x128xbf16> to vector<128x128xbf16>
    %cst_68 = arith.constant dense<0.000000e+00> : vector<16x128xf32>
    %86 = tpu.matmul %20, %85, %cst_68 {dimension_numbers = #tpu.dot_dimension_numbers<[1], [0], [0], [1], [0, 0, 1, 1], [], []>} : vector<16x128xbf16>, vector<128x128xbf16>, vector<16x128xf32> -> vector<16x128xf32>
    %c0_69 = arith.constant 0 : index
    %c1_70 = arith.constant 1 : index
    %c1_71 = arith.constant 1 : index
    %c0_72 = arith.constant 0 : index
    %c0_73 = arith.constant 0 : index
    %87 = vector.load %arg4[%c0_69, %c1_70, %c1_71, %c0_72, %c0_73] : memref<2x3x2x1x128xf32, #tpu.memory_space<vmem>>, vector<1x1x1x1x128xf32>
    %88 = vector.shape_cast %87 : vector<1x1x1x1x128xf32> to vector<1x128xf32>
    %89 = vector.broadcast %88 : vector<1x128xf32> to vector<16x128xf32>
    %90 = arith.addf %86, %89 : vector<16x128xf32>
    %c0_74 = arith.constant 0 : index
    %c2_75 = arith.constant 2 : index
    %c1_76 = arith.constant 1 : index
    %c0_77 = arith.constant 0 : index
    %c0_78 = arith.constant 0 : index
    %91 = vector.load %arg3[%c0_74, %c2_75, %c1_76, %c0_77, %c0_78] : memref<2x3x2x128x128xbf16, #tpu.memory_space<vmem>>, vector<1x1x1x128x128xbf16>
    %92 = vector.shape_cast %91 : vector<1x1x1x128x128xbf16> to vector<128x128xbf16>
    %cst_79 = arith.constant dense<0.000000e+00> : vector<16x128xf32>
    %93 = tpu.matmul %20, %92, %cst_79 {dimension_numbers = #tpu.dot_dimension_numbers<[1], [0], [0], [1], [0, 0, 1, 1], [], []>} : vector<16x128xbf16>, vector<128x128xbf16>, vector<16x128xf32> -> vector<16x128xf32>
    %c0_80 = arith.constant 0 : index
    %c2_81 = arith.constant 2 : index
    %c1_82 = arith.constant 1 : index
    %c0_83 = arith.constant 0 : index
    %c0_84 = arith.constant 0 : index
    %94 = vector.load %arg4[%c0_80, %c2_81, %c1_82, %c0_83, %c0_84] : memref<2x3x2x1x128xf32, #tpu.memory_space<vmem>>, vector<1x1x1x1x128xf32>
    %95 = vector.shape_cast %94 : vector<1x1x1x1x128xf32> to vector<1x128xf32>
    %96 = vector.broadcast %95 : vector<1x128xf32> to vector<16x128xf32>
    %97 = arith.addf %93, %96 : vector<16x128xf32>
    %98 = arith.truncf %83 : vector<16x128xf32> to vector<16x128xbf16>
    %99 = arith.truncf %90 : vector<16x128xf32> to vector<16x128xbf16>
    %100 = arith.truncf %97 : vector<16x128xf32> to vector<16x128xbf16>
    %cst_85 = arith.constant -1.000000e+30 : f32
    %101 = vector.broadcast %cst_85 : f32 to vector<16x1xf32>
    %cst_86 = arith.constant 0.000000e+00 : f32
    %102 = vector.broadcast %cst_86 : f32 to vector<16x1xf32>
    %cst_87 = arith.constant 0.000000e+00 : f32
    %103 = vector.broadcast %cst_87 : f32 to vector<16x128xf32>
    %cst_88 = arith.constant dense<0.000000e+00> : vector<16x16xf32>
    %104 = tpu.matmul %98, %99, %cst_88 {dimension_numbers = #tpu.dot_dimension_numbers<[1], [1], [0], [0], [0, 0, 1, 0], [], []>} : vector<16x128xbf16>, vector<16x128xbf16>, vector<16x16xf32> -> vector<16x16xf32>
    %105 = vector.broadcast %8 : vector<1x16xf32> to vector<16x16xf32>
    %106 = arith.addf %104, %105 : vector<16x16xf32>
    %cst_89 = arith.constant dense<0xFF800000> : vector<16xf32>
    %107 = vector.multi_reduction <maximumf>, %106, %cst_89 [1] : vector<16x16xf32> to vector<16xf32>
    %108 = vector.shape_cast %107 : vector<16xf32> to vector<16x1xf32>
    %109 = arith.maximumf %101, %108 : vector<16x1xf32>
    %110 = arith.subf %101, %109 : vector<16x1xf32>
    %111 = math.exp %110 : vector<16x1xf32>
    %112 = vector.broadcast %109 : vector<16x1xf32> to vector<16x16xf32>
    %113 = arith.subf %106, %112 : vector<16x16xf32>
    %114 = math.exp %113 : vector<16x16xf32>
    %115 = arith.mulf %111, %102 : vector<16x1xf32>
    %cst_90 = arith.constant dense<0.000000e+00> : vector<16xf32>
    %116 = vector.multi_reduction <add>, %114, %cst_90 [1] : vector<16x16xf32> to vector<16xf32>
    %117 = vector.shape_cast %116 : vector<16xf32> to vector<16x1xf32>
    %118 = arith.addf %115, %117 : vector<16x1xf32>
    %119 = vector.broadcast %111 : vector<16x1xf32> to vector<16x128xf32>
    %120 = arith.mulf %119, %103 : vector<16x128xf32>
    %121 = arith.truncf %114 : vector<16x16xf32> to vector<16x16xbf16>
    %cst_91 = arith.constant dense<0.000000e+00> : vector<16x128xf32>
    %122 = tpu.matmul %121, %100, %cst_91 {dimension_numbers = #tpu.dot_dimension_numbers<[1], [0], [0], [1], [0, 0, 1, 1], [], []>} : vector<16x16xbf16>, vector<16x128xbf16>, vector<16x128xf32> -> vector<16x128xf32>
    %123 = arith.addf %120, %122 : vector<16x128xf32>
    %124 = tpu.reciprocal %118 {approx = true} : vector<16x1xf32> -> vector<16x1xf32>
    %125 = vector.broadcast %124 : vector<16x1xf32> to vector<16x128xf32>
    %126 = arith.mulf %123, %125 : vector<16x128xf32>
    %127 = arith.truncf %126 : vector<16x128xf32> to vector<16x128xbf16>
    %c0_92 = arith.constant 0 : index
    %c1_93 = arith.constant 1 : index
    %c0_94 = arith.constant 0 : index
    %c0_95 = arith.constant 0 : index
    %128 = vector.load %arg5[%c0_92, %c1_93, %c0_94, %c0_95] : memref<2x2x128x128xbf16, #tpu.memory_space<vmem>>, vector<1x1x128x128xbf16>
    %129 = vector.shape_cast %128 : vector<1x1x128x128xbf16> to vector<128x128xbf16>
    %cst_96 = arith.constant dense<0.000000e+00> : vector<16x128xf32>
    %130 = tpu.matmul %127, %129, %cst_96 {dimension_numbers = #tpu.dot_dimension_numbers<[1], [0], [0], [1], [0, 0, 1, 1], [], []>} : vector<16x128xbf16>, vector<128x128xbf16>, vector<16x128xf32> -> vector<16x128xf32>
    %131 = arith.addf %76, %130 : vector<16x128xf32>
    %c0_97 = arith.constant 0 : index
    %c0_98 = arith.constant 0 : index
    %c0_99 = arith.constant 0 : index
    %132 = vector.load %arg6[%c0_97, %c0_98, %c0_99] : memref<2x1x128xf32, #tpu.memory_space<vmem>>, vector<1x1x128xf32>
    %133 = vector.shape_cast %132 : vector<1x1x128xf32> to vector<1x128xf32>
    %134 = vector.broadcast %133 : vector<1x128xf32> to vector<16x128xf32>
    %135 = arith.addf %131, %134 : vector<16x128xf32>
    %136 = arith.addf %19, %135 : vector<16x128xf32>
    %c0_100 = arith.constant 0 : index
    %c0_101 = arith.constant 0 : index
    %c0_102 = arith.constant 0 : index
    %c0_103 = arith.constant 0 : index
    %c0_104 = arith.constant 0 : index
    %137 = vector.load %arg7[%c0_100, %c0_101, %c0_102, %c0_103, %c0_104] : memref<2x2x2x1x128xf32, #tpu.memory_space<vmem>>, vector<1x1x1x1x128xf32>
    %138 = vector.shape_cast %137 : vector<1x1x1x1x128xf32> to vector<1x128xf32>
    %c0_105 = arith.constant 0 : index
    %c0_106 = arith.constant 0 : index
    %c1_107 = arith.constant 1 : index
    %c0_108 = arith.constant 0 : index
    %c0_109 = arith.constant 0 : index
    %139 = vector.load %arg7[%c0_105, %c0_106, %c1_107, %c0_108, %c0_109] : memref<2x2x2x1x128xf32, #tpu.memory_space<vmem>>, vector<1x1x1x1x128xf32>
    %140 = vector.shape_cast %139 : vector<1x1x1x1x128xf32> to vector<1x128xf32>
    %cst_110 = arith.constant dense<0.000000e+00> : vector<16xf32>
    %141 = vector.multi_reduction <add>, %136, %cst_110 [1] : vector<16x128xf32> to vector<16xf32>
    %142 = vector.shape_cast %141 : vector<16xf32> to vector<16x1xf32>
    %cst_111 = arith.constant 2.500000e-01 : f32
    %143 = vector.broadcast %cst_111 : f32 to vector<16x1xf32>
    %144 = arith.mulf %142, %143 : vector<16x1xf32>
    %145 = arith.mulf %136, %136 : vector<16x128xf32>
    %cst_112 = arith.constant dense<0.000000e+00> : vector<16xf32>
    %146 = vector.multi_reduction <add>, %145, %cst_112 [1] : vector<16x128xf32> to vector<16xf32>
    %147 = vector.shape_cast %146 : vector<16xf32> to vector<16x1xf32>
    %cst_113 = arith.constant 2.500000e-01 : f32
    %148 = vector.broadcast %cst_113 : f32 to vector<16x1xf32>
    %149 = arith.mulf %147, %148 : vector<16x1xf32>
    %150 = arith.mulf %144, %144 : vector<16x1xf32>
    %151 = arith.subf %149, %150 : vector<16x1xf32>
    %152 = vector.broadcast %144 : vector<16x1xf32> to vector<16x128xf32>
    %153 = arith.subf %136, %152 : vector<16x128xf32>
    %cst_114 = arith.constant 9.99999974E-6 : f32
    %154 = vector.broadcast %cst_114 : f32 to vector<16x1xf32>
    %155 = arith.addf %151, %154 : vector<16x1xf32>
    %156 = math.rsqrt %155 : vector<16x1xf32>
    %157 = vector.broadcast %156 : vector<16x1xf32> to vector<16x128xf32>
    %158 = arith.mulf %153, %157 : vector<16x128xf32>
    %159 = vector.broadcast %138 : vector<1x128xf32> to vector<16x128xf32>
    %160 = arith.mulf %158, %159 : vector<16x128xf32>
    %161 = vector.broadcast %140 : vector<1x128xf32> to vector<16x128xf32>
    %162 = arith.addf %160, %161 : vector<16x128xf32>
    %163 = vector.broadcast %4 : vector<16x1xf32> to vector<16x128xf32>
    %164 = arith.mulf %162, %163 : vector<16x128xf32>
    %cst_115 = arith.constant 0.000000e+00 : f32
    %165 = vector.broadcast %cst_115 : f32 to vector<16x128xf32>
    %c1_i32 = arith.constant 1 : i32
    %166 = tpu.dynamic_rotate %164 by %c1_i32 dim 0 : vector<16x128xf32>, i32 -> vector<16x128xf32>
    %c1_i32_116 = arith.constant 1 : i32
    %167 = vector.broadcast %c1_i32_116 : i32 to vector<16x1xi32>
    %168 = arith.cmpi sge, %17, %167 : vector<16x1xi32>
    %c17_i32 = arith.constant 17 : i32
    %169 = vector.broadcast %c17_i32 : i32 to vector<16x1xi32>
    %170 = arith.cmpi slt, %17, %169 : vector<16x1xi32>
    %171 = arith.andi %168, %170 : vector<16x1xi1>
    %cst_117 = arith.constant 0.000000e+00 : f32
    %172 = vector.shape_cast %171 : vector<16x1xi1> to vector<16x1xi1>
    %173 = vector.broadcast %172 : vector<16x1xi1> to vector<16x128xi1>
    %174 = vector.broadcast %cst_117 : f32 to vector<16x128xf32>
    %175 = arith.select %173, %166, %174 : vector<16x128xi1>, vector<16x128xf32>
    %176 = arith.truncf %175 : vector<16x128xf32> to vector<16x128xbf16>
    %c0_118 = arith.constant 0 : index
    %c0_119 = arith.constant 0 : index
    %c0_120 = arith.constant 0 : index
    %c0_121 = arith.constant 0 : index
    %c0_122 = arith.constant 0 : index
    %177 = vector.load %arg8[%c0_118, %c0_119, %c0_120, %c0_121, %c0_122] : memref<2x2x3x128x128xbf16, #tpu.memory_space<vmem>>, vector<1x1x1x128x128xbf16>
    %178 = vector.shape_cast %177 : vector<1x1x1x128x128xbf16> to vector<128x128xbf16>
    %cst_123 = arith.constant dense<0.000000e+00> : vector<16x128xf32>
    %179 = tpu.matmul %176, %178, %cst_123 {dimension_numbers = #tpu.dot_dimension_numbers<[1], [0], [0], [1], [0, 0, 1, 1], [], []>} : vector<16x128xbf16>, vector<128x128xbf16>, vector<16x128xf32> -> vector<16x128xf32>
    %180 = arith.addf %165, %179 : vector<16x128xf32>
    %181 = arith.truncf %164 : vector<16x128xf32> to vector<16x128xbf16>
    %c0_124 = arith.constant 0 : index
    %c0_125 = arith.constant 0 : index
    %c1_126 = arith.constant 1 : index
    %c0_127 = arith.constant 0 : index
    %c0_128 = arith.constant 0 : index
    %182 = vector.load %arg8[%c0_124, %c0_125, %c1_126, %c0_127, %c0_128] : memref<2x2x3x128x128xbf16, #tpu.memory_space<vmem>>, vector<1x1x1x128x128xbf16>
    %183 = vector.shape_cast %182 : vector<1x1x1x128x128xbf16> to vector<128x128xbf16>
    %cst_129 = arith.constant dense<0.000000e+00> : vector<16x128xf32>
    %184 = tpu.matmul %181, %183, %cst_129 {dimension_numbers = #tpu.dot_dimension_numbers<[1], [0], [0], [1], [0, 0, 1, 1], [], []>} : vector<16x128xbf16>, vector<128x128xbf16>, vector<16x128xf32> -> vector<16x128xf32>
    %185 = arith.addf %180, %184 : vector<16x128xf32>
    %c15_i32 = arith.constant 15 : i32
    %186 = tpu.dynamic_rotate %164 by %c15_i32 dim 0 : vector<16x128xf32>, i32 -> vector<16x128xf32>
    %c-1_i32 = arith.constant -1 : i32
    %187 = vector.broadcast %c-1_i32 : i32 to vector<16x1xi32>
    %188 = arith.cmpi sge, %17, %187 : vector<16x1xi32>
    %c15_i32_130 = arith.constant 15 : i32
    %189 = vector.broadcast %c15_i32_130 : i32 to vector<16x1xi32>
    %190 = arith.cmpi slt, %17, %189 : vector<16x1xi32>
    %191 = arith.andi %188, %190 : vector<16x1xi1>
    %cst_131 = arith.constant 0.000000e+00 : f32
    %192 = vector.shape_cast %191 : vector<16x1xi1> to vector<16x1xi1>
    %193 = vector.broadcast %192 : vector<16x1xi1> to vector<16x128xi1>
    %194 = vector.broadcast %cst_131 : f32 to vector<16x128xf32>
    %195 = arith.select %193, %186, %194 : vector<16x128xi1>, vector<16x128xf32>
    %196 = arith.truncf %195 : vector<16x128xf32> to vector<16x128xbf16>
    %c0_132 = arith.constant 0 : index
    %c0_133 = arith.constant 0 : index
    %c2_134 = arith.constant 2 : index
    %c0_135 = arith.constant 0 : index
    %c0_136 = arith.constant 0 : index
    %197 = vector.load %arg8[%c0_132, %c0_133, %c2_134, %c0_135, %c0_136] : memref<2x2x3x128x128xbf16, #tpu.memory_space<vmem>>, vector<1x1x1x128x128xbf16>
    %198 = vector.shape_cast %197 : vector<1x1x1x128x128xbf16> to vector<128x128xbf16>
    %cst_137 = arith.constant dense<0.000000e+00> : vector<16x128xf32>
    %199 = tpu.matmul %196, %198, %cst_137 {dimension_numbers = #tpu.dot_dimension_numbers<[1], [0], [0], [1], [0, 0, 1, 1], [], []>} : vector<16x128xbf16>, vector<128x128xbf16>, vector<16x128xf32> -> vector<16x128xf32>
    %200 = arith.addf %185, %199 : vector<16x128xf32>
    %c0_138 = arith.constant 0 : index
    %c0_139 = arith.constant 0 : index
    %c0_140 = arith.constant 0 : index
    %c0_141 = arith.constant 0 : index
    %201 = vector.load %arg9[%c0_138, %c0_139, %c0_140, %c0_141] : memref<2x2x1x128xf32, #tpu.memory_space<vmem>>, vector<1x1x1x128xf32>
    %202 = vector.shape_cast %201 : vector<1x1x1x128xf32> to vector<1x128xf32>
    %203 = vector.broadcast %202 : vector<1x128xf32> to vector<16x128xf32>
    %204 = arith.addf %200, %203 : vector<16x128xf32>
    %cst_142 = arith.constant 0.000000e+00 : f32
    %205 = vector.broadcast %cst_142 : f32 to vector<16x128xf32>
    %206 = arith.maximumf %204, %205 : vector<16x128xf32>
    %207 = vector.broadcast %4 : vector<16x1xf32> to vector<16x128xf32>
    %208 = arith.mulf %206, %207 : vector<16x128xf32>
    %cst_143 = arith.constant 0.000000e+00 : f32
    %209 = vector.broadcast %cst_143 : f32 to vector<16x128xf32>
    %c1_i32_144 = arith.constant 1 : i32
    %210 = tpu.dynamic_rotate %208 by %c1_i32_144 dim 0 : vector<16x128xf32>, i32 -> vector<16x128xf32>
    %c1_i32_145 = arith.constant 1 : i32
    %211 = vector.broadcast %c1_i32_145 : i32 to vector<16x1xi32>
    %212 = arith.cmpi sge, %17, %211 : vector<16x1xi32>
    %c17_i32_146 = arith.constant 17 : i32
    %213 = vector.broadcast %c17_i32_146 : i32 to vector<16x1xi32>
    %214 = arith.cmpi slt, %17, %213 : vector<16x1xi32>
    %215 = arith.andi %212, %214 : vector<16x1xi1>
    %cst_147 = arith.constant 0.000000e+00 : f32
    %216 = vector.shape_cast %215 : vector<16x1xi1> to vector<16x1xi1>
    %217 = vector.broadcast %216 : vector<16x1xi1> to vector<16x128xi1>
    %218 = vector.broadcast %cst_147 : f32 to vector<16x128xf32>
    %219 = arith.select %217, %210, %218 : vector<16x128xi1>, vector<16x128xf32>
    %220 = arith.truncf %219 : vector<16x128xf32> to vector<16x128xbf16>
    %c0_148 = arith.constant 0 : index
    %c1_149 = arith.constant 1 : index
    %c0_150 = arith.constant 0 : index
    %c0_151 = arith.constant 0 : index
    %c0_152 = arith.constant 0 : index
    %221 = vector.load %arg8[%c0_148, %c1_149, %c0_150, %c0_151, %c0_152] : memref<2x2x3x128x128xbf16, #tpu.memory_space<vmem>>, vector<1x1x1x128x128xbf16>
    %222 = vector.shape_cast %221 : vector<1x1x1x128x128xbf16> to vector<128x128xbf16>
    %cst_153 = arith.constant dense<0.000000e+00> : vector<16x128xf32>
    %223 = tpu.matmul %220, %222, %cst_153 {dimension_numbers = #tpu.dot_dimension_numbers<[1], [0], [0], [1], [0, 0, 1, 1], [], []>} : vector<16x128xbf16>, vector<128x128xbf16>, vector<16x128xf32> -> vector<16x128xf32>
    %224 = arith.addf %209, %223 : vector<16x128xf32>
    %225 = arith.truncf %208 : vector<16x128xf32> to vector<16x128xbf16>
    %c0_154 = arith.constant 0 : index
    %c1_155 = arith.constant 1 : index
    %c1_156 = arith.constant 1 : index
    %c0_157 = arith.constant 0 : index
    %c0_158 = arith.constant 0 : index
    %226 = vector.load %arg8[%c0_154, %c1_155, %c1_156, %c0_157, %c0_158] : memref<2x2x3x128x128xbf16, #tpu.memory_space<vmem>>, vector<1x1x1x128x128xbf16>
    %227 = vector.shape_cast %226 : vector<1x1x1x128x128xbf16> to vector<128x128xbf16>
    %cst_159 = arith.constant dense<0.000000e+00> : vector<16x128xf32>
    %228 = tpu.matmul %225, %227, %cst_159 {dimension_numbers = #tpu.dot_dimension_numbers<[1], [0], [0], [1], [0, 0, 1, 1], [], []>} : vector<16x128xbf16>, vector<128x128xbf16>, vector<16x128xf32> -> vector<16x128xf32>
    %229 = arith.addf %224, %228 : vector<16x128xf32>
    %c15_i32_160 = arith.constant 15 : i32
    %230 = tpu.dynamic_rotate %208 by %c15_i32_160 dim 0 : vector<16x128xf32>, i32 -> vector<16x128xf32>
    %c-1_i32_161 = arith.constant -1 : i32
    %231 = vector.broadcast %c-1_i32_161 : i32 to vector<16x1xi32>
    %232 = arith.cmpi sge, %17, %231 : vector<16x1xi32>
    %c15_i32_162 = arith.constant 15 : i32
    %233 = vector.broadcast %c15_i32_162 : i32 to vector<16x1xi32>
    %234 = arith.cmpi slt, %17, %233 : vector<16x1xi32>
    %235 = arith.andi %232, %234 : vector<16x1xi1>
    %cst_163 = arith.constant 0.000000e+00 : f32
    %236 = vector.shape_cast %235 : vector<16x1xi1> to vector<16x1xi1>
    %237 = vector.broadcast %236 : vector<16x1xi1> to vector<16x128xi1>
    %238 = vector.broadcast %cst_163 : f32 to vector<16x128xf32>
    %239 = arith.select %237, %230, %238 : vector<16x128xi1>, vector<16x128xf32>
    %240 = arith.truncf %239 : vector<16x128xf32> to vector<16x128xbf16>
    %c0_164 = arith.constant 0 : index
    %c1_165 = arith.constant 1 : index
    %c2_166 = arith.constant 2 : index
    %c0_167 = arith.constant 0 : index
    %c0_168 = arith.constant 0 : index
    %241 = vector.load %arg8[%c0_164, %c1_165, %c2_166, %c0_167, %c0_168] : memref<2x2x3x128x128xbf16, #tpu.memory_space<vmem>>, vector<1x1x1x128x128xbf16>
    %242 = vector.shape_cast %241 : vector<1x1x1x128x128xbf16> to vector<128x128xbf16>
    %cst_169 = arith.constant dense<0.000000e+00> : vector<16x128xf32>
    %243 = tpu.matmul %240, %242, %cst_169 {dimension_numbers = #tpu.dot_dimension_numbers<[1], [0], [0], [1], [0, 0, 1, 1], [], []>} : vector<16x128xbf16>, vector<128x128xbf16>, vector<16x128xf32> -> vector<16x128xf32>
    %244 = arith.addf %229, %243 : vector<16x128xf32>
    %c0_170 = arith.constant 0 : index
    %c1_171 = arith.constant 1 : index
    %c0_172 = arith.constant 0 : index
    %c0_173 = arith.constant 0 : index
    %245 = vector.load %arg9[%c0_170, %c1_171, %c0_172, %c0_173] : memref<2x2x1x128xf32, #tpu.memory_space<vmem>>, vector<1x1x1x128xf32>
    %246 = vector.shape_cast %245 : vector<1x1x1x128xf32> to vector<1x128xf32>
    %247 = vector.broadcast %246 : vector<1x128xf32> to vector<16x128xf32>
    %248 = arith.addf %244, %247 : vector<16x128xf32>
    %249 = vector.broadcast %4 : vector<16x1xf32> to vector<16x128xf32>
    %250 = arith.mulf %248, %249 : vector<16x128xf32>
    %251 = arith.addf %162, %250 : vector<16x128xf32>
    %c0_174 = arith.constant 0 : index
    %c1_175 = arith.constant 1 : index
    %c0_176 = arith.constant 0 : index
    %c0_177 = arith.constant 0 : index
    %c0_178 = arith.constant 0 : index
    %252 = vector.load %arg7[%c0_174, %c1_175, %c0_176, %c0_177, %c0_178] : memref<2x2x2x1x128xf32, #tpu.memory_space<vmem>>, vector<1x1x1x1x128xf32>
    %253 = vector.shape_cast %252 : vector<1x1x1x1x128xf32> to vector<1x128xf32>
    %c0_179 = arith.constant 0 : index
    %c1_180 = arith.constant 1 : index
    %c1_181 = arith.constant 1 : index
    %c0_182 = arith.constant 0 : index
    %c0_183 = arith.constant 0 : index
    %254 = vector.load %arg7[%c0_179, %c1_180, %c1_181, %c0_182, %c0_183] : memref<2x2x2x1x128xf32, #tpu.memory_space<vmem>>, vector<1x1x1x1x128xf32>
    %255 = vector.shape_cast %254 : vector<1x1x1x1x128xf32> to vector<1x128xf32>
    %cst_184 = arith.constant dense<0.000000e+00> : vector<16xf32>
    %256 = vector.multi_reduction <add>, %251, %cst_184 [1] : vector<16x128xf32> to vector<16xf32>
    %257 = vector.shape_cast %256 : vector<16xf32> to vector<16x1xf32>
    %cst_185 = arith.constant 2.500000e-01 : f32
    %258 = vector.broadcast %cst_185 : f32 to vector<16x1xf32>
    %259 = arith.mulf %257, %258 : vector<16x1xf32>
    %260 = arith.mulf %251, %251 : vector<16x128xf32>
    %cst_186 = arith.constant dense<0.000000e+00> : vector<16xf32>
    %261 = vector.multi_reduction <add>, %260, %cst_186 [1] : vector<16x128xf32> to vector<16xf32>
    %262 = vector.shape_cast %261 : vector<16xf32> to vector<16x1xf32>
    %cst_187 = arith.constant 2.500000e-01 : f32
    %263 = vector.broadcast %cst_187 : f32 to vector<16x1xf32>
    %264 = arith.mulf %262, %263 : vector<16x1xf32>
    %265 = arith.mulf %259, %259 : vector<16x1xf32>
    %266 = arith.subf %264, %265 : vector<16x1xf32>
    %267 = vector.broadcast %259 : vector<16x1xf32> to vector<16x128xf32>
    %268 = arith.subf %251, %267 : vector<16x128xf32>
    %cst_188 = arith.constant 9.99999974E-6 : f32
    %269 = vector.broadcast %cst_188 : f32 to vector<16x1xf32>
    %270 = arith.addf %266, %269 : vector<16x1xf32>
    %271 = math.rsqrt %270 : vector<16x1xf32>
    %272 = vector.broadcast %271 : vector<16x1xf32> to vector<16x128xf32>
    %273 = arith.mulf %268, %272 : vector<16x128xf32>
    %274 = vector.broadcast %253 : vector<1x128xf32> to vector<16x128xf32>
    %275 = arith.mulf %273, %274 : vector<16x128xf32>
    %276 = vector.broadcast %255 : vector<1x128xf32> to vector<16x128xf32>
    %277 = arith.addf %275, %276 : vector<16x128xf32>
    %278 = arith.truncf %277 : vector<16x128xf32> to vector<16x128xbf16>
    %cst_189 = arith.constant 0.000000e+00 : f32
    %279 = vector.broadcast %cst_189 : f32 to vector<16x128xf32>
    %c1_190 = arith.constant 1 : index
    %c0_191 = arith.constant 0 : index
    %c0_192 = arith.constant 0 : index
    %c0_193 = arith.constant 0 : index
    %c0_194 = arith.constant 0 : index
    %280 = vector.load %arg3[%c1_190, %c0_191, %c0_192, %c0_193, %c0_194] : memref<2x3x2x128x128xbf16, #tpu.memory_space<vmem>>, vector<1x1x1x128x128xbf16>
    %281 = vector.shape_cast %280 : vector<1x1x1x128x128xbf16> to vector<128x128xbf16>
    %cst_195 = arith.constant dense<0.000000e+00> : vector<16x128xf32>
    %282 = tpu.matmul %278, %281, %cst_195 {dimension_numbers = #tpu.dot_dimension_numbers<[1], [0], [0], [1], [0, 0, 1, 1], [], []>} : vector<16x128xbf16>, vector<128x128xbf16>, vector<16x128xf32> -> vector<16x128xf32>
    %c1_196 = arith.constant 1 : index
    %c0_197 = arith.constant 0 : index
    %c0_198 = arith.constant 0 : index
    %c0_199 = arith.constant 0 : index
    %c0_200 = arith.constant 0 : index
    %283 = vector.load %arg4[%c1_196, %c0_197, %c0_198, %c0_199, %c0_200] : memref<2x3x2x1x128xf32, #tpu.memory_space<vmem>>, vector<1x1x1x1x128xf32>
    %284 = vector.shape_cast %283 : vector<1x1x1x1x128xf32> to vector<1x128xf32>
    %285 = vector.broadcast %284 : vector<1x128xf32> to vector<16x128xf32>
    %286 = arith.addf %282, %285 : vector<16x128xf32>
    %c1_201 = arith.constant 1 : index
    %c1_202 = arith.constant 1 : index
    %c0_203 = arith.constant 0 : index
    %c0_204 = arith.constant 0 : index
    %c0_205 = arith.constant 0 : index
    %287 = vector.load %arg3[%c1_201, %c1_202, %c0_203, %c0_204, %c0_205] : memref<2x3x2x128x128xbf16, #tpu.memory_space<vmem>>, vector<1x1x1x128x128xbf16>
    %288 = vector.shape_cast %287 : vector<1x1x1x128x128xbf16> to vector<128x128xbf16>
    %cst_206 = arith.constant dense<0.000000e+00> : vector<16x128xf32>
    %289 = tpu.matmul %278, %288, %cst_206 {dimension_numbers = #tpu.dot_dimension_numbers<[1], [0], [0], [1], [0, 0, 1, 1], [], []>} : vector<16x128xbf16>, vector<128x128xbf16>, vector<16x128xf32> -> vector<16x128xf32>
    %c1_207 = arith.constant 1 : index
    %c1_208 = arith.constant 1 : index
    %c0_209 = arith.constant 0 : index
    %c0_210 = arith.constant 0 : index
    %c0_211 = arith.constant 0 : index
    %290 = vector.load %arg4[%c1_207, %c1_208, %c0_209, %c0_210, %c0_211] : memref<2x3x2x1x128xf32, #tpu.memory_space<vmem>>, vector<1x1x1x1x128xf32>
    %291 = vector.shape_cast %290 : vector<1x1x1x1x128xf32> to vector<1x128xf32>
    %292 = vector.broadcast %291 : vector<1x128xf32> to vector<16x128xf32>
    %293 = arith.addf %289, %292 : vector<16x128xf32>
    %c1_212 = arith.constant 1 : index
    %c2_213 = arith.constant 2 : index
    %c0_214 = arith.constant 0 : index
    %c0_215 = arith.constant 0 : index
    %c0_216 = arith.constant 0 : index
    %294 = vector.load %arg3[%c1_212, %c2_213, %c0_214, %c0_215, %c0_216] : memref<2x3x2x128x128xbf16, #tpu.memory_space<vmem>>, vector<1x1x1x128x128xbf16>
    %295 = vector.shape_cast %294 : vector<1x1x1x128x128xbf16> to vector<128x128xbf16>
    %cst_217 = arith.constant dense<0.000000e+00> : vector<16x128xf32>
    %296 = tpu.matmul %278, %295, %cst_217 {dimension_numbers = #tpu.dot_dimension_numbers<[1], [0], [0], [1], [0, 0, 1, 1], [], []>} : vector<16x128xbf16>, vector<128x128xbf16>, vector<16x128xf32> -> vector<16x128xf32>
    %c1_218 = arith.constant 1 : index
    %c2_219 = arith.constant 2 : index
    %c0_220 = arith.constant 0 : index
    %c0_221 = arith.constant 0 : index
    %c0_222 = arith.constant 0 : index
    %297 = vector.load %arg4[%c1_218, %c2_219, %c0_220, %c0_221, %c0_222] : memref<2x3x2x1x128xf32, #tpu.memory_space<vmem>>, vector<1x1x1x1x128xf32>
    %298 = vector.shape_cast %297 : vector<1x1x1x1x128xf32> to vector<1x128xf32>
    %299 = vector.broadcast %298 : vector<1x128xf32> to vector<16x128xf32>
    %300 = arith.addf %296, %299 : vector<16x128xf32>
    %301 = arith.truncf %286 : vector<16x128xf32> to vector<16x128xbf16>
    %302 = arith.truncf %293 : vector<16x128xf32> to vector<16x128xbf16>
    %303 = arith.truncf %300 : vector<16x128xf32> to vector<16x128xbf16>
    %cst_223 = arith.constant -1.000000e+30 : f32
    %304 = vector.broadcast %cst_223 : f32 to vector<16x1xf32>
    %cst_224 = arith.constant 0.000000e+00 : f32
    %305 = vector.broadcast %cst_224 : f32 to vector<16x1xf32>
    %cst_225 = arith.constant 0.000000e+00 : f32
    %306 = vector.broadcast %cst_225 : f32 to vector<16x128xf32>
    %cst_226 = arith.constant dense<0.000000e+00> : vector<16x16xf32>
    %307 = tpu.matmul %301, %302, %cst_226 {dimension_numbers = #tpu.dot_dimension_numbers<[1], [1], [0], [0], [0, 0, 1, 0], [], []>} : vector<16x128xbf16>, vector<16x128xbf16>, vector<16x16xf32> -> vector<16x16xf32>
    %308 = vector.broadcast %8 : vector<1x16xf32> to vector<16x16xf32>
    %309 = arith.addf %307, %308 : vector<16x16xf32>
    %cst_227 = arith.constant dense<0xFF800000> : vector<16xf32>
    %310 = vector.multi_reduction <maximumf>, %309, %cst_227 [1] : vector<16x16xf32> to vector<16xf32>
    %311 = vector.shape_cast %310 : vector<16xf32> to vector<16x1xf32>
    %312 = arith.maximumf %304, %311 : vector<16x1xf32>
    %313 = arith.subf %304, %312 : vector<16x1xf32>
    %314 = math.exp %313 : vector<16x1xf32>
    %315 = vector.broadcast %312 : vector<16x1xf32> to vector<16x16xf32>
    %316 = arith.subf %309, %315 : vector<16x16xf32>
    %317 = math.exp %316 : vector<16x16xf32>
    %318 = arith.mulf %314, %305 : vector<16x1xf32>
    %cst_228 = arith.constant dense<0.000000e+00> : vector<16xf32>
    %319 = vector.multi_reduction <add>, %317, %cst_228 [1] : vector<16x16xf32> to vector<16xf32>
    %320 = vector.shape_cast %319 : vector<16xf32> to vector<16x1xf32>
    %321 = arith.addf %318, %320 : vector<16x1xf32>
    %322 = vector.broadcast %314 : vector<16x1xf32> to vector<16x128xf32>
    %323 = arith.mulf %322, %306 : vector<16x128xf32>
    %324 = arith.truncf %317 : vector<16x16xf32> to vector<16x16xbf16>
    %cst_229 = arith.constant dense<0.000000e+00> : vector<16x128xf32>
    %325 = tpu.matmul %324, %303, %cst_229 {dimension_numbers = #tpu.dot_dimension_numbers<[1], [0], [0], [1], [0, 0, 1, 1], [], []>} : vector<16x16xbf16>, vector<16x128xbf16>, vector<16x128xf32> -> vector<16x128xf32>
    %326 = arith.addf %323, %325 : vector<16x128xf32>
    %327 = tpu.reciprocal %321 {approx = true} : vector<16x1xf32> -> vector<16x1xf32>
    %328 = vector.broadcast %327 : vector<16x1xf32> to vector<16x128xf32>
    %329 = arith.mulf %326, %328 : vector<16x128xf32>
    %330 = arith.truncf %329 : vector<16x128xf32> to vector<16x128xbf16>
    %c1_230 = arith.constant 1 : index
    %c0_231 = arith.constant 0 : index
    %c0_232 = arith.constant 0 : index
    %c0_233 = arith.constant 0 : index
    %331 = vector.load %arg5[%c1_230, %c0_231, %c0_232, %c0_233] : memref<2x2x128x128xbf16, #tpu.memory_space<vmem>>, vector<1x1x128x128xbf16>
    %332 = vector.shape_cast %331 : vector<1x1x128x128xbf16> to vector<128x128xbf16>
    %cst_234 = arith.constant dense<0.000000e+00> : vector<16x128xf32>
    %333 = tpu.matmul %330, %332, %cst_234 {dimension_numbers = #tpu.dot_dimension_numbers<[1], [0], [0], [1], [0, 0, 1, 1], [], []>} : vector<16x128xbf16>, vector<128x128xbf16>, vector<16x128xf32> -> vector<16x128xf32>
    %334 = arith.addf %279, %333 : vector<16x128xf32>
    %c1_235 = arith.constant 1 : index
    %c0_236 = arith.constant 0 : index
    %c1_237 = arith.constant 1 : index
    %c0_238 = arith.constant 0 : index
    %c0_239 = arith.constant 0 : index
    %335 = vector.load %arg3[%c1_235, %c0_236, %c1_237, %c0_238, %c0_239] : memref<2x3x2x128x128xbf16, #tpu.memory_space<vmem>>, vector<1x1x1x128x128xbf16>
    %336 = vector.shape_cast %335 : vector<1x1x1x128x128xbf16> to vector<128x128xbf16>
    %cst_240 = arith.constant dense<0.000000e+00> : vector<16x128xf32>
    %337 = tpu.matmul %278, %336, %cst_240 {dimension_numbers = #tpu.dot_dimension_numbers<[1], [0], [0], [1], [0, 0, 1, 1], [], []>} : vector<16x128xbf16>, vector<128x128xbf16>, vector<16x128xf32> -> vector<16x128xf32>
    %c1_241 = arith.constant 1 : index
    %c0_242 = arith.constant 0 : index
    %c1_243 = arith.constant 1 : index
    %c0_244 = arith.constant 0 : index
    %c0_245 = arith.constant 0 : index
    %338 = vector.load %arg4[%c1_241, %c0_242, %c1_243, %c0_244, %c0_245] : memref<2x3x2x1x128xf32, #tpu.memory_space<vmem>>, vector<1x1x1x1x128xf32>
    %339 = vector.shape_cast %338 : vector<1x1x1x1x128xf32> to vector<1x128xf32>
    %340 = vector.broadcast %339 : vector<1x128xf32> to vector<16x128xf32>
    %341 = arith.addf %337, %340 : vector<16x128xf32>
    %c1_246 = arith.constant 1 : index
    %c1_247 = arith.constant 1 : index
    %c1_248 = arith.constant 1 : index
    %c0_249 = arith.constant 0 : index
    %c0_250 = arith.constant 0 : index
    %342 = vector.load %arg3[%c1_246, %c1_247, %c1_248, %c0_249, %c0_250] : memref<2x3x2x128x128xbf16, #tpu.memory_space<vmem>>, vector<1x1x1x128x128xbf16>
    %343 = vector.shape_cast %342 : vector<1x1x1x128x128xbf16> to vector<128x128xbf16>
    %cst_251 = arith.constant dense<0.000000e+00> : vector<16x128xf32>
    %344 = tpu.matmul %278, %343, %cst_251 {dimension_numbers = #tpu.dot_dimension_numbers<[1], [0], [0], [1], [0, 0, 1, 1], [], []>} : vector<16x128xbf16>, vector<128x128xbf16>, vector<16x128xf32> -> vector<16x128xf32>
    %c1_252 = arith.constant 1 : index
    %c1_253 = arith.constant 1 : index
    %c1_254 = arith.constant 1 : index
    %c0_255 = arith.constant 0 : index
    %c0_256 = arith.constant 0 : index
    %345 = vector.load %arg4[%c1_252, %c1_253, %c1_254, %c0_255, %c0_256] : memref<2x3x2x1x128xf32, #tpu.memory_space<vmem>>, vector<1x1x1x1x128xf32>
    %346 = vector.shape_cast %345 : vector<1x1x1x1x128xf32> to vector<1x128xf32>
    %347 = vector.broadcast %346 : vector<1x128xf32> to vector<16x128xf32>
    %348 = arith.addf %344, %347 : vector<16x128xf32>
    %c1_257 = arith.constant 1 : index
    %c2_258 = arith.constant 2 : index
    %c1_259 = arith.constant 1 : index
    %c0_260 = arith.constant 0 : index
    %c0_261 = arith.constant 0 : index
    %349 = vector.load %arg3[%c1_257, %c2_258, %c1_259, %c0_260, %c0_261] : memref<2x3x2x128x128xbf16, #tpu.memory_space<vmem>>, vector<1x1x1x128x128xbf16>
    %350 = vector.shape_cast %349 : vector<1x1x1x128x128xbf16> to vector<128x128xbf16>
    %cst_262 = arith.constant dense<0.000000e+00> : vector<16x128xf32>
    %351 = tpu.matmul %278, %350, %cst_262 {dimension_numbers = #tpu.dot_dimension_numbers<[1], [0], [0], [1], [0, 0, 1, 1], [], []>} : vector<16x128xbf16>, vector<128x128xbf16>, vector<16x128xf32> -> vector<16x128xf32>
    %c1_263 = arith.constant 1 : index
    %c2_264 = arith.constant 2 : index
    %c1_265 = arith.constant 1 : index
    %c0_266 = arith.constant 0 : index
    %c0_267 = arith.constant 0 : index
    %352 = vector.load %arg4[%c1_263, %c2_264, %c1_265, %c0_266, %c0_267] : memref<2x3x2x1x128xf32, #tpu.memory_space<vmem>>, vector<1x1x1x1x128xf32>
    %353 = vector.shape_cast %352 : vector<1x1x1x1x128xf32> to vector<1x128xf32>
    %354 = vector.broadcast %353 : vector<1x128xf32> to vector<16x128xf32>
    %355 = arith.addf %351, %354 : vector<16x128xf32>
    %356 = arith.truncf %341 : vector<16x128xf32> to vector<16x128xbf16>
    %357 = arith.truncf %348 : vector<16x128xf32> to vector<16x128xbf16>
    %358 = arith.truncf %355 : vector<16x128xf32> to vector<16x128xbf16>
    %cst_268 = arith.constant -1.000000e+30 : f32
    %359 = vector.broadcast %cst_268 : f32 to vector<16x1xf32>
    %cst_269 = arith.constant 0.000000e+00 : f32
    %360 = vector.broadcast %cst_269 : f32 to vector<16x1xf32>
    %cst_270 = arith.constant 0.000000e+00 : f32
    %361 = vector.broadcast %cst_270 : f32 to vector<16x128xf32>
    %cst_271 = arith.constant dense<0.000000e+00> : vector<16x16xf32>
    %362 = tpu.matmul %356, %357, %cst_271 {dimension_numbers = #tpu.dot_dimension_numbers<[1], [1], [0], [0], [0, 0, 1, 0], [], []>} : vector<16x128xbf16>, vector<16x128xbf16>, vector<16x16xf32> -> vector<16x16xf32>
    %363 = vector.broadcast %8 : vector<1x16xf32> to vector<16x16xf32>
    %364 = arith.addf %362, %363 : vector<16x16xf32>
    %cst_272 = arith.constant dense<0xFF800000> : vector<16xf32>
    %365 = vector.multi_reduction <maximumf>, %364, %cst_272 [1] : vector<16x16xf32> to vector<16xf32>
    %366 = vector.shape_cast %365 : vector<16xf32> to vector<16x1xf32>
    %367 = arith.maximumf %359, %366 : vector<16x1xf32>
    %368 = arith.subf %359, %367 : vector<16x1xf32>
    %369 = math.exp %368 : vector<16x1xf32>
    %370 = vector.broadcast %367 : vector<16x1xf32> to vector<16x16xf32>
    %371 = arith.subf %364, %370 : vector<16x16xf32>
    %372 = math.exp %371 : vector<16x16xf32>
    %373 = arith.mulf %369, %360 : vector<16x1xf32>
    %cst_273 = arith.constant dense<0.000000e+00> : vector<16xf32>
    %374 = vector.multi_reduction <add>, %372, %cst_273 [1] : vector<16x16xf32> to vector<16xf32>
    %375 = vector.shape_cast %374 : vector<16xf32> to vector<16x1xf32>
    %376 = arith.addf %373, %375 : vector<16x1xf32>
    %377 = vector.broadcast %369 : vector<16x1xf32> to vector<16x128xf32>
    %378 = arith.mulf %377, %361 : vector<16x128xf32>
    %379 = arith.truncf %372 : vector<16x16xf32> to vector<16x16xbf16>
    %cst_274 = arith.constant dense<0.000000e+00> : vector<16x128xf32>
    %380 = tpu.matmul %379, %358, %cst_274 {dimension_numbers = #tpu.dot_dimension_numbers<[1], [0], [0], [1], [0, 0, 1, 1], [], []>} : vector<16x16xbf16>, vector<16x128xbf16>, vector<16x128xf32> -> vector<16x128xf32>
    %381 = arith.addf %378, %380 : vector<16x128xf32>
    %382 = tpu.reciprocal %376 {approx = true} : vector<16x1xf32> -> vector<16x1xf32>
    %383 = vector.broadcast %382 : vector<16x1xf32> to vector<16x128xf32>
    %384 = arith.mulf %381, %383 : vector<16x128xf32>
    %385 = arith.truncf %384 : vector<16x128xf32> to vector<16x128xbf16>
    %c1_275 = arith.constant 1 : index
    %c1_276 = arith.constant 1 : index
    %c0_277 = arith.constant 0 : index
    %c0_278 = arith.constant 0 : index
    %386 = vector.load %arg5[%c1_275, %c1_276, %c0_277, %c0_278] : memref<2x2x128x128xbf16, #tpu.memory_space<vmem>>, vector<1x1x128x128xbf16>
    %387 = vector.shape_cast %386 : vector<1x1x128x128xbf16> to vector<128x128xbf16>
    %cst_279 = arith.constant dense<0.000000e+00> : vector<16x128xf32>
    %388 = tpu.matmul %385, %387, %cst_279 {dimension_numbers = #tpu.dot_dimension_numbers<[1], [0], [0], [1], [0, 0, 1, 1], [], []>} : vector<16x128xbf16>, vector<128x128xbf16>, vector<16x128xf32> -> vector<16x128xf32>
    %389 = arith.addf %334, %388 : vector<16x128xf32>
    %c1_280 = arith.constant 1 : index
    %c0_281 = arith.constant 0 : index
    %c0_282 = arith.constant 0 : index
    %390 = vector.load %arg6[%c1_280, %c0_281, %c0_282] : memref<2x1x128xf32, #tpu.memory_space<vmem>>, vector<1x1x128xf32>
    %391 = vector.shape_cast %390 : vector<1x1x128xf32> to vector<1x128xf32>
    %392 = vector.broadcast %391 : vector<1x128xf32> to vector<16x128xf32>
    %393 = arith.addf %389, %392 : vector<16x128xf32>
    %394 = arith.addf %277, %393 : vector<16x128xf32>
    %c1_283 = arith.constant 1 : index
    %c0_284 = arith.constant 0 : index
    %c0_285 = arith.constant 0 : index
    %c0_286 = arith.constant 0 : index
    %c0_287 = arith.constant 0 : index
    %395 = vector.load %arg7[%c1_283, %c0_284, %c0_285, %c0_286, %c0_287] : memref<2x2x2x1x128xf32, #tpu.memory_space<vmem>>, vector<1x1x1x1x128xf32>
    %396 = vector.shape_cast %395 : vector<1x1x1x1x128xf32> to vector<1x128xf32>
    %c1_288 = arith.constant 1 : index
    %c0_289 = arith.constant 0 : index
    %c1_290 = arith.constant 1 : index
    %c0_291 = arith.constant 0 : index
    %c0_292 = arith.constant 0 : index
    %397 = vector.load %arg7[%c1_288, %c0_289, %c1_290, %c0_291, %c0_292] : memref<2x2x2x1x128xf32, #tpu.memory_space<vmem>>, vector<1x1x1x1x128xf32>
    %398 = vector.shape_cast %397 : vector<1x1x1x1x128xf32> to vector<1x128xf32>
    %cst_293 = arith.constant dense<0.000000e+00> : vector<16xf32>
    %399 = vector.multi_reduction <add>, %394, %cst_293 [1] : vector<16x128xf32> to vector<16xf32>
    %400 = vector.shape_cast %399 : vector<16xf32> to vector<16x1xf32>
    %cst_294 = arith.constant 2.500000e-01 : f32
    %401 = vector.broadcast %cst_294 : f32 to vector<16x1xf32>
    %402 = arith.mulf %400, %401 : vector<16x1xf32>
    %403 = arith.mulf %394, %394 : vector<16x128xf32>
    %cst_295 = arith.constant dense<0.000000e+00> : vector<16xf32>
    %404 = vector.multi_reduction <add>, %403, %cst_295 [1] : vector<16x128xf32> to vector<16xf32>
    %405 = vector.shape_cast %404 : vector<16xf32> to vector<16x1xf32>
    %cst_296 = arith.constant 2.500000e-01 : f32
    %406 = vector.broadcast %cst_296 : f32 to vector<16x1xf32>
    %407 = arith.mulf %405, %406 : vector<16x1xf32>
    %408 = arith.mulf %402, %402 : vector<16x1xf32>
    %409 = arith.subf %407, %408 : vector<16x1xf32>
    %410 = vector.broadcast %402 : vector<16x1xf32> to vector<16x128xf32>
    %411 = arith.subf %394, %410 : vector<16x128xf32>
    %cst_297 = arith.constant 9.99999974E-6 : f32
    %412 = vector.broadcast %cst_297 : f32 to vector<16x1xf32>
    %413 = arith.addf %409, %412 : vector<16x1xf32>
    %414 = math.rsqrt %413 : vector<16x1xf32>
    %415 = vector.broadcast %414 : vector<16x1xf32> to vector<16x128xf32>
    %416 = arith.mulf %411, %415 : vector<16x128xf32>
    %417 = vector.broadcast %396 : vector<1x128xf32> to vector<16x128xf32>
    %418 = arith.mulf %416, %417 : vector<16x128xf32>
    %419 = vector.broadcast %398 : vector<1x128xf32> to vector<16x128xf32>
    %420 = arith.addf %418, %419 : vector<16x128xf32>
    %421 = vector.broadcast %4 : vector<16x1xf32> to vector<16x128xf32>
    %422 = arith.mulf %420, %421 : vector<16x128xf32>
    %cst_298 = arith.constant 0.000000e+00 : f32
    %423 = vector.broadcast %cst_298 : f32 to vector<16x128xf32>
    %c1_i32_299 = arith.constant 1 : i32
    %424 = tpu.dynamic_rotate %422 by %c1_i32_299 dim 0 : vector<16x128xf32>, i32 -> vector<16x128xf32>
    %c1_i32_300 = arith.constant 1 : i32
    %425 = vector.broadcast %c1_i32_300 : i32 to vector<16x1xi32>
    %426 = arith.cmpi sge, %17, %425 : vector<16x1xi32>
    %c17_i32_301 = arith.constant 17 : i32
    %427 = vector.broadcast %c17_i32_301 : i32 to vector<16x1xi32>
    %428 = arith.cmpi slt, %17, %427 : vector<16x1xi32>
    %429 = arith.andi %426, %428 : vector<16x1xi1>
    %cst_302 = arith.constant 0.000000e+00 : f32
    %430 = vector.shape_cast %429 : vector<16x1xi1> to vector<16x1xi1>
    %431 = vector.broadcast %430 : vector<16x1xi1> to vector<16x128xi1>
    %432 = vector.broadcast %cst_302 : f32 to vector<16x128xf32>
    %433 = arith.select %431, %424, %432 : vector<16x128xi1>, vector<16x128xf32>
    %434 = arith.truncf %433 : vector<16x128xf32> to vector<16x128xbf16>
    %c1_303 = arith.constant 1 : index
    %c0_304 = arith.constant 0 : index
    %c0_305 = arith.constant 0 : index
    %c0_306 = arith.constant 0 : index
    %c0_307 = arith.constant 0 : index
    %435 = vector.load %arg8[%c1_303, %c0_304, %c0_305, %c0_306, %c0_307] : memref<2x2x3x128x128xbf16, #tpu.memory_space<vmem>>, vector<1x1x1x128x128xbf16>
    %436 = vector.shape_cast %435 : vector<1x1x1x128x128xbf16> to vector<128x128xbf16>
    %cst_308 = arith.constant dense<0.000000e+00> : vector<16x128xf32>
    %437 = tpu.matmul %434, %436, %cst_308 {dimension_numbers = #tpu.dot_dimension_numbers<[1], [0], [0], [1], [0, 0, 1, 1], [], []>} : vector<16x128xbf16>, vector<128x128xbf16>, vector<16x128xf32> -> vector<16x128xf32>
    %438 = arith.addf %423, %437 : vector<16x128xf32>
    %439 = arith.truncf %422 : vector<16x128xf32> to vector<16x128xbf16>
    %c1_309 = arith.constant 1 : index
    %c0_310 = arith.constant 0 : index
    %c1_311 = arith.constant 1 : index
    %c0_312 = arith.constant 0 : index
    %c0_313 = arith.constant 0 : index
    %440 = vector.load %arg8[%c1_309, %c0_310, %c1_311, %c0_312, %c0_313] : memref<2x2x3x128x128xbf16, #tpu.memory_space<vmem>>, vector<1x1x1x128x128xbf16>
    %441 = vector.shape_cast %440 : vector<1x1x1x128x128xbf16> to vector<128x128xbf16>
    %cst_314 = arith.constant dense<0.000000e+00> : vector<16x128xf32>
    %442 = tpu.matmul %439, %441, %cst_314 {dimension_numbers = #tpu.dot_dimension_numbers<[1], [0], [0], [1], [0, 0, 1, 1], [], []>} : vector<16x128xbf16>, vector<128x128xbf16>, vector<16x128xf32> -> vector<16x128xf32>
    %443 = arith.addf %438, %442 : vector<16x128xf32>
    %c15_i32_315 = arith.constant 15 : i32
    %444 = tpu.dynamic_rotate %422 by %c15_i32_315 dim 0 : vector<16x128xf32>, i32 -> vector<16x128xf32>
    %c-1_i32_316 = arith.constant -1 : i32
    %445 = vector.broadcast %c-1_i32_316 : i32 to vector<16x1xi32>
    %446 = arith.cmpi sge, %17, %445 : vector<16x1xi32>
    %c15_i32_317 = arith.constant 15 : i32
    %447 = vector.broadcast %c15_i32_317 : i32 to vector<16x1xi32>
    %448 = arith.cmpi slt, %17, %447 : vector<16x1xi32>
    %449 = arith.andi %446, %448 : vector<16x1xi1>
    %cst_318 = arith.constant 0.000000e+00 : f32
    %450 = vector.shape_cast %449 : vector<16x1xi1> to vector<16x1xi1>
    %451 = vector.broadcast %450 : vector<16x1xi1> to vector<16x128xi1>
    %452 = vector.broadcast %cst_318 : f32 to vector<16x128xf32>
    %453 = arith.select %451, %444, %452 : vector<16x128xi1>, vector<16x128xf32>
    %454 = arith.truncf %453 : vector<16x128xf32> to vector<16x128xbf16>
    %c1_319 = arith.constant 1 : index
    %c0_320 = arith.constant 0 : index
    %c2_321 = arith.constant 2 : index
    %c0_322 = arith.constant 0 : index
    %c0_323 = arith.constant 0 : index
    %455 = vector.load %arg8[%c1_319, %c0_320, %c2_321, %c0_322, %c0_323] : memref<2x2x3x128x128xbf16, #tpu.memory_space<vmem>>, vector<1x1x1x128x128xbf16>
    %456 = vector.shape_cast %455 : vector<1x1x1x128x128xbf16> to vector<128x128xbf16>
    %cst_324 = arith.constant dense<0.000000e+00> : vector<16x128xf32>
    %457 = tpu.matmul %454, %456, %cst_324 {dimension_numbers = #tpu.dot_dimension_numbers<[1], [0], [0], [1], [0, 0, 1, 1], [], []>} : vector<16x128xbf16>, vector<128x128xbf16>, vector<16x128xf32> -> vector<16x128xf32>
    %458 = arith.addf %443, %457 : vector<16x128xf32>
    %c1_325 = arith.constant 1 : index
    %c0_326 = arith.constant 0 : index
    %c0_327 = arith.constant 0 : index
    %c0_328 = arith.constant 0 : index
    %459 = vector.load %arg9[%c1_325, %c0_326, %c0_327, %c0_328] : memref<2x2x1x128xf32, #tpu.memory_space<vmem>>, vector<1x1x1x128xf32>
    %460 = vector.shape_cast %459 : vector<1x1x1x128xf32> to vector<1x128xf32>
    %461 = vector.broadcast %460 : vector<1x128xf32> to vector<16x128xf32>
    %462 = arith.addf %458, %461 : vector<16x128xf32>
    %cst_329 = arith.constant 0.000000e+00 : f32
    %463 = vector.broadcast %cst_329 : f32 to vector<16x128xf32>
    %464 = arith.maximumf %462, %463 : vector<16x128xf32>
    %465 = vector.broadcast %4 : vector<16x1xf32> to vector<16x128xf32>
    %466 = arith.mulf %464, %465 : vector<16x128xf32>
    %cst_330 = arith.constant 0.000000e+00 : f32
    %467 = vector.broadcast %cst_330 : f32 to vector<16x128xf32>
    %c1_i32_331 = arith.constant 1 : i32
    %468 = tpu.dynamic_rotate %466 by %c1_i32_331 dim 0 : vector<16x128xf32>, i32 -> vector<16x128xf32>
    %c1_i32_332 = arith.constant 1 : i32
    %469 = vector.broadcast %c1_i32_332 : i32 to vector<16x1xi32>
    %470 = arith.cmpi sge, %17, %469 : vector<16x1xi32>
    %c17_i32_333 = arith.constant 17 : i32
    %471 = vector.broadcast %c17_i32_333 : i32 to vector<16x1xi32>
    %472 = arith.cmpi slt, %17, %471 : vector<16x1xi32>
    %473 = arith.andi %470, %472 : vector<16x1xi1>
    %cst_334 = arith.constant 0.000000e+00 : f32
    %474 = vector.shape_cast %473 : vector<16x1xi1> to vector<16x1xi1>
    %475 = vector.broadcast %474 : vector<16x1xi1> to vector<16x128xi1>
    %476 = vector.broadcast %cst_334 : f32 to vector<16x128xf32>
    %477 = arith.select %475, %468, %476 : vector<16x128xi1>, vector<16x128xf32>
    %478 = arith.truncf %477 : vector<16x128xf32> to vector<16x128xbf16>
    %c1_335 = arith.constant 1 : index
    %c1_336 = arith.constant 1 : index
    %c0_337 = arith.constant 0 : index
    %c0_338 = arith.constant 0 : index
    %c0_339 = arith.constant 0 : index
    %479 = vector.load %arg8[%c1_335, %c1_336, %c0_337, %c0_338, %c0_339] : memref<2x2x3x128x128xbf16, #tpu.memory_space<vmem>>, vector<1x1x1x128x128xbf16>
    %480 = vector.shape_cast %479 : vector<1x1x1x128x128xbf16> to vector<128x128xbf16>
    %cst_340 = arith.constant dense<0.000000e+00> : vector<16x128xf32>
    %481 = tpu.matmul %478, %480, %cst_340 {dimension_numbers = #tpu.dot_dimension_numbers<[1], [0], [0], [1], [0, 0, 1, 1], [], []>} : vector<16x128xbf16>, vector<128x128xbf16>, vector<16x128xf32> -> vector<16x128xf32>
    %482 = arith.addf %467, %481 : vector<16x128xf32>
    %483 = arith.truncf %466 : vector<16x128xf32> to vector<16x128xbf16>
    %c1_341 = arith.constant 1 : index
    %c1_342 = arith.constant 1 : index
    %c1_343 = arith.constant 1 : index
    %c0_344 = arith.constant 0 : index
    %c0_345 = arith.constant 0 : index
    %484 = vector.load %arg8[%c1_341, %c1_342, %c1_343, %c0_344, %c0_345] : memref<2x2x3x128x128xbf16, #tpu.memory_space<vmem>>, vector<1x1x1x128x128xbf16>
    %485 = vector.shape_cast %484 : vector<1x1x1x128x128xbf16> to vector<128x128xbf16>
    %cst_346 = arith.constant dense<0.000000e+00> : vector<16x128xf32>
    %486 = tpu.matmul %483, %485, %cst_346 {dimension_numbers = #tpu.dot_dimension_numbers<[1], [0], [0], [1], [0, 0, 1, 1], [], []>} : vector<16x128xbf16>, vector<128x128xbf16>, vector<16x128xf32> -> vector<16x128xf32>
    %487 = arith.addf %482, %486 : vector<16x128xf32>
    %c15_i32_347 = arith.constant 15 : i32
    %488 = tpu.dynamic_rotate %466 by %c15_i32_347 dim 0 : vector<16x128xf32>, i32 -> vector<16x128xf32>
    %c-1_i32_348 = arith.constant -1 : i32
    %489 = vector.broadcast %c-1_i32_348 : i32 to vector<16x1xi32>
    %490 = arith.cmpi sge, %17, %489 : vector<16x1xi32>
    %c15_i32_349 = arith.constant 15 : i32
    %491 = vector.broadcast %c15_i32_349 : i32 to vector<16x1xi32>
    %492 = arith.cmpi slt, %17, %491 : vector<16x1xi32>
    %493 = arith.andi %490, %492 : vector<16x1xi1>
    %cst_350 = arith.constant 0.000000e+00 : f32
    %494 = vector.shape_cast %493 : vector<16x1xi1> to vector<16x1xi1>
    %495 = vector.broadcast %494 : vector<16x1xi1> to vector<16x128xi1>
    %496 = vector.broadcast %cst_350 : f32 to vector<16x128xf32>
    %497 = arith.select %495, %488, %496 : vector<16x128xi1>, vector<16x128xf32>
    %498 = arith.truncf %497 : vector<16x128xf32> to vector<16x128xbf16>
    %c1_351 = arith.constant 1 : index
    %c1_352 = arith.constant 1 : index
    %c2_353 = arith.constant 2 : index
    %c0_354 = arith.constant 0 : index
    %c0_355 = arith.constant 0 : index
    %499 = vector.load %arg8[%c1_351, %c1_352, %c2_353, %c0_354, %c0_355] : memref<2x2x3x128x128xbf16, #tpu.memory_space<vmem>>, vector<1x1x1x128x128xbf16>
    %500 = vector.shape_cast %499 : vector<1x1x1x128x128xbf16> to vector<128x128xbf16>
    %cst_356 = arith.constant dense<0.000000e+00> : vector<16x128xf32>
    %501 = tpu.matmul %498, %500, %cst_356 {dimension_numbers = #tpu.dot_dimension_numbers<[1], [0], [0], [1], [0, 0, 1, 1], [], []>} : vector<16x128xbf16>, vector<128x128xbf16>, vector<16x128xf32> -> vector<16x128xf32>
    %502 = arith.addf %487, %501 : vector<16x128xf32>
    %c1_357 = arith.constant 1 : index
    %c1_358 = arith.constant 1 : index
    %c0_359 = arith.constant 0 : index
    %c0_360 = arith.constant 0 : index
    %503 = vector.load %arg9[%c1_357, %c1_358, %c0_359, %c0_360] : memref<2x2x1x128xf32, #tpu.memory_space<vmem>>, vector<1x1x1x128xf32>
    %504 = vector.shape_cast %503 : vector<1x1x1x128xf32> to vector<1x128xf32>
    %505 = vector.broadcast %504 : vector<1x128xf32> to vector<16x128xf32>
    %506 = arith.addf %502, %505 : vector<16x128xf32>
    %507 = vector.broadcast %4 : vector<16x1xf32> to vector<16x128xf32>
    %508 = arith.mulf %506, %507 : vector<16x128xf32>
    %509 = arith.addf %420, %508 : vector<16x128xf32>
    %c1_361 = arith.constant 1 : index
    %c1_362 = arith.constant 1 : index
    %c0_363 = arith.constant 0 : index
    %c0_364 = arith.constant 0 : index
    %c0_365 = arith.constant 0 : index
    %510 = vector.load %arg7[%c1_361, %c1_362, %c0_363, %c0_364, %c0_365] : memref<2x2x2x1x128xf32, #tpu.memory_space<vmem>>, vector<1x1x1x1x128xf32>
    %511 = vector.shape_cast %510 : vector<1x1x1x1x128xf32> to vector<1x128xf32>
    %c1_366 = arith.constant 1 : index
    %c1_367 = arith.constant 1 : index
    %c1_368 = arith.constant 1 : index
    %c0_369 = arith.constant 0 : index
    %c0_370 = arith.constant 0 : index
    %512 = vector.load %arg7[%c1_366, %c1_367, %c1_368, %c0_369, %c0_370] : memref<2x2x2x1x128xf32, #tpu.memory_space<vmem>>, vector<1x1x1x1x128xf32>
    %513 = vector.shape_cast %512 : vector<1x1x1x1x128xf32> to vector<1x128xf32>
    %cst_371 = arith.constant dense<0.000000e+00> : vector<16xf32>
    %514 = vector.multi_reduction <add>, %509, %cst_371 [1] : vector<16x128xf32> to vector<16xf32>
    %515 = vector.shape_cast %514 : vector<16xf32> to vector<16x1xf32>
    %cst_372 = arith.constant 2.500000e-01 : f32
    %516 = vector.broadcast %cst_372 : f32 to vector<16x1xf32>
    %517 = arith.mulf %515, %516 : vector<16x1xf32>
    %518 = arith.mulf %509, %509 : vector<16x128xf32>
    %cst_373 = arith.constant dense<0.000000e+00> : vector<16xf32>
    %519 = vector.multi_reduction <add>, %518, %cst_373 [1] : vector<16x128xf32> to vector<16xf32>
    %520 = vector.shape_cast %519 : vector<16xf32> to vector<16x1xf32>
    %cst_374 = arith.constant 2.500000e-01 : f32
    %521 = vector.broadcast %cst_374 : f32 to vector<16x1xf32>
    %522 = arith.mulf %520, %521 : vector<16x1xf32>
    %523 = arith.mulf %517, %517 : vector<16x1xf32>
    %524 = arith.subf %522, %523 : vector<16x1xf32>
    %525 = vector.broadcast %517 : vector<16x1xf32> to vector<16x128xf32>
    %526 = arith.subf %509, %525 : vector<16x128xf32>
    %cst_375 = arith.constant 9.99999974E-6 : f32
    %527 = vector.broadcast %cst_375 : f32 to vector<16x1xf32>
    %528 = arith.addf %524, %527 : vector<16x1xf32>
    %529 = math.rsqrt %528 : vector<16x1xf32>
    %530 = vector.broadcast %529 : vector<16x1xf32> to vector<16x128xf32>
    %531 = arith.mulf %526, %530 : vector<16x128xf32>
    %532 = vector.broadcast %511 : vector<1x128xf32> to vector<16x128xf32>
    %533 = arith.mulf %531, %532 : vector<16x128xf32>
    %534 = vector.broadcast %513 : vector<1x128xf32> to vector<16x128xf32>
    %535 = arith.addf %533, %534 : vector<16x128xf32>
    %536 = vector.broadcast %4 : vector<16x1xf32> to vector<16x128xf32>
    %537 = arith.mulf %535, %536 : vector<16x128xf32>
    %538 = arith.addf %537, %13 : vector<16x128xf32>
    %539 = arith.truncf %538 : vector<16x128xf32> to vector<16x128xbf16>
    %c0_376 = arith.constant 0 : index
    %c0_377 = arith.constant 0 : index
    %c0_378 = arith.constant 0 : index
    %540 = vector.load %arg10[%c0_376, %c0_377, %c0_378] : memref<2x128x128xbf16, #tpu.memory_space<vmem>>, vector<1x128x128xbf16>
    %541 = vector.shape_cast %540 : vector<1x128x128xbf16> to vector<128x128xbf16>
    %cst_379 = arith.constant dense<0.000000e+00> : vector<16x128xf32>
    %542 = tpu.matmul %539, %541, %cst_379 {dimension_numbers = #tpu.dot_dimension_numbers<[1], [0], [0], [1], [0, 0, 1, 1], [], []>} : vector<16x128xbf16>, vector<128x128xbf16>, vector<16x128xf32> -> vector<16x128xf32>
    %c0_380 = arith.constant 0 : index
    %c0_381 = arith.constant 0 : index
    %c0_382 = arith.constant 0 : index
    %543 = vector.load %arg11[%c0_380, %c0_381, %c0_382] : memref<2x1x128xf32, #tpu.memory_space<vmem>>, vector<1x1x128xf32>
    %544 = vector.shape_cast %543 : vector<1x1x128xf32> to vector<1x128xf32>
    %545 = vector.broadcast %544 : vector<1x128xf32> to vector<16x128xf32>
    %546 = arith.addf %542, %545 : vector<16x128xf32>
    %547 = vector.broadcast %4 : vector<16x1xf32> to vector<16x128xf32>
    %548 = arith.mulf %546, %547 : vector<16x128xf32>
    %c1_383 = arith.constant 1 : index
    %c0_384 = arith.constant 0 : index
    %c0_385 = arith.constant 0 : index
    %549 = vector.load %arg10[%c1_383, %c0_384, %c0_385] : memref<2x128x128xbf16, #tpu.memory_space<vmem>>, vector<1x128x128xbf16>
    %550 = vector.shape_cast %549 : vector<1x128x128xbf16> to vector<128x128xbf16>
    %cst_386 = arith.constant dense<0.000000e+00> : vector<16x128xf32>
    %551 = tpu.matmul %539, %550, %cst_386 {dimension_numbers = #tpu.dot_dimension_numbers<[1], [0], [0], [1], [0, 0, 1, 1], [], []>} : vector<16x128xbf16>, vector<128x128xbf16>, vector<16x128xf32> -> vector<16x128xf32>
    %c1_387 = arith.constant 1 : index
    %c0_388 = arith.constant 0 : index
    %c0_389 = arith.constant 0 : index
    %552 = vector.load %arg11[%c1_387, %c0_388, %c0_389] : memref<2x1x128xf32, #tpu.memory_space<vmem>>, vector<1x1x128xf32>
    %553 = vector.shape_cast %552 : vector<1x1x128xf32> to vector<1x128xf32>
    %554 = vector.broadcast %553 : vector<1x128xf32> to vector<16x128xf32>
    %555 = arith.addf %551, %554 : vector<16x128xf32>
    %556 = vector.broadcast %4 : vector<16x1xf32> to vector<16x128xf32>
    %557 = arith.mulf %555, %556 : vector<16x128xf32>
    %558 = math.exp %557 : vector<16x128xf32>
    %559 = arith.mulf %16, %558 : vector<16x128xf32>
    %560 = vector.broadcast %4 : vector<16x1xf32> to vector<16x128xf32>
    %561 = arith.mulf %559, %560 : vector<16x128xf32>
    %562 = arith.addf %548, %561 : vector<16x128xf32>
    %563 = tpu.transpose %562, [1, 0] : vector<16x128xf32> -> vector<128x16xf32>
    %c0_390 = arith.constant 0 : index
    %c0_391 = arith.constant 0 : index
    %c0_392 = arith.constant 0 : index
    %564 = vector.load %arg12[%c0_390, %c0_391, %c0_392] : memref<1x8x16xf32, #tpu.memory_space<vmem>>, vector<1x4x16xf32>
    %565 = vector.shape_cast %564 : vector<1x4x16xf32> to vector<4x16xf32>
    %566 = vector.shape_cast %9 : vector<4x16xf32> to vector<1x4x16xf32>
    tpu.vector_store %arg12[%c0_390, %c0_391, %c0_392], %566 {strides = array<i32>} : memref<1x8x16xf32, #tpu.memory_space<vmem>>, vector<1x4x16xf32>,
    %567 = vector.extract_strided_slice %563 {offsets = [0, 0], sizes = [4, 16], strides = [1, 1]} : vector<128x16xf32> to vector<4x16xf32>
    %c0_393 = arith.constant 0 : index
    %c4 = arith.constant 4 : index
    %c0_394 = arith.constant 0 : index
    %568 = vector.load %arg12[%c0_393, %c4, %c0_394] : memref<1x8x16xf32, #tpu.memory_space<vmem>>, vector<1x4x16xf32>
    %569 = vector.shape_cast %568 : vector<1x4x16xf32> to vector<4x16xf32>
    %570 = vector.shape_cast %567 : vector<4x16xf32> to vector<1x4x16xf32>
    tpu.vector_store %arg12[%c0_393, %c4, %c0_394], %570 {strides = array<i32>} : memref<1x8x16xf32, #tpu.memory_space<vmem>>, vector<1x4x16xf32>,
    %cst_395 = arith.constant dense<0.000000e+00> : vector<128xf32>
    %571 = vector.multi_reduction <add>, %557, %cst_395 [0] : vector<16x128xf32> to vector<128xf32>
    %572 = vector.shape_cast %571 : vector<128xf32> to vector<1x128xf32>
    %cst_396 = arith.constant dense<0.000000e+00> : vector<1xf32>
    %573 = vector.multi_reduction <add>, %572, %cst_396 [1] : vector<1x128xf32> to vector<1xf32>
    %574 = vector.shape_cast %573 : vector<1xf32> to vector<1x1xf32>
    %c0_397 = arith.constant 0 : index
    %c0_398 = arith.constant 0 : index
    %c0_399 = arith.constant 0 : index
    %575 = vector.load %arg13[%c0_397, %c0_398, %c0_399] : memref<1x1x1xf32, #tpu.memory_space<vmem>>, vector<1x1x1xf32>
    %576 = vector.shape_cast %575 : vector<1x1x1xf32> to vector<1x1xf32>
    %577 = vector.shape_cast %574 : vector<1x1xf32> to vector<1x1x1xf32>
    tpu.vector_store %arg13[%c0_397, %c0_398, %c0_399], %577 {strides = array<i32>} : memref<1x1x1xf32, #tpu.memory_space<vmem>>, vector<1x1x1xf32>,
    return
  }
  func.func @transform_0(%arg0: i32) -> (i32, i32, i32) {
    %c0_i32 = arith.constant 0 : i32
    %c0_i32_0 = arith.constant 0 : i32
    %c0_i32_1 = arith.constant 0 : i32
    return %arg0, %c0_i32, %c0_i32_0 : i32, i32, i32
  }
  func.func @transform_1(%arg0: i32) -> (i32, i32, i32) {
    %c0_i32 = arith.constant 0 : i32
    %c0_i32_0 = arith.constant 0 : i32
    %c0_i32_1 = arith.constant 0 : i32
    return %arg0, %c0_i32, %c0_i32_0 : i32, i32, i32
  }
  func.func @transform_2(%arg0: i32) -> (i32, i32, i32, i32, i32) {
    %c0_i32 = arith.constant 0 : i32
    %c0_i32_0 = arith.constant 0 : i32
    %c0_i32_1 = arith.constant 0 : i32
    %c0_i32_2 = arith.constant 0 : i32
    %c0_i32_3 = arith.constant 0 : i32
    %c0_i32_4 = arith.constant 0 : i32
    return %c0_i32, %c0_i32_0, %c0_i32_1, %c0_i32_2, %c0_i32_3 : i32, i32, i32, i32, i32
  }
  func.func @transform_3(%arg0: i32) -> (i32, i32, i32, i32, i32) {
    %c0_i32 = arith.constant 0 : i32
    %c0_i32_0 = arith.constant 0 : i32
    %c0_i32_1 = arith.constant 0 : i32
    %c0_i32_2 = arith.constant 0 : i32
    %c0_i32_3 = arith.constant 0 : i32
    %c0_i32_4 = arith.constant 0 : i32
    return %c0_i32, %c0_i32_0, %c0_i32_1, %c0_i32_2, %c0_i32_3 : i32, i32, i32, i32, i32
  }
  func.func @transform_4(%arg0: i32) -> (i32, i32, i32, i32) {
    %c0_i32 = arith.constant 0 : i32
    %c0_i32_0 = arith.constant 0 : i32
    %c0_i32_1 = arith.constant 0 : i32
    %c0_i32_2 = arith.constant 0 : i32
    %c0_i32_3 = arith.constant 0 : i32
    return %c0_i32, %c0_i32_0, %c0_i32_1, %c0_i32_2 : i32, i32, i32, i32
  }
  func.func @transform_5(%arg0: i32) -> (i32, i32, i32) {
    %c0_i32 = arith.constant 0 : i32
    %c0_i32_0 = arith.constant 0 : i32
    %c0_i32_1 = arith.constant 0 : i32
    %c0_i32_2 = arith.constant 0 : i32
    return %c0_i32, %c0_i32_0, %c0_i32_1 : i32, i32, i32
  }
  func.func @transform_6(%arg0: i32) -> (i32, i32, i32, i32, i32) {
    %c0_i32 = arith.constant 0 : i32
    %c0_i32_0 = arith.constant 0 : i32
    %c0_i32_1 = arith.constant 0 : i32
    %c0_i32_2 = arith.constant 0 : i32
    %c0_i32_3 = arith.constant 0 : i32
    %c0_i32_4 = arith.constant 0 : i32
    return %c0_i32, %c0_i32_0, %c0_i32_1, %c0_i32_2, %c0_i32_3 : i32, i32, i32, i32, i32
  }
  func.func @transform_7(%arg0: i32) -> (i32, i32, i32, i32, i32) {
    %c0_i32 = arith.constant 0 : i32
    %c0_i32_0 = arith.constant 0 : i32
    %c0_i32_1 = arith.constant 0 : i32
    %c0_i32_2 = arith.constant 0 : i32
    %c0_i32_3 = arith.constant 0 : i32
    %c0_i32_4 = arith.constant 0 : i32
    return %c0_i32, %c0_i32_0, %c0_i32_1, %c0_i32_2, %c0_i32_3 : i32, i32, i32, i32, i32
  }
  func.func @transform_8(%arg0: i32) -> (i32, i32, i32, i32) {
    %c0_i32 = arith.constant 0 : i32
    %c0_i32_0 = arith.constant 0 : i32
    %c0_i32_1 = arith.constant 0 : i32
    %c0_i32_2 = arith.constant 0 : i32
    %c0_i32_3 = arith.constant 0 : i32
    return %c0_i32, %c0_i32_0, %c0_i32_1, %c0_i32_2 : i32, i32, i32, i32
  }
  func.func @transform_9(%arg0: i32) -> (i32, i32, i32) {
    %c0_i32 = arith.constant 0 : i32
    %c0_i32_0 = arith.constant 0 : i32
    %c0_i32_1 = arith.constant 0 : i32
    %c0_i32_2 = arith.constant 0 : i32
    return %c0_i32, %c0_i32_0, %c0_i32_1 : i32, i32, i32
  }
  func.func @transform_10(%arg0: i32) -> (i32, i32, i32) {
    %c0_i32 = arith.constant 0 : i32
    %c0_i32_0 = arith.constant 0 : i32
    %c0_i32_1 = arith.constant 0 : i32
    %c0_i32_2 = arith.constant 0 : i32
    return %c0_i32, %c0_i32_0, %c0_i32_1 : i32, i32, i32
  }
  func.func @transform_11(%arg0: i32) -> (i32, i32, i32) {
    %c0_i32 = arith.constant 0 : i32
    %c0_i32_0 = arith.constant 0 : i32
    %c0_i32_1 = arith.constant 0 : i32
    return %arg0, %c0_i32, %c0_i32_0 : i32, i32, i32
  }
  func.func @transform_12(%arg0: i32) -> (i32, i32, i32) {
    %c0_i32 = arith.constant 0 : i32
    %c0_i32_0 = arith.constant 0 : i32
    %c0_i32_1 = arith.constant 0 : i32
    return %arg0, %c0_i32, %c0_i32_0 : i32, i32, i32
  }
}

</mosaic_0001>

<bundles_post_ra>
// kernel: mono_flow_forward.1
= control target key start
LH: loop header
LB: loop body
LE: loop exit
PB: predicated region body
PF: predicated region fallthrough
CT: control target
= control target key end

     0   :  { %s8593_s0 = inlined_call_operand.vmem [shape: f32[2,8,16], index: 0, kind: input, shape index: {}]   ;;  %s8594_s1 = inlined_call_operand.vmem [shape: f32[2,1,16], index: 1, kind: input, shape index: {}]   ;;  %s8595_s2 = inlined_call_operand.vmem [shape: bf16[2,3,2,128,128], index: 2, kind: input, shape index: {}]   ;;  %s8596_s3 = inlined_call_operand.vmem [shape: f32[2,3,2,1,128], index: 3, kind: input, shape index: {}]   ;;  %s8597_s4 = inlined_call_operand.vmem [shape: bf16[2,2,128,128], index: 4, kind: input, shape index: {}]   ;;  %s8598_s5 = inlined_call_operand.vmem [shape: f32[2,1,128], index: 5, kind: input, shape index: {}]   ;;  %s8599_s6 = inlined_call_operand.vmem [shape: f32[2,2,2,1,128], index: 6, kind: input, shape index: {}]   ;;  %s8600_s7 = inlined_call_operand.vmem [shape: bf16[2,2,3,128,128], index: 7, kind: input, shape index: {}]   ;;  %s8601_s8 = inlined_call_operand.vmem [shape: f32[2,2,1,128], index: 8, kind: input, shape index: {}]   ;;  %s8602_s9 = inlined_call_operand.vmem [shape: bf16[2,128,128], index: 9, kind: input, shape index: {}]   ;;  %s8603_s10 = inlined_call_operand.vmem [shape: f32[2,1,128], index: 10, kind: input, shape index: {}]   ;;  %s8604_s11 = inlined_call_operand.hbm [shape: f32[2,8,16], index: 11, kind: output, shape index: {0}]   ;;  %s8605_s12 = inlined_call_operand.vmem [shape: f32[2,1,1], index: 12, kind: output, shape index: {1}]  }
   0x1   :  { %8607 = sst [smem:[#allocation7_spill]] %s8593_s0 }
   0x2   :  { %8608 = sst [smem:[#allocation8_spill]] %s8594_s1 }
   0x3   :  { %18 = vsyncpa [#allocation3], 0 }
   0x4   :  { %20 = vsyncpa [#allocation3 + $0x1], 0  ;;  %s7048_s21 = smov 0   ;;  %s7050_s22 = smov 0  }
   0x5   :  { %s7052_s23 = smov 0   ;;  %s7054_s24 = smov 0  }
   0x6 LB: > { %8609 = sst [smem:[#allocation5_spill]] %s6972_s23  ;;  %s7069_s25 = sadd.s32 4294967295, %s6976_s24   ;;  %s6976_s24 = sphi %s7054_s24, %s8623_s24   ;;  %s6972_s23 = sphi %s7052_s23, %s8620_s23   ;;  %s6968_s22 = sphi %s7050_s22, %s8622_s22   ;;  %s6964_s21 = sphi %s7048_s21, %s8621_s21  }
   0x7   : > { %s4882_s26 = sadd.s32 4294967294, %s6976_s24   ;;  %s7073_s27 = sadd.s32 1, %s6976_s24  }
   0x8   : > { %s274_s28 = sadd.s32 1, %s6972_s23  ;;  %s271_s29 = ssub.s32 %s6976_s24, %s7073_s27 }
   0x9   : > { %p284_p0 = scmp.ne.s32.totalorder %s6972_s23, %s6968_s22  ;;  %p272_p1 = scmp.eq.s32.totalorder %s271_s29, 0 }
   0xa   : > { %p285_p2 = scmp.eq.s32.totalorder %s7069_s25, 1  ;;  %p290_p3 = scmp.ne.s32.totalorder %s6968_s22, %s6964_s21 }
   0xb   : > { %p291_p4 = scmp.eq.s32.totalorder %s4882_s26, 1  ;;  %p4885_p7 = scmp.ge.s32.totalorder %s6976_s24, 1 }
   0xc   : > { %s7084_s30 = scalar_select %p272_p1, %s6972_s23, %s274_s28  }
   0xd   : > { %p7086_p5 = por %p285_p2, %p284_p0  ;;  %p7090_p6 = por %p291_p4, %p290_p3 }
   0xe   : > { %8610 = sst [smem:[#allocation6_spill]] %s7084_s30  ;;  %p375_p8 = scmp.lt.s32.totalorder %s6976_s24, 3 }
  0x10   : > { %p376_p9 = pnand %p4885_p7, %p375_p8 }
  0x11   : > { %p422_p10 = scmp.lt.s32.totalorder (!%p376_p9), %s7069_s25, 1  ;;  %s8613_s1 = sld [smem:[#allocation8_spill]] (!%p376_p9) }
  0x12   : > { %379 = sbr.rel (%p376_p9) target bundleno = 5509 (0x1585), region = 64  ;;  %s8614_s0 = sld [smem:[#allocation7_spill]] (!%p376_p9) }
  0x13   : > { %s414_s29 = sand.u32 (!%p376_p9), 1, %s6968_s22  }
  0x14   : > { %s4886_s30 = sshll.u32 (!%p376_p9), %s414_s29, 3  ;;  %s4776_s20 = scalar_lea.sflag (!%p376_p9), [#allocation3], %s414_s29 }
  0x15   : > { %s7116_s23 = scalar_lea.vmem (!%p376_p9), [#allocation2], %s4886_s30 }
  0x17   : > { %v6978_v0 = vmov 0   ;;  %s7098_s15 = scalar_select %p422_p10, %s7069_s25, 1  ;;  %vm4761_vm0 = vcmask 125952   ;;  %v6607_v4 = vld [vmem:[%s8595_s2 + $0x38] sm:$0xff]   ;;  %v6979_v6 = vmov 0.0   ;;  %v6609_v7 = vld [vmem:[%s8595_s2 + $0x30] sm:$0xff]  }
  0x18   : > { %6606 = vset.pattern.permute.xlu1 %v6978_v0  ;;  %v6608_v5 = vld [vmem:[%s8595_s2 + $0xb8] sm:$0xff]   ;;  %5914 = vmatprep.subr.bf16.mxu0 %v6979_v6  ;;  %v6610_v8 = vld [vmem:[%s8595_s2 + $0xb0] sm:$0xff]   ;;  %v6611_v10 = vld [vmem:[%s8595_s2 + $0x28] sm:$0xff]   ;;  %vm6980_vm1 = vmmov 0   ;;  %vm501_vm2 = vcmask 31744   ;;  %vm947_vm3 = vcmask 130048  }
  0x19   : > { %s7104_s18 = scalar_lea.vmem %s8613_s1, %s7098_s15  ;;  %s4887_s19 = sshll.u32 %s7098_s15, 3  ;;  %5915 = vmatpush3.bf16.msra.mxu0 %v6607_v4  ;;  %5934 = vmatprep.subr.bf16.mxu1 %v6979_v6  ;;  %v6612_v11 = vld [vmem:[%s8595_s2 + $0xa8] sm:$0xff]   ;;  %v6613_v12 = vld [vmem:[%s8595_s2 + $0x20] sm:$0xff]   ;;  %v6615_v14 = vld [vmem:[%s8595_s2 + $0x18] sm:$0xff]   ;;  %vm6981_vm6 = vmmov 1   ;;  %vm4773_vm11 = vcmask 0  }
  0x1a   : > { %v434_v1 = vld [vmem:[%s7104_s18] sm:$0x1]  ;;  %s425_s28 = scalar_lea.vmem %s8614_s0, %s4887_s19  ;;  %5935 = vmatpush3.bf16.msra.mxu1 %v6608_v5  ;;  %5916 = vmatprep.subr.bf16.mxu0 %v6979_v6  ;;  %v6616_v15 = vld [vmem:[%s8595_s2 + $0x98] sm:$0xff]   ;;  %v6617_v16 = vld [vmem:[%s8595_s2 + $0x10] sm:$0xff]   ;;  %s431_s26 = scalar_lea.vmem %s8605_s12, %s7098_s15 }
  0x1b   : > { %435 = vxpose.xlu0.b32.start.end [1/1] (short) (narrow) %v434_v1, 16  ;;  %v7114_v2 = vld [vmem:[%s425_s28] sm:$0xff]  ;;  %5936 = vmatprep.subr.bf16.mxu1 %v6979_v6  ;;  %v6618_v17 = vld [vmem:[%s8595_s2 + $0x90] sm:$0xff]   ;;  %v6619_v18 = vld [vmem:[%s8595_s2 + $0x8] sm:$0xff]   ;;  %s5625_s28 = sshll.u32 %s7069_s25, 7  ;;  %s6982_s15 = smov [#allocation2]  }
  0x1c   : > { %4762 = vst.msk [vmem:[%s7116_s23] sm:$0xf] %vm4761_vm0, %v7114_v2  ;;  %v6614_v13 = vld [vmem:[%s8595_s2 + $0xa0] sm:$0xff]   ;;  %v6620_v19 = vld [vmem:[%s8595_s2 + $0x88] sm:$0xff]   ;;  %5930 = vmatprep.mubr.msk.bf16.mxu0 %vm6980_vm1, %v6979_v6  ;;  %5950 = vmatprep.mubr.msk.bf16.mxu1 %vm6980_vm1, %v6979_v6  ;;  %v6623_v30 = vld [vmem:[%s8595_s2 + $0x138] sm:$0xff]   ;;  %s8554_s17 = scalar_lea.hbm %s8604_s11, %s5625_s28  ;;  %s6920_s30 = sshll.u32 %s6982_s15, 4  ;;  %s6921_s30 = int_to_ptr.vmem [resolvable:$false] %s6920_s30 }
  0x1d   : > { %5917 = vmatpush3.bf16.msra.mxu0 %v6609_v7  ;;  %v6621_v20 = vld [vmem:[%s8595_s2] sm:$0xff]   ;;  %v6624_v32 = vld [vmem:[%s8595_s2 + $0x130] sm:$0xff]   ;;  %v6625_v33 = vld [vmem:[%s8595_s2 + $0x128] sm:$0xff]   ;;  %s6922_s25 = scalar_lea.vmem %s6921_s30, 256 }
  0x1e   : > { %5937 = vmatpush3.bf16.msra.mxu1 %v6610_v8  ;;  %5918 = vmatprep.subr.bf16.mxu0 %v6979_v6  ;;  %v6622_v21 = vld [vmem:[%s8595_s2 + $0x80] sm:$0xff]   ;;  %v6627_v35 = vld [vmem:[%s8595_s2 + $0x118] sm:$0xff]   ;;  %v6628_v36 = vld [vmem:[%s8595_s2 + $0x110] sm:$0xff]  }
  0x1f   : > { %5938 = vmatprep.subr.bf16.mxu1 %v6979_v6  ;;  %v6626_v34 = vld [vmem:[%s8595_s2 + $0x120] sm:$0xff]   ;;  %v6629_v37 = vld [vmem:[%s8595_s2 + $0x108] sm:$0xff]   ;;  %v6631_v39 = vld [vmem:[%s8595_s2 + $0xf8] sm:$0xff]  }
  0x20   : > { %v6630_v38 = vld [vmem:[%s8595_s2 + $0x100] sm:$0xff]   ;;  %v6632_v40 = vld [vmem:[%s8595_s2 + $0xf0] sm:$0xff]   ;;  %v6633_v41 = vld [vmem:[%s8595_s2 + $0xe8] sm:$0xff]  }
  0x21   : > { %5919 = vmatpush3.bf16.msra.mxu0 %v6611_v10  ;;  %v6634_v42 = vld [vmem:[%s8595_s2 + $0xe0] sm:$0xff]   ;;  %v6635_v43 = vld [vmem:[%s8595_s2 + $0xd8] sm:$0xff]   ;;  %v6636_v44 = vld [vmem:[%s8595_s2 + $0xd0] sm:$0xff]  }
  0x22   : > { %5939 = vmatpush3.bf16.msra.mxu1 %v6612_v11  ;;  %5920 = vmatprep.subr.bf16.mxu0 %v6979_v6  ;;  %v6637_v45 = vld [vmem:[%s8595_s2 + $0xc8] sm:$0xff]   ;;  %v6638_v46 = vld [vmem:[%s8595_s2 + $0xc0] sm:$0xff]  }
  0x23   : > { %5940 = vmatprep.subr.bf16.mxu1 %v6979_v6  ;;  %v4915_v49 = vld [vmem:[%s8596_s3 + $0x2] ss:$0 sm:$0xff]  ;;  %v4889_v59 = vld [vmem:[%s8596_s3] ss:$0 sm:$0xff]  ;;  %v4994_v10 = vld [vmem:[%s8596_s3 + $0x3] ss:$0 sm:$0xff] }
  0x25   : > { %5921 = vmatpush3.bf16.msra.mxu0 %v6613_v12 }
  0x26   : > { %5941 = vmatpush3.bf16.msra.mxu1 %v6614_v13  ;;  %5922 = vmatprep.subr.bf16.mxu0 %v6979_v6 }
  0x27   : > { %5942 = vmatprep.subr.bf16.mxu1 %v6979_v6 }
  0x29   : > { %5923 = vmatpush3.bf16.msra.mxu0 %v6615_v14 }
  0x2a   : > { %5943 = vmatpush3.bf16.msra.mxu1 %v6616_v15  ;;  %5924 = vmatprep.subr.bf16.mxu0 %v6979_v6 }
  0x2b   : > { %5944 = vmatprep.subr.bf16.mxu1 %v6979_v6 }
  0x2d   : > { %5925 = vmatpush3.bf16.msra.mxu0 %v6617_v16 }
  0x2e   : > { %5945 = vmatpush3.bf16.msra.mxu1 %v6618_v17  ;;  %5926 = vmatprep.subr.bf16.mxu0 %v6979_v6  ;;  %v541_v17 = vlaneseq }
  0x2f   : > { %5946 = vmatprep.subr.bf16.mxu1 %v6979_v6 }
  0x31   : > { %5927 = vmatpush3.bf16.msra.mxu0 %v6619_v18  ;;  %v7307_v18 = vshrl.u32 %v541_v17, 7 }
  0x32   : > { %5947 = vmatpush3.bf16.msra.mxu1 %v6620_v19  ;;  %5928 = vmatprep.subr.bf16.mxu0 %v6979_v6  ;;  %v6915_v19 = vld [vmem:[%s7104_s18] sm:$0x1]  ;;  %s4792_s18 = sshll.u32 %s7116_s23, 4  ;;  %s4793_s18 = int_to_ptr.vmem [resolvable:$true] %s4792_s18 }
  0x33   : > { %5948 = vmatprep.subr.bf16.mxu1 %v6979_v6  ;;  %vm1769_vm4 = vcmp.lt.s32.totalorder %v7307_v18, 1  ;;  %vm1772_vm5 = vcmp.ge.s32.totalorder %v7307_v18, 1  ;;  %vm1999_vm8 = vcmp.lt.s32.totalorder %v7307_v18, 7  ;;  %s6916_s0 = scalar_lea.vmem %s4793_s18, 128  ;;  %p6923_p0 = scmp.lt.s32.totalorder %s4793_s18, %s6921_s30 }
  0x34   : > { %vm7611_vm7 = vmpackc.low %vm6981_vm6, %vm1772_vm5  ;;  %p6917_p11 = scmp.ne.s32.totalorder %s4793_s18, %s6916_s0  ;;  %p6924_p1 = scmp.lt.s32.totalorder %s6922_s25, %s6916_s0 }
  0x35   : > { %5929 = vmatpush3.bf16.msra.mxu0 %v6621_v20  ;;  %v4888_v20 = vadd.f32 -1.0, %v6915_v19 }
  0x36   : > { %5949 = vmatpush3.bf16.msra.mxu1 %v6622_v21  ;;  %5954 = vmatprep.subr.bf16.mxu0 %v6979_v6  ;;  %v903_v21 = vsub.s32 0, %v7307_v18  ;;  %p6918_p12 = pnand %p6917_p11, %p7086_p5  ;;  %p6925_p2 = por %p6924_p1, %p6923_p0 }
  0x37   : > { %5974 = vmatprep.subr.bf16.mxu1 %v6979_v6 }
  0x38   : > { %p6919_p13 = pneg %p6918_p12 }
  0x3a   : > { %p6926_p3 = pnand %p6925_p2, %p6919_p13 }
  0x44   : > { %6605 = vset.pattern.permute.xlu0 %v6978_v0  ;;  %v4941_v0 = vld [vmem:[%s8596_s3 + $0x4] ss:$0 sm:$0xff] }
  0x97   : > { %v451_v3 = vpop.trf.xlu0 }
  0x98   : > { %546 = vperm.xlu0 %6605, %v451_v3  }
  0x9b   : > { %v452_v9 = vpop.trf.xlu0 }
  0x9c   : > { %551 = vperm.xlu1 %6606, %v452_v9  }
  0xc5   : > { %469 = vxpose.xlu1.b32.start.end [1/1] (short) (narrow) %v7114_v2, 16 }
 0x113   : > { %v7197_v26 = vpop.permute.xlu0 %546 }
 0x117   : > { %v7192_v22 = vpop.permute.xlu1 %551 }
 0x141   : > { %v485_v23 = vpop.trf.xlu1 }
 0x142   : > { %v7195_v24 = vsel %vm501_vm2, %v485_v23, 0.0  ;;  %v468_v23 = vmul.f32 10000.0, %v4888_v20 }
 0x143   : > { %v7204_v28 = vmul.f32 %v7197_v26, %v7195_v24 }
 0x145   : > { %v486_v25 = vpop.trf.xlu1 }
 0x146   : > { %v7200_v27 = vsel %vm501_vm2, %v486_v25, 0.0  ;;  %v7311_v25 = vrot.slane %v468_v23, %v903_v21 }
 0x147   : > { %v7208_v29 = vmul.f32 %v7192_v22, %v7200_v27 }
 0x149   : > { %v7215_v31 = vpack.c.bf16 %v7208_v29, %v7204_v28 }
 0x14b   : > { %5931 = vmatmul.mubr.bf16.vlgmr.msra.gmra.mxu0 %v7215_v31  ;;  %5951 = vmatmul.mubr.bf16.vlgmr.msra.gmra.mxu1 %v7215_v31 }
 0x14c   : > { %5955 = vmatpush3.bf16.msra.mxu0 %v6623_v30  ;;  %5970 = vmatprep.mubr.msk.bf16.mxu0 %vm6980_vm1, %v6979_v6 }
 0x14d   : > { %5956 = vmatprep.subr.bf16.mxu0 %v6979_v6  ;;  %5976 = vmatprep.mubr.msk.bf16.mxu1 %vm6980_vm1, %v6979_v6 }
 0x150   : > { %5957 = vmatpush3.bf16.msra.mxu0 %v6624_v32 }
 0x151   : > { %5958 = vmatprep.subr.bf16.mxu0 %v6979_v6 }
 0x154   : > { %5959 = vmatpush3.bf16.msra.mxu0 %v6625_v33 }
 0x155   : > { %5960 = vmatprep.subr.bf16.mxu0 %v6979_v6 }
 0x158   : > { %5961 = vmatpush3.bf16.msra.mxu0 %v6626_v34 }
 0x159   : > { %5962 = vmatprep.subr.bf16.mxu0 %v6979_v6 }
 0x15c   : > { %5963 = vmatpush3.bf16.msra.mxu0 %v6627_v35 }
 0x15d   : > { %5964 = vmatprep.subr.bf16.mxu0 %v6979_v6 }
 0x160   : > { %5965 = vmatpush3.bf16.msra.mxu0 %v6628_v36 }
 0x161   : > { %5966 = vmatprep.subr.bf16.mxu0 %v6979_v6 }
 0x164   : > { %5967 = vmatpush3.bf16.msra.mxu0 %v6629_v37 }
 0x165   : > { %5968 = vmatprep.subr.bf16.mxu0 %v6979_v6 }
 0x168   : > { %5969 = vmatpush3.bf16.msra.mxu0 %v6630_v38 }
 0x169   : > { %6006 = vmatprep.subr.bf16.mxu0 %v6979_v6 }
 0x16b   : > { %5971 = vmatmul.mubr.bf16.vlgmr.msra.gmra.mxu0 %v7215_v31 }
 0x16c   : > { %6007 = vmatpush3.bf16.msra.mxu0 %v6631_v39  ;;  %6022 = vmatprep.mubr.msk.bf16.mxu0 %vm6980_vm1, %v6979_v6 }
 0x16d   : > { %6008 = vmatprep.subr.bf16.mxu0 %v6979_v6 }
 0x170   : > { %6009 = vmatpush3.bf16.msra.mxu0 %v6632_v40 }
 0x171   : > { %6010 = vmatprep.subr.bf16.mxu0 %v6979_v6 }
 0x174   : > { %6011 = vmatpush3.bf16.msra.mxu0 %v6633_v41 }
 0x175   : > { %6012 = vmatprep.subr.bf16.mxu0 %v6979_v6 }
 0x178   : > { %6013 = vmatpush3.bf16.msra.mxu0 %v6634_v42 }
 0x179   : > { %6014 = vmatprep.subr.bf16.mxu0 %v6979_v6 }
 0x17c   : > { %6015 = vmatpush3.bf16.msra.mxu0 %v6635_v43 }
 0x17d   : > { %6016 = vmatprep.subr.bf16.mxu0 %v6979_v6 }
 0x180   : > { %6017 = vmatpush3.bf16.msra.mxu0 %v6636_v44 }
 0x181   : > { %6018 = vmatprep.subr.bf16.mxu0 %v6979_v6 }
 0x184   : > { %6019 = vmatpush3.bf16.msra.mxu0 %v6637_v45 }
 0x185   : > { %6020 = vmatprep.subr.bf16.mxu0 %v6979_v6 }
 0x188   : > { %6021 = vmatpush3.bf16.msra.mxu0 %v6638_v46 }
 0x189   : > { %6046 = vmatprep.subr.bf16.mxu0 %v6979_v6 }
 0x18b   : > { %6023 = vmatmul.mubr.bf16.vlgmr.msra.gmra.mxu0 %v7215_v31 }
 0x18c   : > { %6048 = vmatprep.mubr.msk.bf16.mxu0 %vm6980_vm1, %v6979_v6 }
 0x20b   : > { %v662_v47 = vpop.f32.mrf.mxu0  ;;  %v776_v48 = vpop.f32.mrf.mxu1 }
 0x20c   : > { %v777_v54 = vadd.f32 %v4915_v49, %v776_v48  ;;  %v663_v61 = vadd.f32 %v4889_v59, %v662_v47 }
 0x20d   : > { %v5932_v50 = vpop.f32.mrf.mxu0  ;;  %v5952_v51 = vpop.f32.mrf.mxu1 }
 0x20f   : > { %v665_v52 = vpop.f32.mrf.mxu0  ;;  %v779_v53 = vpop.f32.mrf.mxu1 }
 0x210   : > { %v780_v55 = vadd.f32 %v4915_v49, %v779_v53  ;;  %v666_v60 = vadd.f32 %v4889_v59, %v665_v52  ;;  %v6639_v49 = vld [vmem:[%s8595_s2 + $0x78] sm:$0xff]   ;;  %v6640_v52 = vld [vmem:[%s8595_s2 + $0x70] sm:$0xff]   ;;  %v6641_v53 = vld [vmem:[%s8595_s2 + $0x68] sm:$0xff]  }
 0x211   : > { %v5933_v56 = vpop.f32.mrf.mxu0  ;;  %v5953_v57 = vpop.f32.mrf.mxu1  ;;  %v6647_v59 = vld [vmem:[%s8595_s2 + $0x178] sm:$0xff]  }
 0x212   : > { %v898_v58 = vpack.c.bf16 %v780_v55, %v777_v54  ;;  %v897_v62 = vpack.c.bf16 %v666_v60, %v663_v61  ;;  %v6642_v54 = vld [vmem:[%s8595_s2 + $0x60] sm:$0xff]   ;;  %v6643_v55 = vld [vmem:[%s8595_s2 + $0x58] sm:$0xff]   ;;  %v6644_v56 = vld [vmem:[%s8595_s2 + $0x50] sm:$0xff]  }
 0x213   : > { %v6645_v57 = vld [vmem:[%s8595_s2 + $0x48] sm:$0xff]   ;;  %v6648_v60 = vld [vmem:[%s8595_s2 + $0x170] sm:$0xff]  }
 0x214   : > { %5975 = vmatpush3.bf16.xpose.msra.mxu1 %v898_v58  ;;  %v6646_v58 = vld [vmem:[%s8595_s2 + $0x40] sm:$0xff]   ;;  %v6649_v61 = vld [vmem:[%s8595_s2 + $0x168] sm:$0xff]  }
 0x215   : > { %5980 = vmatprep.subr.bf16.mxu1 %v6979_v6 }
 0x21b   : > { %5977 = vmatmul.mubr.bf16.vlgmr.msra.gmra.mxu1 %v897_v62  ;;  %v6650_v62 = vld [vmem:[%s8595_s2 + $0x160] sm:$0xff]  }
 0x21c   : > { %5982 = vmatprep.mubr.msk.bf16.mxu1 %vm6980_vm1, %v6979_v6 }
 0x22b   : > { %v890_v63 = vpop.f32.mrf.mxu0 }
 0x22c   : > { %v891_v4 = vadd.f32 %v4941_v0, %v890_v63  ;;  %v6651_v63 = vld [vmem:[%s8595_s2 + $0x158] sm:$0xff]  }
 0x22d   : > { %v5972_v1 = vpop.f32.mrf.mxu0 }
 0x22e   : > { %v6653_v1 = vld [vmem:[%s8595_s2 + $0x148] sm:$0xff]  }
 0x22f   : > { %v893_v3 = vpop.f32.mrf.mxu0 }
 0x230   : > { %v894_v5 = vadd.f32 %v4941_v0, %v893_v3  ;;  %v6652_v0 = vld [vmem:[%s8595_s2 + $0x150] sm:$0xff]   ;;  %v6654_v3 = vld [vmem:[%s8595_s2 + $0x140] sm:$0xff]  }
 0x231   : > { %v5973_v7 = vpop.f32.mrf.mxu0 }
 0x232   : > { %v899_v8 = vpack.c.bf16 %v894_v5, %v891_v4 }
 0x234   : > { %5981 = vmatpush3.bf16.msra.mxu1 %v899_v8 }
 0x235   : > { %5986 = vmatprep.subr.bf16.mxu1 %v6979_v6 }
 0x24b   : > { %v1267_v9 = vpop.f32.mrf.mxu0 }
 0x24c   : > { %v1268_v13 = vadd.f32 %v4994_v10, %v1267_v9 }
 0x24d   : > { %v6024_v11 = vpop.f32.mrf.mxu0 }
 0x24f   : > { %v1270_v12 = vpop.f32.mrf.mxu0 }
 0x250   : > { %v1271_v14 = vadd.f32 %v4994_v10, %v1270_v12 }
 0x251   : > { %v6025_v15 = vpop.f32.mrf.mxu0 }
 0x252   : > { %v1389_v16 = vpack.c.bf16 %v1271_v14, %v1268_v13 }
 0x254   : > { %6047 = vmatpush3.bf16.xpose.msra.mxu0 %v1389_v16 }
 0x255   : > { %6052 = vmatprep.subr.bf16.mxu0 %v6979_v6 }
 0x2db   : > { %v940_v30 = vpop.f32.mrf.mxu1 }
 0x2dc   : > { %v941_v32 = vadd.f32 %v940_v30, %v7311_v25 }
 0x2dd   : > { %v5978_v33 = vpop.f32.mrf.mxu1 }
 0x2de   : > { %v948_v34 = vsel %vm947_vm3, %v941_v32, -inf }
 0x2df   : > { %949 = vmax.xlane.f32.xlu1 %v948_v34  ;;  %v943_v35 = vpop.f32.mrf.mxu1 }
 0x2e0   : > { %v944_v36 = vadd.f32 %v943_v35, %v7311_v25 }
 0x2e1   : > { %v5979_v37 = vpop.f32.mrf.mxu1 }
 0x2e2   : > { %v951_v38 = vsel %vm947_vm3, %v944_v36, -inf }
 0x2e3   : > { %952 = vmax.xlane.f32.xlu0 %v951_v38 }
 0x368   : > { %v7317_v39 = vpop.xlane.xlu1 %949 }
 0x369   : > { %v954_v40 = vmax.f32 %v7317_v39, -1e+30 }
 0x36b   : > { %v962_v41 = vsub.f32 %v941_v32, %v954_v40  ;;  %v956_v7 = vsub.f32 -1e+30, %v954_v40  ;;  %v4968_v32 = vld [vmem:[%s8596_s3 + $0x1] ss:$0 sm:$0xff]  ;;  %v5020_v40 = vld [vmem:[%s8596_s3 + $0x5] ss:$0 sm:$0xff] }
 0x36c   : > { %v7322_v42 = vpop.xlane.xlu0 %952 }
 0x36d   : > { %v955_v43 = vmax.f32 %v7322_v42, -1e+30  ;;  %v964_v44 = vmul.f32 1.442695, %v962_v41  ;;  %v958_v8 = vmul.f32 1.442695, %v956_v7 }
 0x36f   : > { %v963_v45 = vsub.f32 %v944_v36, %v955_v43  ;;  %6847 = vpow2.f32 %v964_v44  ;;  %v957_v4 = vsub.f32 -1e+30, %v955_v43 }
 0x371   : > { %v966_v46 = vmul.f32 1.442695, %v963_v45  ;;  %v960_v5 = vmul.f32 1.442695, %v957_v4 }
 0x373   : > { %6849 = vpow2.f32 %v966_v46 }
 0x374   : > { %6851 = vpow2.f32 %v960_v5 }
 0x375   : > { %6853 = vpow2.f32 %v958_v8 }
 0x37c   : > { %v7327_v47 = vpop.eup %6847 }
 0x380   : > { %v6850_v48 = vpop.eup %6849 }
 0x381   : > { %v973_v50 = vsel %vm947_vm3, %v6850_v48, 0.0  ;;  %v978_v51 = vpack.c.bf16 %v6850_v48, %v7327_v47  ;;  %v6852_v9 = vpop.eup %6851  ;;  %v6655_v48 = vld [vmem:[%s8597_s4 + $0x38] sm:$0xff]  }
 0x382   : > { %974 = vadd.xlane.f32.xlu1 %v973_v50  ;;  %v969_v11 = vmul.f32 0.0, %v6852_v9  ;;  %v6854_v13 = vpop.eup %6853 }
 0x383   : > { %5983 = vmatmul.mubr.msk.bf16.vlgmr.msra.gmra.mxu1 %vm947_vm3, %v978_v51 }
 0x384   : > { %5987 = vmatpush3.bf16.msra.mxu1 %v6639_v49  ;;  %6002 = vmatprep.mubr.msk.bf16.mxu1 %vm6980_vm1, %v6979_v6 }
 0x385   : > { %5988 = vmatprep.subr.bf16.mxu1 %v6979_v6 }
 0x388   : > { %5989 = vmatpush3.bf16.msra.mxu1 %v6640_v52 }
 0x389   : > { %5990 = vmatprep.subr.bf16.mxu1 %v6979_v6 }
 0x38c   : > { %5991 = vmatpush3.bf16.msra.mxu1 %v6641_v53 }
 0x38d   : > { %5992 = vmatprep.subr.bf16.mxu1 %v6979_v6 }
 0x390   : > { %5993 = vmatpush3.bf16.msra.mxu1 %v6642_v54 }
 0x391   : > { %5994 = vmatprep.subr.bf16.mxu1 %v6979_v6 }
 0x394   : > { %5995 = vmatpush3.bf16.msra.mxu1 %v6643_v55 }
 0x395   : > { %5996 = vmatprep.subr.bf16.mxu1 %v6979_v6 }
 0x398   : > { %5997 = vmatpush3.bf16.msra.mxu1 %v6644_v56 }
 0x399   : > { %5998 = vmatprep.subr.bf16.mxu1 %v6979_v6 }
 0x39c   : > { %5999 = vmatpush3.bf16.msra.mxu1 %v6645_v57  ;;  %v970_v57 = vsel %vm947_vm3, %v7327_v47, 0.0  ;;  %v6659_v47 = vld [vmem:[%s8597_s4 + $0x18] sm:$0xff]  }
 0x39d   : > { %6000 = vmatprep.subr.bf16.mxu1 %v6979_v6 }
 0x3a0   : > { %6001 = vmatpush3.bf16.msra.mxu1 %v6646_v58  ;;  %v6656_v58 = vld [vmem:[%s8597_s4 + $0x30] sm:$0xff]  }
 0x3a1   : > { %6026 = vmatprep.subr.bf16.mxu1 %v6979_v6 }
 0x3a3   : > { %6003 = vmatmul.mubr.bf16.vlgmr.msra.gmra.mxu1 %v7215_v31 }
 0x3a4   : > { %6027 = vmatpush3.bf16.msra.mxu1 %v6647_v59  ;;  %6042 = vmatprep.mubr.msk.bf16.mxu1 %vm6980_vm1, %v6979_v6  ;;  %v6657_v59 = vld [vmem:[%s8597_s4 + $0x28] sm:$0xff]  }
 0x3a5   : > { %6028 = vmatprep.subr.bf16.mxu1 %v6979_v6 }
 0x3a8   : > { %6029 = vmatpush3.bf16.msra.mxu1 %v6648_v60  ;;  %v6658_v60 = vld [vmem:[%s8597_s4 + $0x20] sm:$0xff]  }
 0x3a9   : > { %6030 = vmatprep.subr.bf16.mxu1 %v6979_v6 }
 0x3ac   : > { %6031 = vmatpush3.bf16.msra.mxu1 %v6649_v61  ;;  %v6660_v61 = vld [vmem:[%s8597_s4 + $0x10] sm:$0xff]  }
 0x3ad   : > { %6032 = vmatprep.subr.bf16.mxu1 %v6979_v6 }
 0x3b0   : > { %6033 = vmatpush3.bf16.msra.mxu1 %v6650_v62  ;;  %v6661_v62 = vld [vmem:[%s8597_s4 + $0x8] sm:$0xff]  }
 0x3b1   : > { %6034 = vmatprep.subr.bf16.mxu1 %v6979_v6 }
 0x3b4   : > { %6035 = vmatpush3.bf16.msra.mxu1 %v6651_v63  ;;  %v6662_v63 = vld [vmem:[%s8597_s4] sm:$0xff]  }
 0x3b5   : > { %6036 = vmatprep.subr.bf16.mxu1 %v6979_v6 }
 0x3b8   : > { %6037 = vmatpush3.bf16.msra.mxu1 %v6652_v0 }
 0x3b9   : > { %6038 = vmatprep.subr.bf16.mxu1 %v6979_v6 }
 0x3bc   : > { %6039 = vmatpush3.bf16.msra.mxu1 %v6653_v1 }
 0x3bd   : > { %6040 = vmatprep.subr.bf16.mxu1 %v6979_v6 }
 0x3c0   : > { %6041 = vmatpush3.bf16.msra.mxu1 %v6654_v3 }
 0x3c1   : > { %6078 = vmatprep.subr.bf16.mxu1 %v6979_v6 }
 0x3c3   : > { %6043 = vmatmul.mubr.bf16.vlgmr.msra.gmra.mxu1 %v7215_v31  ;;  %v7408_v31 = vmul.f32 0.0, %v6854_v13 }
 0x3c4   : > { %6094 = vmatprep.mubr.msk.bf16.mxu1 %vm6980_vm1, %v6979_v6  ;;  %6079 = vmatpush3.bf16.msra.mxu1 %v6655_v48 }
 0x3c5   : > { %6080 = vmatprep.subr.bf16.mxu1 %v6979_v6 }
 0x3c8   : > { %6081 = vmatpush3.bf16.msra.mxu1 %v6656_v58 }
 0x3c9   : > { %6082 = vmatprep.subr.bf16.mxu1 %v6979_v6 }
 0x3cc   : > { %6083 = vmatpush3.bf16.msra.mxu1 %v6657_v59 }
 0x3cd   : > { %6084 = vmatprep.subr.bf16.mxu1 %v6979_v6 }
 0x3d0   : > { %6085 = vmatpush3.bf16.msra.mxu1 %v6658_v60 }
 0x3d1   : > { %6086 = vmatprep.subr.bf16.mxu1 %v6979_v6 }
 0x3d4   : > { %6087 = vmatpush3.bf16.msra.mxu1 %v6659_v47 }
 0x3d5   : > { %6088 = vmatprep.subr.bf16.mxu1 %v6979_v6 }
 0x3d8   : > { %6089 = vmatpush3.bf16.msra.mxu1 %v6660_v61 }
 0x3d9   : > { %6090 = vmatprep.subr.bf16.mxu1 %v6979_v6 }
 0x3dc   : > { %6091 = vmatpush3.bf16.msra.mxu1 %v6661_v62 }
 0x3dd   : > { %6092 = vmatprep.subr.bf16.mxu1 %v6979_v6 }
 0x3e0   : > { %6093 = vmatpush3.bf16.msra.mxu1 %v6662_v63 }
 0x3e1   : > { %6118 = vmatprep.subr.bf16.mxu1 %v6979_v6 }
 0x40b   : > { %v975_v10 = vpop.xlane.xlu1 %974 }
 0x40c   : > { %v977_v12 = vadd.f32 %v975_v10, %v969_v11 }
 0x40e   : > { %6855 = vrcp.f32 %v977_v12 }
 0x41b   : > { %v6856_v20 = vpop.eup %6855 }
 0x443   : > { %v1016_v14 = vpop.f32.mrf.mxu1 }
 0x444   : > { %v7411_v15 = vadd.f32 %v1016_v14, %v7408_v31 }
 0x445   : > { %v5984_v16 = vpop.f32.mrf.mxu1 }
 0x447   : > { %v1019_v17 = vpop.f32.mrf.mxu1 }
 0x448   : > { %v1024_v19 = vadd.f32 %v1019_v17, %v969_v11 }
 0x449   : > { %v5985_v21 = vpop.f32.mrf.mxu1 }
 0x44a   : > { %v7413_v23 = vmul.f32 %v6856_v20, %v1024_v19 }
 0x463   : > { %v1153_v30 = vpop.f32.mrf.mxu1 }
 0x464   : > { %v1154_v35 = vadd.f32 %v4968_v32, %v1153_v30  ;;  %v6666_v30 = vld [vmem:[%s8597_s4 + $0x60] sm:$0xff]  }
 0x465   : > { %v6004_v33 = vpop.f32.mrf.mxu1 }
 0x466   : > { %v6668_v33 = vld [vmem:[%s8597_s4 + $0x50] sm:$0xff]  }
 0x467   : > { %v1156_v34 = vpop.f32.mrf.mxu1 }
 0x468   : > { %v1157_v36 = vadd.f32 %v4968_v32, %v1156_v34  ;;  %v6667_v32 = vld [vmem:[%s8597_s4 + $0x58] sm:$0xff]   ;;  %v6669_v34 = vld [vmem:[%s8597_s4 + $0x48] sm:$0xff]  }
 0x469   : > { %v6005_v37 = vpop.f32.mrf.mxu1 }
 0x46a   : > { %v1388_v38 = vpack.c.bf16 %v1157_v36, %v1154_v35  ;;  %v6670_v35 = vld [vmem:[%s8597_s4 + $0x40] sm:$0xff]  }
 0x46c   : > { %6049 = vmatmul.mubr.bf16.vlgmr.msra.gmra.mxu0 %v1388_v38 }
 0x46d   : > { %6054 = vmatprep.mubr.msk.bf16.mxu0 %vm6980_vm1, %v6979_v6 }
 0x483   : > { %v1381_v39 = vpop.f32.mrf.mxu1 }
 0x484   : > { %v1382_v43 = vadd.f32 %v5020_v40, %v1381_v39 }
 0x485   : > { %v6044_v41 = vpop.f32.mrf.mxu1 }
 0x487   : > { %v1384_v42 = vpop.f32.mrf.mxu1 }
 0x488   : > { %v1385_v44 = vadd.f32 %v5020_v40, %v1384_v42 }
 0x489   : > { %v6045_v45 = vpop.f32.mrf.mxu1 }
 0x48a   : > { %v1390_v46 = vpack.c.bf16 %v1385_v44, %v1382_v43 }
 0x48c   : > { %6053 = vmatpush3.bf16.msra.mxu0 %v1390_v46 }
 0x48d   : > { %6058 = vmatprep.subr.bf16.mxu0 %v6979_v6 }
 0x52c   : > { %v1425_v49 = vpop.f32.mrf.mxu0 }
 0x52d   : > { %v1426_v50 = vadd.f32 %v1425_v49, %v7311_v25 }
 0x52e   : > { %v6050_v51 = vpop.f32.mrf.mxu0 }
 0x52f   : > { %v1432_v52 = vsel %vm947_vm3, %v1426_v50, -inf }
 0x530   : > { %1433 = vmax.xlane.f32.xlu0 %v1432_v52  ;;  %v1428_v53 = vpop.f32.mrf.mxu0 }
 0x531   : > { %v1429_v54 = vadd.f32 %v1428_v53, %v7311_v25 }
 0x532   : > { %v6051_v55 = vpop.f32.mrf.mxu0 }
 0x533   : > { %v1435_v56 = vsel %vm947_vm3, %v1429_v54, -inf }
 0x534   : > { %1436 = vmax.xlane.f32.xlu0 %v1435_v56 }
 0x538   : > { %971 = vadd.xlane.f32.xlu0 %v970_v57 }
 0x5b9   : > { %v1434_v0 = vpop.xlane.xlu0 %1433 }
 0x5ba   : > { %v1438_v1 = vmax.f32 %v1434_v0, -1e+30  ;;  %v5062_v0 = vld [vmem:[%s8598_s5] ss:$0 sm:$0xff] }
 0x5bc   : > { %v1446_v3 = vsub.f32 %v1426_v50, %v1438_v1  ;;  %v1440_v36 = vsub.f32 -1e+30, %v1438_v1 }
 0x5bd   : > { %v1437_v4 = vpop.xlane.xlu0 %1436 }
 0x5be   : > { %v1448_v5 = vmul.f32 1.442695, %v1446_v3  ;;  %v1439_v7 = vmax.f32 %v1437_v4, -1e+30  ;;  %v1442_v38 = vmul.f32 1.442695, %v1440_v36 }
 0x5c0   : > { %v1447_v8 = vsub.f32 %v1429_v54, %v1439_v7  ;;  %6857 = vpow2.f32 %v1448_v5  ;;  %v1441_v37 = vsub.f32 -1e+30, %v1439_v7 }
 0x5c1   : > { %v972_v9 = vpop.xlane.xlu0 %971 }
 0x5c2   : > { %v1450_v10 = vmul.f32 1.442695, %v1447_v8  ;;  %v976_v11 = vadd.f32 %v972_v9, %v7408_v31  ;;  %v6663_v31 = vld [vmem:[%s8597_s4 + $0x78] sm:$0xff]   ;;  %v1444_v39 = vmul.f32 1.442695, %v1441_v37 }
 0x5c4   : > { %6859 = vpow2.f32 %v1450_v10 }
 0x5c5   : > { %6861 = vrcp.f32 %v976_v11 }
 0x5c6   : > { %6863 = vpow2.f32 %v1442_v38 }
 0x5c7   : > { %6865 = vpow2.f32 %v1444_v39 }
 0x5cd   : > { %v6858_v12 = vpop.eup %6857 }
 0x5ce   : > { %v1454_v13 = vsel %vm947_vm3, %v6858_v12, 0.0 }
 0x5cf   : > { %1455 = vadd.xlane.f32.xlu0 %v1454_v13 }
 0x5d1   : > { %v6860_v14 = vpop.eup %6859 }
 0x5d2   : > { %v6862_v16 = vpop.eup %6861  ;;  %v1457_v17 = vsel %vm947_vm3, %v6860_v14, 0.0  ;;  %v1462_v19 = vpack.c.bf16 %v6860_v14, %v6858_v12  ;;  %v6672_v14 = vld [vmem:[%s8600_s7 + $0x70] sm:$0xff]  }
 0x5d3   : > { %1458 = vadd.xlane.f32.xlu1 %v1457_v17  ;;  %v1027_v20 = vmul.f32 %v6862_v16, %v7411_v15  ;;  %v6664_v15 = vld [vmem:[%s8597_s4 + $0x70] sm:$0xff]   ;;  %v6864_v40 = vpop.eup %6863  ;;  %v6674_v16 = vld [vmem:[%s8600_s7 + $0x68] sm:$0xff]  }
 0x5d4   : > { %6055 = vmatmul.mubr.msk.bf16.vlgmr.msra.gmra.mxu0 %vm947_vm3, %v1462_v19  ;;  %v6866_v41 = vpop.eup %6865  ;;  %v1452_v43 = vmul.f32 0.0, %v6864_v40  ;;  %v6675_v17 = vld [vmem:[%s8600_s7 + $0x30] sm:$0xff]   ;;  %v6676_v19 = vld [vmem:[%s8600_s7 + $0x60] sm:$0xff]  }
 0x5d5   : > { %v1029_v21 = vpack.c.bf16 %v7413_v23, %v1027_v20  ;;  %6074 = vmatprep.mubr.msk.bf16.mxu0 %vm6980_vm1, %v6979_v6  ;;  %6059 = vmatpush3.bf16.msra.mxu0 %v6663_v31  ;;  %v6665_v23 = vld [vmem:[%s8597_s4 + $0x68] sm:$0xff]   ;;  %v1453_v45 = vmul.f32 0.0, %v6866_v41  ;;  %v6679_v31 = vld [vmem:[%s8600_s7 + $0x20] sm:$0xff]  }
 0x5d6   : > { %6060 = vmatprep.subr.bf16.mxu0 %v6979_v6  ;;  %v6677_v20 = vld [vmem:[%s8600_s7 + $0x28] sm:$0xff]  }
 0x5d7   : > { %6095 = vmatmul.mubr.bf16.vlgmr.msra.gmra.mxu1 %v1029_v21  ;;  %v6678_v21 = vld [vmem:[%s8600_s7 + $0x58] sm:$0xff]  }
 0x5d8   : > { %6134 = vmatprep.mubr.msk.bf16.mxu1 %vm6980_vm1, %v6979_v6 }
 0x5d9   : > { %6061 = vmatpush3.bf16.msra.mxu0 %v6664_v15  ;;  %v6680_v15 = vld [vmem:[%s8600_s7 + $0x50] sm:$0xff]  }
 0x5da   : > { %6062 = vmatprep.subr.bf16.mxu0 %v6979_v6 }
 0x5dd   : > { %6063 = vmatpush3.bf16.msra.mxu0 %v6665_v23  ;;  %v6681_v23 = vld [vmem:[%s8600_s7 + $0x18] sm:$0xff]  }
 0x5de   : > { %6064 = vmatprep.subr.bf16.mxu0 %v6979_v6 }
 0x5e1   : > { %6065 = vmatpush3.bf16.msra.mxu0 %v6666_v30  ;;  %v6682_v30 = vld [vmem:[%s8600_s7 + $0x48] sm:$0xff]  }
 0x5e2   : > { %6066 = vmatprep.subr.bf16.mxu0 %v6979_v6 }
 0x5e5   : > { %6067 = vmatpush3.bf16.msra.mxu0 %v6667_v32  ;;  %v6683_v32 = vld [vmem:[%s8600_s7 + $0x10] sm:$0xff]  }
 0x5e6   : > { %6068 = vmatprep.subr.bf16.mxu0 %v6979_v6 }
 0x5e9   : > { %6069 = vmatpush3.bf16.msra.mxu0 %v6668_v33  ;;  %v6684_v33 = vld [vmem:[%s8600_s7 + $0x40] sm:$0xff]  }
 0x5ea   : > { %6070 = vmatprep.subr.bf16.mxu0 %v6979_v6 }
 0x5ed   : > { %6071 = vmatpush3.bf16.msra.mxu0 %v6669_v34  ;;  %v6685_v34 = vld [vmem:[%s8600_s7 + $0x8] sm:$0xff]  }
 0x5ee   : > { %6072 = vmatprep.subr.bf16.mxu0 %v6979_v6 }
 0x5f1   : > { %6073 = vmatpush3.bf16.msra.mxu0 %v6670_v35  ;;  %v6686_v35 = vld [vmem:[%s8600_s7] sm:$0xff]  }
 0x5f2   : > { %6098 = vmatprep.subr.bf16.mxu0 %v6979_v6 }
 0x658   : > { %v1456_v42 = vpop.xlane.xlu0 %1455 }
 0x659   : > { %v1460_v46 = vadd.f32 %v1456_v42, %v1452_v43 }
 0x65b   : > { %6867 = vrcp.f32 %v1460_v46 }
 0x65c   : > { %v1459_v44 = vpop.xlane.xlu1 %1458 }
 0x65d   : > { %v1461_v48 = vadd.f32 %v1459_v44, %v1453_v45 }
 0x65f   : > { %6869 = vrcp.f32 %v1461_v48 }
 0x668   : > { %v6868_v54 = vpop.eup %6867 }
 0x66c   : > { %v6870_v57 = vpop.eup %6869 }
 0x694   : > { %v1500_v49 = vpop.f32.mrf.mxu0 }
 0x695   : > { %v1507_v51 = vadd.f32 %v1500_v49, %v1452_v43 }
 0x696   : > { %v6056_v50 = vpop.f32.mrf.mxu0 }
 0x697   : > { %v1702_v52 = vpop.f32.mrf.mxu1  ;;  %v1511_v59 = vmul.f32 %v6868_v54, %v1507_v51 }
 0x698   : > { %v1503_v53 = vpop.f32.mrf.mxu0 }
 0x699   : > { %v1508_v55 = vadd.f32 %v1503_v53, %v1453_v45  ;;  %v6096_v56 = vpop.f32.mrf.mxu1  ;;  %v5064_v53 = vld [vmem:[%s8599_s6] ss:$0 sm:$0xff] }
 0x69a   : > { %v6057_v58 = vpop.f32.mrf.mxu0 }
 0x69b   : > { %v1512_v60 = vmul.f32 %v6870_v57, %v1508_v55  ;;  %v1705_v47 = vpop.f32.mrf.mxu1  ;;  %v5065_v55 = vld [vmem:[%s8599_s6 + $0x1] ss:$0 sm:$0xff] }
 0x69d   : > { %v1513_v61 = vpack.c.bf16 %v1512_v60, %v1511_v59  ;;  %v6097_v62 = vpop.f32.mrf.mxu1 }
 0x69f   : > { %6075 = vmatmul.mubr.bf16.vlgmr.msra.gmra.mxu0 %v1513_v61 }
 0x6a0   : > { %6114 = vmatprep.mubr.msk.bf16.mxu0 %vm6980_vm1, %v6979_v6 }
 0x75f   : > { %v1613_v63 = vpop.f32.mrf.mxu0 }
 0x760   : > { %v1703_v1 = vadd.f32 %v1702_v52, %v1613_v63 }
 0x761   : > { %v6076_v3 = vpop.f32.mrf.mxu0 }
 0x762   : > { %v1716_v4 = vadd.f32 %v5062_v0, %v1703_v1 }
 0x763   : > { %v1616_v5 = vpop.f32.mrf.mxu0 }
 0x764   : > { %v1706_v7 = vadd.f32 %v1705_v47, %v1616_v5  ;;  %v7510_v8 = vadd.f32 %v1716_v4, %v7204_v28  ;;  %v6671_v28 = vld [vmem:[%s8600_s7 + $0x78] sm:$0xff]  }
 0x765   : > { %v6077_v9 = vpop.f32.mrf.mxu0  ;;  %6099 = vmatpush3.bf16.msra.mxu0 %v6671_v28  ;;  %v6692_v28 = vld [vmem:[%s8600_s7 + $0x90] sm:$0xff]  }
 0x766   : > { %v1717_v10 = vadd.f32 %v5062_v0, %v1706_v7  ;;  %1723 = vadd.xlane.f32.xlu0 %v7510_v8  ;;  %v1729_v11 = vmul.f32 %v7510_v8, %v7510_v8  ;;  %6100 = vmatprep.subr.bf16.mxu0 %v6979_v6  ;;  %v6687_v0 = vld [vmem:[%s8600_s7 + $0xb8] sm:$0xff]  }
 0x768   : > { %v7516_v12 = vadd.f32 %v1717_v10, %v7208_v29  ;;  %v6673_v29 = vld [vmem:[%s8600_s7 + $0x38] sm:$0xff]   ;;  %v6688_v10 = vld [vmem:[%s8600_s7 + $0xb0] sm:$0xff]  }
 0x769   : > { %6101 = vmatpush3.bf16.msra.mxu0 %v6672_v14  ;;  %6119 = vmatpush3.bf16.msra.mxu1 %v6673_v29  ;;  %v6693_v14 = vld [vmem:[%s8600_s7 + $0x88] sm:$0xff]   ;;  %v543_v29 = vadd.s32 8, %v7307_v18 }
 0x76a   : > { %1731 = vadd.xlane.f32.xlu0 %v1729_v11  ;;  %1725 = vadd.xlane.f32.xlu1 %v7516_v12  ;;  %v1730_v13 = vmul.f32 %v7516_v12, %v7516_v12  ;;  %v6689_v11 = vld [vmem:[%s8600_s7 + $0xa8] sm:$0xff]  }
 0x76b   : > { %6102 = vmatprep.subr.bf16.mxu0 %v6979_v6  ;;  %6120 = vmatprep.subr.bf16.mxu1 %v6979_v6  ;;  %vm2005_vm9 = vcmp.lt.s32.totalorder %v543_v29, 15 }
 0x76c   : > { %vm7656_vm10 = vmpackc.low %vm2005_vm9, %vm6981_vm6 }
 0x76d   : > { %6103 = vmatpush3.bf16.msra.mxu0 %v6674_v16  ;;  %6121 = vmatpush3.bf16.msra.mxu1 %v6675_v17 }
 0x76e   : > { %1733 = vadd.xlane.f32.xlu1 %v1730_v13  ;;  %6104 = vmatprep.subr.bf16.mxu0 %v6979_v6  ;;  %v6691_v13 = vld [vmem:[%s8600_s7 + $0x98] sm:$0xff]  }
 0x76f   : > { %6122 = vmatprep.subr.bf16.mxu1 %v6979_v6 }
 0x771   : > { %6105 = vmatpush3.bf16.msra.mxu0 %v6676_v19  ;;  %6123 = vmatpush3.bf16.msra.mxu1 %v6677_v20  ;;  %v6694_v19 = vld [vmem:[%s8600_s7 + $0x80] sm:$0xff]  }
 0x772   : > { %6106 = vmatprep.subr.bf16.mxu0 %v6979_v6  ;;  %6124 = vmatprep.subr.bf16.mxu1 %v6979_v6 }
 0x775   : > { %6107 = vmatpush3.bf16.msra.mxu0 %v6678_v21  ;;  %6125 = vmatpush3.bf16.msra.mxu1 %v6679_v31 }
 0x776   : > { %6108 = vmatprep.subr.bf16.mxu0 %v6979_v6  ;;  %6126 = vmatprep.subr.bf16.mxu1 %v6979_v6 }
 0x779   : > { %6109 = vmatpush3.bf16.msra.mxu0 %v6680_v15  ;;  %6127 = vmatpush3.bf16.msra.mxu1 %v6681_v23  ;;  %v6695_v23 = vld [vmem:[%s8600_s7 + $0x138] sm:$0xff]  }
 0x77a   : > { %6110 = vmatprep.subr.bf16.mxu0 %v6979_v6  ;;  %6128 = vmatprep.subr.bf16.mxu1 %v6979_v6 }
 0x77d   : > { %6111 = vmatpush3.bf16.msra.mxu0 %v6682_v30  ;;  %6129 = vmatpush3.bf16.msra.mxu1 %v6683_v32  ;;  %v6697_v30 = vld [vmem:[%s8600_s7 + $0xf8] sm:$0xff]   ;;  %v6696_v32 = vld [vmem:[%s8600_s7 + $0x130] sm:$0xff]  }
 0x77e   : > { %6112 = vmatprep.subr.bf16.mxu0 %v6979_v6  ;;  %6130 = vmatprep.subr.bf16.mxu1 %v6979_v6 }
 0x781   : > { %6113 = vmatpush3.bf16.msra.mxu0 %v6684_v33  ;;  %6131 = vmatpush3.bf16.msra.mxu1 %v6685_v34  ;;  %v6699_v33 = vld [vmem:[%s8600_s7 + $0xf0] sm:$0xff]   ;;  %v6698_v34 = vld [vmem:[%s8600_s7 + $0x128] sm:$0xff]  }
 0x782   : > { %6132 = vmatprep.subr.bf16.mxu1 %v6979_v6  ;;  %6138 = vmatprep.subr.bf16.mxu0 %v6979_v6 }
 0x785   : > { %6133 = vmatpush3.bf16.msra.mxu1 %v6686_v35  ;;  %v6701_v35 = vld [vmem:[%s8600_s7 + $0xe8] sm:$0xff]  }
 0x786   : > { %6158 = vmatprep.subr.bf16.mxu1 %v6979_v6 }
 0x7ef   : > { %v1724_v36 = vpop.xlane.xlu0 %1723 }
 0x7f0   : > { %v1727_v37 = vmul.f32 0.25, %v1724_v36  ;;  %v6700_v36 = vld [vmem:[%s8600_s7 + $0x120] sm:$0xff]  }
 0x7f2   : > { %v1737_v40 = vmul.f32 %v1727_v37, %v1727_v37  ;;  %v1741_v51 = vsub.f32 %v7510_v8, %v1727_v37  ;;  %v6703_v37 = vld [vmem:[%s8600_s7 + $0xe0] sm:$0xff]   ;;  %v6827_v8 = vld [vmem:[%s8600_s7 + $0x2d8] sm:$0xff]  }
 0x7f3   : > { %v1732_v38 = vpop.xlane.xlu0 %1731  ;;  %v1726_v39 = vpop.xlane.xlu1 %1725 }
 0x7f4   : > { %v1735_v41 = vmul.f32 0.25, %v1732_v38  ;;  %v1728_v42 = vmul.f32 0.25, %v1726_v39  ;;  %v6702_v38 = vld [vmem:[%s8600_s7 + $0x118] sm:$0xff]   ;;  %v6704_v39 = vld [vmem:[%s8600_s7 + $0x110] sm:$0xff]  }
 0x7f6   : > { %v1739_v43 = vsub.f32 %v1735_v41, %v1737_v40  ;;  %v1738_v46 = vmul.f32 %v1728_v42, %v1728_v42  ;;  %v1742_v56 = vsub.f32 %v7516_v12, %v1728_v42  ;;  %v6690_v12 = vld [vmem:[%s8600_s7 + $0xa0] sm:$0xff]   ;;  %v6705_v40 = vld [vmem:[%s8600_s7 + $0xd8] sm:$0xff]   ;;  %v6706_v41 = vld [vmem:[%s8600_s7 + $0x108] sm:$0xff]  }
 0x7f7   : > { %v1734_v44 = vpop.xlane.xlu1 %1733  ;;  %v6707_v42 = vld [vmem:[%s8600_s7 + $0xd0] sm:$0xff]  }
 0x7f8   : > { %v1743_v45 = vadd.f32 1e-05, %v1739_v43  ;;  %v1736_v48 = vmul.f32 0.25, %v1734_v44  ;;  %v6708_v43 = vld [vmem:[%s8600_s7 + $0x100] sm:$0xff]   ;;  %v6709_v44 = vld [vmem:[%s8600_s7 + $0xc8] sm:$0xff]  }
 0x7fa   : > { %6871 = vrsqrt.f32 %v1743_v45  ;;  %v1740_v49 = vsub.f32 %v1736_v48, %v1738_v46  ;;  %v6710_v45 = vld [vmem:[%s8600_s7 + $0xc0] sm:$0xff]  }
 0x7fc   : > { %v1744_v50 = vadd.f32 1e-05, %v1740_v49 }
 0x7fe   : > { %6873 = vrsqrt.f32 %v1744_v50 }
 0x807   : > { %v6872_v52 = vpop.eup %6871 }
 0x808   : > { %v1747_v54 = vmul.f32 %v6872_v52, %v1741_v51 }
 0x80a   : > { %v1755_v57 = vmul.f32 %v5064_v53, %v1747_v54 }
 0x80b   : > { %v6874_v58 = vpop.eup %6873 }
 0x80c   : > { %v1748_v59 = vmul.f32 %v6874_v58, %v1742_v56  ;;  %v7593_v60 = vadd.f32 %v5065_v55, %v1755_v57  ;;  %v5128_v57 = vld [vmem:[%s8601_s8] ss:$0 sm:$0xff] }
 0x80e   : > { %v1756_v47 = vmul.f32 %v5064_v53, %v1748_v59  ;;  %v1765_v62 = vmul.f32 %v7593_v60, %v7197_v26 }
 0x810   : > { %v7595_v61 = vadd.f32 %v5065_v55, %v1756_v47  ;;  %v1767_v1 = vrot.slane %v1765_v62, 7  ;;  %v1997_v17 = vrot.slane %v1765_v62, 1 }
 0x812   : > { %v1766_v63 = vmul.f32 %v7595_v61, %v7192_v22 }
 0x814   : > { %v1768_v3 = vrot.slane %v1766_v63, 7  ;;  %v1801_v4 = vpack.c.bf16 %v1766_v63, %v1765_v62  ;;  %v1998_v16 = vrot.slane %v1766_v63, 1 }
 0x816   : > { %6115 = vmatmul.mubr.bf16.vlgmr.msra.gmra.mxu0 %v1801_v4  ;;  %v1770_v5 = vsel %vm1769_vm4, %v1767_v1, %v1768_v3  ;;  %v1771_v7 = vsel %vm1769_vm4, %v1768_v3, %v1767_v1  ;;  %v2000_v20 = vsel %vm1999_vm8, %v1997_v17, %v1998_v16  ;;  %v2001_v21 = vsel %vm1999_vm8, %v1998_v16, %v1997_v17  ;;  %v6712_v16 = vld [vmem:[%s8600_s7 + $0x170] sm:$0xff]   ;;  %v6713_v17 = vld [vmem:[%s8600_s7 + $0x168] sm:$0xff]  }
 0x817   : > { %6139 = vmatpush3.bf16.msra.mxu0 %v6687_v0  ;;  %v5099_v9 = vpack.c.bf16 %v1770_v5, %v1771_v7  ;;  %6154 = vmatprep.mubr.msk.bf16.mxu0 %vm6980_vm1, %v6979_v6  ;;  %v5126_v15 = vpack.c.bf16 %v2001_v21, %v2000_v20  ;;  %v6715_v20 = vld [vmem:[%s8600_s7 + $0x158] sm:$0xff]   ;;  %v6716_v21 = vld [vmem:[%s8600_s7 + $0x150] sm:$0xff]  }
 0x818   : > { %6140 = vmatprep.subr.bf16.mxu0 %v6979_v6 }
 0x819   : > { %6135 = vmatmul.mubr.msk.bf16.vlgmr.msra.gmra.mxu1 %vm7611_vm7, %v5099_v9 }
 0x81a   : > { %6174 = vmatprep.mubr.msk.bf16.mxu1 %vm6980_vm1, %v6979_v6  ;;  %6159 = vmatpush3.bf16.msra.mxu1 %v6695_v23 }
 0x81b   : > { %6141 = vmatpush3.bf16.msra.mxu0 %v6688_v10  ;;  %6160 = vmatprep.subr.bf16.mxu1 %v6979_v6  ;;  %v6711_v10 = vld [vmem:[%s8600_s7 + $0x178] sm:$0xff]  }
 0x81c   : > { %6142 = vmatprep.subr.bf16.mxu0 %v6979_v6 }
 0x81e   : > { %6161 = vmatpush3.bf16.msra.mxu1 %v6696_v32  ;;  %v6718_v32 = vld [vmem:[%s8600_s7 + $0x140] sm:$0xff]  }
 0x81f   : > { %6143 = vmatpush3.bf16.msra.mxu0 %v6689_v11  ;;  %6162 = vmatprep.subr.bf16.mxu1 %v6979_v6 }
 0x820   : > { %6144 = vmatprep.subr.bf16.mxu0 %v6979_v6 }
 0x822   : > { %6163 = vmatpush3.bf16.msra.mxu1 %v6698_v34 }
 0x823   : > { %6145 = vmatpush3.bf16.msra.mxu0 %v6690_v12  ;;  %6164 = vmatprep.subr.bf16.mxu1 %v6979_v6 }
 0x824   : > { %6146 = vmatprep.subr.bf16.mxu0 %v6979_v6 }
 0x826   : > { %6165 = vmatpush3.bf16.msra.mxu1 %v6700_v36 }
 0x827   : > { %6147 = vmatpush3.bf16.msra.mxu0 %v6691_v13  ;;  %6166 = vmatprep.subr.bf16.mxu1 %v6979_v6 }
 0x828   : > { %6148 = vmatprep.subr.bf16.mxu0 %v6979_v6 }
 0x82a   : > { %6167 = vmatpush3.bf16.msra.mxu1 %v6702_v38 }
 0x82b   : > { %6149 = vmatpush3.bf16.msra.mxu0 %v6692_v28  ;;  %6168 = vmatprep.subr.bf16.mxu1 %v6979_v6 }
 0x82c   : > { %6150 = vmatprep.subr.bf16.mxu0 %v6979_v6 }
 0x82e   : > { %6169 = vmatpush3.bf16.msra.mxu1 %v6704_v39 }
 0x82f   : > { %6151 = vmatpush3.bf16.msra.mxu0 %v6693_v14  ;;  %6170 = vmatprep.subr.bf16.mxu1 %v6979_v6 }
 0x830   : > { %6152 = vmatprep.subr.bf16.mxu0 %v6979_v6 }
 0x832   : > { %6171 = vmatpush3.bf16.msra.mxu1 %v6706_v41 }
 0x833   : > { %6153 = vmatpush3.bf16.msra.mxu0 %v6694_v19  ;;  %6172 = vmatprep.subr.bf16.mxu1 %v6979_v6  ;;  %v6714_v19 = vld [vmem:[%s8600_s7 + $0x160] sm:$0xff]  }
 0x834   : > { %6178 = vmatprep.subr.bf16.mxu0 %v6979_v6 }
 0x836   : > { %6155 = vmatmul.mubr.msk.bf16.vlgmr.msra.gmra.mxu0 %vm7656_vm10, %v5126_v15  ;;  %6173 = vmatpush3.bf16.msra.mxu1 %v6708_v43  ;;  %v6717_v15 = vld [vmem:[%s8600_s7 + $0x148] sm:$0xff]  }
 0x837   : > { %6194 = vmatprep.mubr.msk.bf16.mxu0 %vm6980_vm1, %v6979_v6  ;;  %6179 = vmatpush3.bf16.msra.mxu0 %v6697_v30 }
 0x838   : > { %6180 = vmatprep.subr.bf16.mxu0 %v6979_v6  ;;  %6198 = vmatprep.subr.bf16.mxu1 %v6979_v6 }
 0x83b   : > { %6181 = vmatpush3.bf16.msra.mxu0 %v6699_v33 }
 0x83c   : > { %6182 = vmatprep.subr.bf16.mxu0 %v6979_v6 }
 0x83f   : > { %6183 = vmatpush3.bf16.msra.mxu0 %v6701_v35 }
 0x840   : > { %6184 = vmatprep.subr.bf16.mxu0 %v6979_v6 }
 0x843   : > { %6185 = vmatpush3.bf16.msra.mxu0 %v6703_v37 }
 0x844   : > { %6186 = vmatprep.subr.bf16.mxu0 %v6979_v6 }
 0x847   : > { %6187 = vmatpush3.bf16.msra.mxu0 %v6705_v40 }
 0x848   : > { %6188 = vmatprep.subr.bf16.mxu0 %v6979_v6 }
 0x84b   : > { %6189 = vmatpush3.bf16.msra.mxu0 %v6707_v42 }
 0x84c   : > { %6190 = vmatprep.subr.bf16.mxu0 %v6979_v6 }
 0x84f   : > { %6191 = vmatpush3.bf16.msra.mxu0 %v6709_v44 }
 0x850   : > { %6192 = vmatprep.subr.bf16.mxu0 %v6979_v6 }
 0x853   : > { %6193 = vmatpush3.bf16.msra.mxu0 %v6710_v45 }
 0x854   : > { %6218 = vmatprep.subr.bf16.mxu0 %v6979_v6 }
 0x8d6   : > { %v1901_v46 = vpop.f32.mrf.mxu0 }
 0x8d8   : > { %v6116_v48 = vpop.f32.mrf.mxu0 }
 0x8d9   : > { %v1990_v49 = vpop.f32.mrf.mxu1 }
 0x8da   : > { %v1904_v50 = vpop.f32.mrf.mxu0  ;;  %v1991_v55 = vadd.f32 %v1990_v49, %v1901_v46  ;;  %v5208_v46 = vld [vmem:[%s8601_s8 + $0x1] ss:$0 sm:$0xff] }
 0x8db   : > { %v6136_v51 = vpop.f32.mrf.mxu1 }
 0x8dc   : > { %v6117_v52 = vpop.f32.mrf.mxu0 }
 0x8dd   : > { %v1993_v53 = vpop.f32.mrf.mxu1 }
 0x8de   : > { %v1994_v47 = vadd.f32 %v1993_v53, %v1904_v50 }
 0x8df   : > { %v6137_v54 = vpop.f32.mrf.mxu1 }
 0x8f6   : > { %v2114_v56 = vpop.f32.mrf.mxu0 }
 0x8f7   : > { %v2121_v58 = vadd.f32 %v2114_v56, %v1991_v55 }
 0x8f8   : > { %v6156_v59 = vpop.f32.mrf.mxu0 }
 0x8f9   : > { %v2130_v62 = vadd.f32 %v5128_v57, %v2121_v58 }
 0x8fa   : > { %v2117_v63 = vpop.f32.mrf.mxu0 }
 0x8fb   : > { %v2132_v0 = vmax.f32 %v2130_v62, 0.0  ;;  %v2122_v1 = vadd.f32 %v2117_v63, %v1994_v47  ;;  %v6720_v63 = vld [vmem:[%s8595_s2 + $0x238] sm:$0xff]  }
 0x8fc   : > { %v6157_v3 = vpop.f32.mrf.mxu0 }
 0x8fd   : > { %v2131_v4 = vadd.f32 %v5128_v57, %v2122_v1  ;;  %v2134_v5 = vmul.f32 %v2132_v0, %v7197_v26  ;;  %v6722_v0 = vld [vmem:[%s8595_s2 + $0x230] sm:$0xff]   ;;  %v6723_v1 = vld [vmem:[%s8595_s2 + $0x1a8] sm:$0xff]  }
 0x8fe   : > { %v6724_v3 = vld [vmem:[%s8595_s2 + $0x228] sm:$0xff]  }
 0x8ff   : > { %v2133_v7 = vmax.f32 %v2131_v4, 0.0  ;;  %v2136_v11 = vrot.slane %v2134_v5, 7  ;;  %v2356_v30 = vrot.slane %v2134_v5, 1  ;;  %v6725_v4 = vld [vmem:[%s8595_s2 + $0x1a0] sm:$0xff]  }
 0x901   : > { %v2135_v9 = vmul.f32 %v2133_v7, %v7192_v22  ;;  %v6727_v7 = vld [vmem:[%s8595_s2 + $0x198] sm:$0xff]  }
 0x903   : > { %v2137_v12 = vrot.slane %v2135_v9, 7  ;;  %v2160_v13 = vpack.c.bf16 %v2135_v9, %v2134_v5  ;;  %v2357_v23 = vrot.slane %v2135_v9, 1  ;;  %v6726_v5 = vld [vmem:[%s8595_s2 + $0x220] sm:$0xff]   ;;  %v6728_v9 = vld [vmem:[%s8595_s2 + $0x218] sm:$0xff]  }
 0x905   : > { %6175 = vmatmul.mubr.bf16.vlgmr.msra.gmra.mxu1 %v2160_v13  ;;  %v2138_v28 = vsel %vm1769_vm4, %v2136_v11, %v2137_v12  ;;  %v2139_v14 = vsel %vm1769_vm4, %v2137_v12, %v2136_v11  ;;  %v2358_v33 = vsel %vm1999_vm8, %v2356_v30, %v2357_v23  ;;  %v2359_v34 = vsel %vm1999_vm8, %v2357_v23, %v2356_v30  ;;  %v6730_v11 = vld [vmem:[%s8595_s2 + $0x210] sm:$0xff]   ;;  %v6731_v12 = vld [vmem:[%s8595_s2 + $0x188] sm:$0xff]  }
 0x906   : > { %6199 = vmatpush3.bf16.msra.mxu1 %v6711_v10  ;;  %v5178_v29 = vpack.c.bf16 %v2138_v28, %v2139_v14  ;;  %6214 = vmatprep.mubr.msk.bf16.mxu1 %vm6980_vm1, %v6979_v6  ;;  %v5205_v35 = vpack.c.bf16 %v2359_v34, %v2358_v33  ;;  %v6729_v10 = vld [vmem:[%s8595_s2 + $0x190] sm:$0xff]   ;;  %v6732_v13 = vld [vmem:[%s8595_s2 + $0x208] sm:$0xff]   ;;  %v6733_v28 = vld [vmem:[%s8595_s2 + $0x180] sm:$0xff]  }
 0x907   : > { %6200 = vmatprep.subr.bf16.mxu1 %v6979_v6  ;;  %v6734_v14 = vld [vmem:[%s8595_s2 + $0x200] sm:$0xff]  }
 0x908   : > { %6195 = vmatmul.mubr.msk.bf16.vlgmr.msra.gmra.mxu0 %vm7611_vm7, %v5178_v29 }
 0x909   : > { %6234 = vmatprep.mubr.msk.bf16.mxu0 %vm6980_vm1, %v6979_v6 }
 0x90a   : > { %6201 = vmatpush3.bf16.msra.mxu1 %v6712_v16 }
 0x90b   : > { %6202 = vmatprep.subr.bf16.mxu1 %v6979_v6 }
 0x90e   : > { %6203 = vmatpush3.bf16.msra.mxu1 %v6713_v17 }
 0x90f   : > { %6204 = vmatprep.subr.bf16.mxu1 %v6979_v6 }
 0x912   : > { %6205 = vmatpush3.bf16.msra.mxu1 %v6714_v19 }
 0x913   : > { %6206 = vmatprep.subr.bf16.mxu1 %v6979_v6 }
 0x916   : > { %6207 = vmatpush3.bf16.msra.mxu1 %v6715_v20 }
 0x917   : > { %6208 = vmatprep.subr.bf16.mxu1 %v6979_v6 }
 0x91a   : > { %6209 = vmatpush3.bf16.msra.mxu1 %v6716_v21 }
 0x91b   : > { %6210 = vmatprep.subr.bf16.mxu1 %v6979_v6 }
 0x91e   : > { %6211 = vmatpush3.bf16.msra.mxu1 %v6717_v15 }
 0x91f   : > { %6212 = vmatprep.subr.bf16.mxu1 %v6979_v6 }
 0x922   : > { %6213 = vmatpush3.bf16.msra.mxu1 %v6718_v32 }
 0x923   : > { %6238 = vmatprep.subr.bf16.mxu1 %v6979_v6 }
 0x925   : > { %6215 = vmatmul.mubr.msk.bf16.vlgmr.msra.gmra.mxu1 %vm7656_vm10, %v5205_v35 }
 0x926   : > { %6254 = vmatprep.mubr.msk.bf16.mxu1 %vm6980_vm1, %v6979_v6  ;;  %6239 = vmatpush3.bf16.msra.mxu1 %v6720_v63  ;;  %v6747_v63 = vld [vmem:[%s8595_s2 + $0x258] sm:$0xff]  }
 0x927   : > { %6240 = vmatprep.subr.bf16.mxu1 %v6979_v6 }
 0x92a   : > { %6241 = vmatpush3.bf16.msra.mxu1 %v6722_v0  ;;  %v6749_v0 = vld [vmem:[%s8595_s2 + $0x248] sm:$0xff]  }
 0x92b   : > { %6242 = vmatprep.subr.bf16.mxu1 %v6979_v6 }
 0x92e   : > { %6243 = vmatpush3.bf16.msra.mxu1 %v6724_v3 }
 0x92f   : > { %6244 = vmatprep.subr.bf16.mxu1 %v6979_v6 }
 0x932   : > { %6245 = vmatpush3.bf16.msra.mxu1 %v6726_v5  ;;  %v5256_v5 = vld [vmem:[%s8596_s3 + $0x8] ss:$0 sm:$0xff] }
 0x933   : > { %6246 = vmatprep.subr.bf16.mxu1 %v6979_v6 }
 0x936   : > { %6247 = vmatpush3.bf16.msra.mxu1 %v6728_v9 }
 0x937   : > { %6248 = vmatprep.subr.bf16.mxu1 %v6979_v6 }
 0x93a   : > { %6249 = vmatpush3.bf16.msra.mxu1 %v6730_v11 }
 0x93b   : > { %6250 = vmatprep.subr.bf16.mxu1 %v6979_v6 }
 0x93e   : > { %6251 = vmatpush3.bf16.msra.mxu1 %v6732_v13 }
 0x93f   : > { %6252 = vmatprep.subr.bf16.mxu1 %v6979_v6 }
 0x942   : > { %6253 = vmatpush3.bf16.msra.mxu1 %v6734_v14 }
 0x943   : > { %6278 = vmatprep.subr.bf16.mxu1 %v6979_v6 }
 0x9c5   : > { %v2260_v36 = vpop.f32.mrf.mxu1 }
 0x9c7   : > { %v6176_v37 = vpop.f32.mrf.mxu1 }
 0x9c8   : > { %v2349_v38 = vpop.f32.mrf.mxu0 }
 0x9c9   : > { %v2263_v39 = vpop.f32.mrf.mxu1  ;;  %v2350_v44 = vadd.f32 %v2349_v38, %v2260_v36 }
 0x9ca   : > { %v6196_v40 = vpop.f32.mrf.mxu0 }
 0x9cb   : > { %v6177_v41 = vpop.f32.mrf.mxu1  ;;  %v5211_v40 = vld [vmem:[%s8599_s6 + $0x2] ss:$0 sm:$0xff] }
 0x9cc   : > { %v2352_v42 = vpop.f32.mrf.mxu0 }
 0x9cd   : > { %v2353_v50 = vadd.f32 %v2352_v42, %v2263_v39 }
 0x9ce   : > { %v6197_v43 = vpop.f32.mrf.mxu0 }
 0x9e5   : > { %v2462_v45 = vpop.f32.mrf.mxu1 }
 0x9e6   : > { %v2469_v48 = vadd.f32 %v2462_v45, %v2350_v44  ;;  %v5212_v45 = vld [vmem:[%s8599_s6 + $0x3] ss:$0 sm:$0xff] }
 0x9e7   : > { %v6216_v49 = vpop.f32.mrf.mxu1 }
 0x9e8   : > { %v2479_v51 = vadd.f32 %v5208_v46, %v2469_v48 }
 0x9e9   : > { %v2465_v52 = vpop.f32.mrf.mxu1 }
 0x9ea   : > { %v2481_v53 = vmul.f32 %v2479_v51, %v7197_v26  ;;  %v2470_v54 = vadd.f32 %v2465_v52, %v2353_v50  ;;  %v6735_v50 = vld [vmem:[%s8595_s2 + $0x2b8] sm:$0xff]   ;;  %v6736_v52 = vld [vmem:[%s8595_s2 + $0x2b0] sm:$0xff]  }
 0x9eb   : > { %v6217_v55 = vpop.f32.mrf.mxu1 }
 0x9ec   : > { %v2480_v56 = vadd.f32 %v5208_v46, %v2470_v54  ;;  %v7789_v57 = vadd.f32 %v2481_v53, %v7593_v60  ;;  %v6719_v60 = vld [vmem:[%s8595_s2 + $0x1b8] sm:$0xff]   ;;  %v6737_v53 = vld [vmem:[%s8595_s2 + $0x2a8] sm:$0xff]   ;;  %v6738_v54 = vld [vmem:[%s8595_s2 + $0x2a0] sm:$0xff]  }
 0x9ed   : > { %6219 = vmatpush3.bf16.msra.mxu0 %v6719_v60  ;;  %v6739_v55 = vld [vmem:[%s8595_s2 + $0x298] sm:$0xff]   ;;  %v6746_v60 = vld [vmem:[%s8595_s2 + $0x260] sm:$0xff]  }
 0x9ee   : > { %v2482_v58 = vmul.f32 %v2480_v56, %v7192_v22  ;;  %2489 = vadd.xlane.f32.xlu0 %v7789_v57  ;;  %v2495_v59 = vmul.f32 %v7789_v57, %v7789_v57  ;;  %6220 = vmatprep.subr.bf16.mxu0 %v6979_v6  ;;  %v6740_v56 = vld [vmem:[%s8595_s2 + $0x290] sm:$0xff]  }
 0x9f0   : > { %v7796_v47 = vadd.f32 %v2482_v58, %v7595_v61  ;;  %v6721_v61 = vld [vmem:[%s8595_s2 + $0x1b0] sm:$0xff]   ;;  %v6742_v58 = vld [vmem:[%s8595_s2 + $0x280] sm:$0xff]  }
 0x9f1   : > { %6221 = vmatpush3.bf16.msra.mxu0 %v6721_v61  ;;  %v6748_v61 = vld [vmem:[%s8595_s2 + $0x250] sm:$0xff]  }
 0x9f2   : > { %2497 = vadd.xlane.f32.xlu0 %v2495_v59  ;;  %2491 = vadd.xlane.f32.xlu1 %v7796_v47  ;;  %v2496_v62 = vmul.f32 %v7796_v47, %v7796_v47  ;;  %v6743_v59 = vld [vmem:[%s8595_s2 + $0x278] sm:$0xff]  }
 0x9f3   : > { %6222 = vmatprep.subr.bf16.mxu0 %v6979_v6 }
 0x9f5   : > { %6223 = vmatpush3.bf16.msra.mxu0 %v6723_v1  ;;  %v6750_v1 = vld [vmem:[%s8595_s2 + $0x240] sm:$0xff]  }
 0x9f6   : > { %2499 = vadd.xlane.f32.xlu1 %v2496_v62  ;;  %6224 = vmatprep.subr.bf16.mxu0 %v6979_v6  ;;  %v6745_v62 = vld [vmem:[%s8595_s2 + $0x268] sm:$0xff]  }
 0x9f9   : > { %6225 = vmatpush3.bf16.msra.mxu0 %v6725_v4 }
 0x9fa   : > { %6226 = vmatprep.subr.bf16.mxu0 %v6979_v6 }
 0x9fd   : > { %6227 = vmatpush3.bf16.msra.mxu0 %v6727_v7 }
 0x9fe   : > { %6228 = vmatprep.subr.bf16.mxu0 %v6979_v6 }
 0xa01   : > { %6229 = vmatpush3.bf16.msra.mxu0 %v6729_v10 }
 0xa02   : > { %6230 = vmatprep.subr.bf16.mxu0 %v6979_v6 }
 0xa05   : > { %6231 = vmatpush3.bf16.msra.mxu0 %v6731_v12 }
 0xa06   : > { %6232 = vmatprep.subr.bf16.mxu0 %v6979_v6 }
 0xa09   : > { %6233 = vmatpush3.bf16.msra.mxu0 %v6733_v28 }
 0xa0a   : > { %6258 = vmatprep.subr.bf16.mxu0 %v6979_v6 }
 0xa77   : > { %v2490_v29 = vpop.xlane.xlu0 %2489 }
 0xa78   : > { %v2493_v16 = vmul.f32 0.25, %v2490_v29 }
 0xa7a   : > { %v2503_v20 = vmul.f32 %v2493_v16, %v2493_v16  ;;  %v2507_v37 = vsub.f32 %v7789_v57, %v2493_v16  ;;  %v6741_v57 = vld [vmem:[%s8595_s2 + $0x288] sm:$0xff]   ;;  %v5230_v16 = vld [vmem:[%s8596_s3 + $0x6] ss:$0 sm:$0xff] }
 0xa7b   : > { %v2498_v17 = vpop.xlane.xlu0 %2497  ;;  %v2492_v19 = vpop.xlane.xlu1 %2491 }
 0xa7c   : > { %v2501_v21 = vmul.f32 0.25, %v2498_v17  ;;  %v2494_v15 = vmul.f32 0.25, %v2492_v19 }
 0xa7e   : > { %v2505_v23 = vsub.f32 %v2501_v21, %v2503_v20  ;;  %v2504_v33 = vmul.f32 %v2494_v15, %v2494_v15  ;;  %v2508_v41 = vsub.f32 %v7796_v47, %v2494_v15  ;;  %v6744_v47 = vld [vmem:[%s8595_s2 + $0x270] sm:$0xff]   ;;  %v5282_v15 = vld [vmem:[%s8596_s3 + $0xa] ss:$0 sm:$0xff] }
 0xa7f   : > { %v2500_v30 = vpop.xlane.xlu1 %2499 }
 0xa80   : > { %v2509_v32 = vadd.f32 1e-05, %v2505_v23  ;;  %v2502_v34 = vmul.f32 0.25, %v2500_v30 }
 0xa82   : > { %6875 = vrsqrt.f32 %v2509_v32  ;;  %v2506_v35 = vsub.f32 %v2502_v34, %v2504_v33 }
 0xa84   : > { %v2510_v36 = vadd.f32 1e-05, %v2506_v35 }
 0xa86   : > { %6877 = vrsqrt.f32 %v2510_v36 }
 0xa8f   : > { %v6876_v38 = vpop.eup %6875 }
 0xa90   : > { %v2513_v39 = vmul.f32 %v6876_v38, %v2507_v37  ;;  %v5351_v37 = vld [vmem:[%s8596_s3 + $0x9] ss:$0 sm:$0xff] }
 0xa92   : > { %v2521_v43 = vmul.f32 %v5211_v40, %v2513_v39 }
 0xa93   : > { %v6878_v42 = vpop.eup %6877 }
 0xa94   : > { %v2514_v44 = vmul.f32 %v6878_v42, %v2508_v41  ;;  %v7873_v48 = vadd.f32 %v5212_v45, %v2521_v43 }
 0xa96   : > { %v2522_v46 = vmul.f32 %v5211_v40, %v2514_v44 }
 0xa98   : > { %v7875_v49 = vadd.f32 %v5212_v45, %v2522_v46 }
 0xa9a   : > { %v7882_v51 = vpack.c.bf16 %v7875_v49, %v7873_v48 }
 0xa9c   : > { %6235 = vmatmul.mubr.bf16.vlgmr.msra.gmra.mxu0 %v7882_v51  ;;  %6255 = vmatmul.mubr.bf16.vlgmr.msra.gmra.mxu1 %v7882_v51 }
 0xa9d   : > { %6259 = vmatpush3.bf16.msra.mxu0 %v6735_v50  ;;  %6274 = vmatprep.mubr.msk.bf16.mxu0 %vm6980_vm1, %v6979_v6 }
 0xa9e   : > { %6260 = vmatprep.subr.bf16.mxu0 %v6979_v6  ;;  %6280 = vmatprep.mubr.msk.bf16.mxu1 %vm6980_vm1, %v6979_v6 }
 0xaa1   : > { %6261 = vmatpush3.bf16.msra.mxu0 %v6736_v52 }
 0xaa2   : > { %6262 = vmatprep.subr.bf16.mxu0 %v6979_v6 }
 0xaa5   : > { %6263 = vmatpush3.bf16.msra.mxu0 %v6737_v53 }
 0xaa6   : > { %6264 = vmatprep.subr.bf16.mxu0 %v6979_v6 }
 0xaa9   : > { %6265 = vmatpush3.bf16.msra.mxu0 %v6738_v54 }
 0xaaa   : > { %6266 = vmatprep.subr.bf16.mxu0 %v6979_v6 }
 0xaad   : > { %6267 = vmatpush3.bf16.msra.mxu0 %v6739_v55 }
 0xaae   : > { %6268 = vmatprep.subr.bf16.mxu0 %v6979_v6 }
 0xab1   : > { %6269 = vmatpush3.bf16.msra.mxu0 %v6740_v56 }
 0xab2   : > { %6270 = vmatprep.subr.bf16.mxu0 %v6979_v6 }
 0xab5   : > { %6271 = vmatpush3.bf16.msra.mxu0 %v6741_v57 }
 0xab6   : > { %6272 = vmatprep.subr.bf16.mxu0 %v6979_v6 }
 0xab9   : > { %6273 = vmatpush3.bf16.msra.mxu0 %v6742_v58 }
 0xaba   : > { %6310 = vmatprep.subr.bf16.mxu0 %v6979_v6 }
 0xabc   : > { %6275 = vmatmul.mubr.bf16.vlgmr.msra.gmra.mxu0 %v7882_v51 }
 0xabd   : > { %6311 = vmatpush3.bf16.msra.mxu0 %v6743_v59  ;;  %6326 = vmatprep.mubr.msk.bf16.mxu0 %vm6980_vm1, %v6979_v6 }
 0xabe   : > { %6312 = vmatprep.subr.bf16.mxu0 %v6979_v6 }
 0xac1   : > { %6313 = vmatpush3.bf16.msra.mxu0 %v6744_v47 }
 0xac2   : > { %6314 = vmatprep.subr.bf16.mxu0 %v6979_v6 }
 0xac5   : > { %6315 = vmatpush3.bf16.msra.mxu0 %v6745_v62 }
 0xac6   : > { %6316 = vmatprep.subr.bf16.mxu0 %v6979_v6 }
 0xac9   : > { %6317 = vmatpush3.bf16.msra.mxu0 %v6746_v60 }
 0xaca   : > { %6318 = vmatprep.subr.bf16.mxu0 %v6979_v6 }
 0xacd   : > { %6319 = vmatpush3.bf16.msra.mxu0 %v6747_v63 }
 0xace   : > { %6320 = vmatprep.subr.bf16.mxu0 %v6979_v6 }
 0xad1   : > { %6321 = vmatpush3.bf16.msra.mxu0 %v6748_v61 }
 0xad2   : > { %6322 = vmatprep.subr.bf16.mxu0 %v6979_v6 }
 0xad5   : > { %6323 = vmatpush3.bf16.msra.mxu0 %v6749_v0 }
 0xad6   : > { %6324 = vmatprep.subr.bf16.mxu0 %v6979_v6 }
 0xad9   : > { %6325 = vmatpush3.bf16.msra.mxu0 %v6750_v1  ;;  %v6751_v1 = vld [vmem:[%s8595_s2 + $0x1f8] sm:$0xff]  }
 0xada   : > { %6350 = vmatprep.subr.bf16.mxu0 %v6979_v6 }
 0xadc   : > { %6327 = vmatmul.mubr.bf16.vlgmr.msra.gmra.mxu0 %v7882_v51 }
 0xadd   : > { %6352 = vmatprep.mubr.msk.bf16.mxu0 %vm6980_vm1, %v6979_v6 }
 0xb5c   : > { %v2639_v3 = vpop.f32.mrf.mxu0  ;;  %v2753_v4 = vpop.f32.mrf.mxu1 }
 0xb5d   : > { %v2754_v12 = vadd.f32 %v5256_v5, %v2753_v4  ;;  %v2640_v19 = vadd.f32 %v5230_v16, %v2639_v3  ;;  %v6752_v4 = vld [vmem:[%s8595_s2 + $0x1f0] sm:$0xff]  }
 0xb5e   : > { %v6236_v7 = vpop.f32.mrf.mxu0  ;;  %v6256_v9 = vpop.f32.mrf.mxu1 }
 0xb5f   : > { %v6754_v7 = vld [vmem:[%s8595_s2 + $0x1e0] sm:$0xff]   ;;  %v6755_v9 = vld [vmem:[%s8595_s2 + $0x1d8] sm:$0xff]  }
 0xb60   : > { %v2642_v10 = vpop.f32.mrf.mxu0  ;;  %v2756_v11 = vpop.f32.mrf.mxu1 }
 0xb61   : > { %v2757_v13 = vadd.f32 %v5256_v5, %v2756_v11  ;;  %v2643_v17 = vadd.f32 %v5230_v16, %v2642_v10  ;;  %v6753_v5 = vld [vmem:[%s8595_s2 + $0x1e8] sm:$0xff]   ;;  %v6756_v10 = vld [vmem:[%s8595_s2 + $0x1d0] sm:$0xff]   ;;  %v6763_v16 = vld [vmem:[%s8595_s2 + $0x2d8] sm:$0xff]  }
 0xb62   : > { %v6237_v28 = vpop.f32.mrf.mxu0  ;;  %v6257_v14 = vpop.f32.mrf.mxu1  ;;  %v6757_v11 = vld [vmem:[%s8595_s2 + $0x1c8] sm:$0xff]  }
 0xb63   : > { %v2875_v29 = vpack.c.bf16 %v2757_v13, %v2754_v12  ;;  %v2874_v20 = vpack.c.bf16 %v2643_v17, %v2640_v19  ;;  %v6758_v12 = vld [vmem:[%s8595_s2 + $0x1c0] sm:$0xff]   ;;  %v6759_v13 = vld [vmem:[%s8595_s2 + $0x2f8] sm:$0xff]   ;;  %v6760_v28 = vld [vmem:[%s8595_s2 + $0x2f0] sm:$0xff]  }
 0xb64   : > { %v6761_v14 = vld [vmem:[%s8595_s2 + $0x2e8] sm:$0xff]   ;;  %v6764_v17 = vld [vmem:[%s8595_s2 + $0x2d0] sm:$0xff]  }
 0xb65   : > { %6279 = vmatpush3.bf16.xpose.msra.mxu1 %v2875_v29  ;;  %v6762_v29 = vld [vmem:[%s8595_s2 + $0x2e0] sm:$0xff]   ;;  %v6765_v19 = vld [vmem:[%s8595_s2 + $0x2c8] sm:$0xff]  }
 0xb66   : > { %6284 = vmatprep.subr.bf16.mxu1 %v6979_v6 }
 0xb6c   : > { %6281 = vmatmul.mubr.bf16.vlgmr.msra.gmra.mxu1 %v2874_v20  ;;  %v6766_v20 = vld [vmem:[%s8595_s2 + $0x2c0] sm:$0xff]  }
 0xb6d   : > { %6286 = vmatprep.mubr.msk.bf16.mxu1 %vm6980_vm1, %v6979_v6 }
 0xb7c   : > { %v2867_v21 = vpop.f32.mrf.mxu0 }
 0xb7d   : > { %v2868_v32 = vadd.f32 %v5282_v15, %v2867_v21 }
 0xb7e   : > { %v6276_v23 = vpop.f32.mrf.mxu0 }
 0xb80   : > { %v2870_v30 = vpop.f32.mrf.mxu0 }
 0xb81   : > { %v2871_v33 = vadd.f32 %v5282_v15, %v2870_v30 }
 0xb82   : > { %v6277_v34 = vpop.f32.mrf.mxu0 }
 0xb83   : > { %v2876_v35 = vpack.c.bf16 %v2871_v33, %v2868_v32 }
 0xb85   : > { %6285 = vmatpush3.bf16.msra.mxu1 %v2876_v35 }
 0xb86   : > { %6290 = vmatprep.subr.bf16.mxu1 %v6979_v6 }
 0xb9c   : > { %v3238_v36 = vpop.f32.mrf.mxu0 }
 0xb9d   : > { %v3239_v40 = vadd.f32 %v5351_v37, %v3238_v36 }
 0xb9e   : > { %v6328_v38 = vpop.f32.mrf.mxu0 }
 0xba0   : > { %v3241_v39 = vpop.f32.mrf.mxu0 }
 0xba1   : > { %v3242_v41 = vadd.f32 %v5351_v37, %v3241_v39 }
 0xba2   : > { %v6329_v42 = vpop.f32.mrf.mxu0 }
 0xba3   : > { %v3360_v43 = vpack.c.bf16 %v3242_v41, %v3239_v40  ;;  %v5325_v42 = vld [vmem:[%s8596_s3 + $0x7] ss:$0 sm:$0xff] }
 0xba5   : > { %6351 = vmatpush3.bf16.xpose.msra.mxu0 %v3360_v43 }
 0xba6   : > { %6356 = vmatprep.subr.bf16.mxu0 %v6979_v6 }
 0xc2c   : > { %v2911_v44 = vpop.f32.mrf.mxu1 }
 0xc2d   : > { %v2912_v45 = vadd.f32 %v2911_v44, %v7311_v25 }
 0xc2e   : > { %v6282_v46 = vpop.f32.mrf.mxu1 }
 0xc2f   : > { %v2918_v50 = vsel %vm947_vm3, %v2912_v45, -inf }
 0xc30   : > { %2919 = vmax.xlane.f32.xlu0 %v2918_v50  ;;  %v2914_v52 = vpop.f32.mrf.mxu1 }
 0xc31   : > { %v2915_v53 = vadd.f32 %v2914_v52, %v7311_v25 }
 0xc32   : > { %v6283_v54 = vpop.f32.mrf.mxu1 }
 0xc33   : > { %v2921_v55 = vsel %vm947_vm3, %v2915_v53, -inf  ;;  %v5377_v54 = vld [vmem:[%s8596_s3 + $0xb] ss:$0 sm:$0xff] }
 0xc34   : > { %2922 = vmax.xlane.f32.xlu1 %v2921_v55 }
 0xcb9   : > { %v7978_v56 = vpop.xlane.xlu0 %2919 }
 0xcba   : > { %v2924_v57 = vmax.f32 %v7978_v56, -1e+30 }
 0xcbc   : > { %v2932_v58 = vsub.f32 %v2912_v45, %v2924_v57  ;;  %v2926_v21 = vsub.f32 -1e+30, %v2924_v57 }
 0xcbd   : > { %v7983_v59 = vpop.xlane.xlu1 %2922 }
 0xcbe   : > { %v2925_v47 = vmax.f32 %v7983_v59, -1e+30  ;;  %v2934_v62 = vmul.f32 1.442695, %v2932_v58  ;;  %v2928_v15 = vmul.f32 1.442695, %v2926_v21 }
 0xcc0   : > { %v2933_v60 = vsub.f32 %v2915_v53, %v2925_v47  ;;  %6879 = vpow2.f32 %v2934_v62  ;;  %v2927_v23 = vsub.f32 -1e+30, %v2925_v47  ;;  %v6767_v62 = vld [vmem:[%s8597_s4 + $0xb8] sm:$0xff]  }
 0xcc2   : > { %v2936_v63 = vmul.f32 1.442695, %v2933_v60  ;;  %v2930_v30 = vmul.f32 1.442695, %v2927_v23 }
 0xcc4   : > { %6881 = vpow2.f32 %v2936_v63 }
 0xcc5   : > { %6883 = vpow2.f32 %v2928_v15 }
 0xcc6   : > { %6885 = vpow2.f32 %v2930_v30 }
 0xccd   : > { %v7988_v61 = vpop.eup %6879 }
 0xcd1   : > { %v7990_v0 = vpop.eup %6881 }
 0xcd2   : > { %v2948_v3 = vpack.c.bf16 %v7990_v0, %v7988_v61  ;;  %v6884_v32 = vpop.eup %6883 }
 0xcd3   : > { %v8071_v33 = vmul.f32 0.0, %v6884_v32  ;;  %v6886_v34 = vpop.eup %6885 }
 0xcd4   : > { %6287 = vmatmul.mubr.msk.bf16.vlgmr.msra.gmra.mxu1 %vm947_vm3, %v2948_v3  ;;  %v8076_v37 = vmul.f32 0.0, %v6886_v34 }
 0xcd5   : > { %6291 = vmatpush3.bf16.msra.mxu1 %v6751_v1  ;;  %6306 = vmatprep.mubr.msk.bf16.mxu1 %vm6980_vm1, %v6979_v6 }
 0xcd6   : > { %6292 = vmatprep.subr.bf16.mxu1 %v6979_v6 }
 0xcd9   : > { %6293 = vmatpush3.bf16.msra.mxu1 %v6752_v4 }
 0xcda   : > { %6294 = vmatprep.subr.bf16.mxu1 %v6979_v6 }
 0xcdd   : > { %6295 = vmatpush3.bf16.msra.mxu1 %v6753_v5 }
 0xcde   : > { %6296 = vmatprep.subr.bf16.mxu1 %v6979_v6 }
 0xce1   : > { %6297 = vmatpush3.bf16.msra.mxu1 %v6754_v7 }
 0xce2   : > { %6298 = vmatprep.subr.bf16.mxu1 %v6979_v6 }
 0xce5   : > { %6299 = vmatpush3.bf16.msra.mxu1 %v6755_v9  ;;  %v2940_v9 = vsel %vm947_vm3, %v7988_v61, 0.0  ;;  %v6770_v61 = vld [vmem:[%s8597_s4 + $0xa0] sm:$0xff]  }
 0xce6   : > { %6300 = vmatprep.subr.bf16.mxu1 %v6979_v6 }
 0xce9   : > { %6301 = vmatpush3.bf16.msra.mxu1 %v6756_v10 }
 0xcea   : > { %6302 = vmatprep.subr.bf16.mxu1 %v6979_v6 }
 0xced   : > { %6303 = vmatpush3.bf16.msra.mxu1 %v6757_v11  ;;  %v2943_v11 = vsel %vm947_vm3, %v7990_v0, 0.0  ;;  %v6771_v0 = vld [vmem:[%s8597_s4 + $0x98] sm:$0xff]  }
 0xcee   : > { %6304 = vmatprep.subr.bf16.mxu1 %v6979_v6 }
 0xcf1   : > { %6305 = vmatpush3.bf16.msra.mxu1 %v6758_v12  ;;  %v6768_v12 = vld [vmem:[%s8597_s4 + $0xb0] sm:$0xff]  }
 0xcf2   : > { %6330 = vmatprep.subr.bf16.mxu1 %v6979_v6 }
 0xcf4   : > { %6307 = vmatmul.mubr.bf16.vlgmr.msra.gmra.mxu1 %v7882_v51 }
 0xcf5   : > { %6331 = vmatpush3.bf16.msra.mxu1 %v6759_v13  ;;  %6346 = vmatprep.mubr.msk.bf16.mxu1 %vm6980_vm1, %v6979_v6  ;;  %v6772_v13 = vld [vmem:[%s8597_s4 + $0x90] sm:$0xff]  }
 0xcf6   : > { %6332 = vmatprep.subr.bf16.mxu1 %v6979_v6 }
 0xcf9   : > { %6333 = vmatpush3.bf16.msra.mxu1 %v6760_v28  ;;  %v6773_v28 = vld [vmem:[%s8597_s4 + $0x88] sm:$0xff]  }
 0xcfa   : > { %6334 = vmatprep.subr.bf16.mxu1 %v6979_v6 }
 0xcfd   : > { %6335 = vmatpush3.bf16.msra.mxu1 %v6761_v14  ;;  %v6774_v14 = vld [vmem:[%s8597_s4 + $0x80] sm:$0xff]  }
 0xcfe   : > { %6336 = vmatprep.subr.bf16.mxu1 %v6979_v6 }
 0xd01   : > { %6337 = vmatpush3.bf16.msra.mxu1 %v6762_v29 }
 0xd02   : > { %6338 = vmatprep.subr.bf16.mxu1 %v6979_v6 }
 0xd05   : > { %6339 = vmatpush3.bf16.msra.mxu1 %v6763_v16 }
 0xd06   : > { %6340 = vmatprep.subr.bf16.mxu1 %v6979_v6 }
 0xd09   : > { %6341 = vmatpush3.bf16.msra.mxu1 %v6764_v17 }
 0xd0a   : > { %6342 = vmatprep.subr.bf16.mxu1 %v6979_v6 }
 0xd0d   : > { %6343 = vmatpush3.bf16.msra.mxu1 %v6765_v19 }
 0xd0e   : > { %6344 = vmatprep.subr.bf16.mxu1 %v6979_v6 }
 0xd11   : > { %6345 = vmatpush3.bf16.msra.mxu1 %v6766_v20 }
 0xd12   : > { %6382 = vmatprep.subr.bf16.mxu1 %v6979_v6 }
 0xd14   : > { %6347 = vmatmul.mubr.bf16.vlgmr.msra.gmra.mxu1 %v7882_v51 }
 0xd15   : > { %6398 = vmatprep.mubr.msk.bf16.mxu1 %vm6980_vm1, %v6979_v6  ;;  %6383 = vmatpush3.bf16.msra.mxu1 %v6767_v62 }
 0xd16   : > { %6384 = vmatprep.subr.bf16.mxu1 %v6979_v6 }
 0xd19   : > { %6385 = vmatpush3.bf16.msra.mxu1 %v6768_v12 }
 0xd1a   : > { %6386 = vmatprep.subr.bf16.mxu1 %v6979_v6 }
 0xd94   : > { %v2986_v35 = vpop.f32.mrf.mxu1 }
 0xd95   : > { %v8074_v51 = vadd.f32 %v2986_v35, %v8071_v33 }
 0xd96   : > { %v6288_v36 = vpop.f32.mrf.mxu1 }
 0xd98   : > { %v2989_v38 = vpop.f32.mrf.mxu1 }
 0xd99   : > { %v8079_v39 = vadd.f32 %v2989_v38, %v8076_v37 }
 0xd9a   : > { %v6289_v40 = vpop.f32.mrf.mxu1 }
 0xdb4   : > { %v3124_v41 = vpop.f32.mrf.mxu1 }
 0xdb5   : > { %v3125_v45 = vadd.f32 %v5325_v42, %v3124_v41 }
 0xdb6   : > { %v6308_v43 = vpop.f32.mrf.mxu1 }
 0xdb8   : > { %v3127_v44 = vpop.f32.mrf.mxu1 }
 0xdb9   : > { %v3128_v46 = vadd.f32 %v5325_v42, %v3127_v44 }
 0xdba   : > { %v6309_v50 = vpop.f32.mrf.mxu1 }
 0xdbb   : > { %v3359_v52 = vpack.c.bf16 %v3128_v46, %v3125_v45  ;;  %v6776_v46 = vld [vmem:[%s8597_s4 + $0xf0] sm:$0xff]   ;;  %v6778_v50 = vld [vmem:[%s8597_s4 + $0xe0] sm:$0xff]  }
 0xdbd   : > { %6353 = vmatmul.mubr.bf16.vlgmr.msra.gmra.mxu0 %v3359_v52  ;;  %v6779_v52 = vld [vmem:[%s8597_s4 + $0xd8] sm:$0xff]  }
 0xdbe   : > { %6358 = vmatprep.mubr.msk.bf16.mxu0 %vm6980_vm1, %v6979_v6 }
 0xdd4   : > { %v3352_v53 = vpop.f32.mrf.mxu1 }
 0xdd5   : > { %v3353_v57 = vadd.f32 %v5377_v54, %v3352_v53  ;;  %v6780_v53 = vld [vmem:[%s8597_s4 + $0xd0] sm:$0xff]  }
 0xdd6   : > { %v6348_v55 = vpop.f32.mrf.mxu1 }
 0xdd7   : > { %v6782_v55 = vld [vmem:[%s8597_s4 + $0xc0] sm:$0xff]  }
 0xdd8   : > { %v3355_v56 = vpop.f32.mrf.mxu1 }
 0xdd9   : > { %v3356_v58 = vadd.f32 %v5377_v54, %v3355_v56  ;;  %v6781_v54 = vld [vmem:[%s8597_s4 + $0xc8] sm:$0xff]  }
 0xdda   : > { %v6349_v59 = vpop.f32.mrf.mxu1 }
 0xddb   : > { %v3361_v47 = vpack.c.bf16 %v3356_v58, %v3353_v57 }
 0xddd   : > { %6357 = vmatpush3.bf16.msra.mxu0 %v3361_v47 }
 0xdde   : > { %6362 = vmatprep.subr.bf16.mxu0 %v6979_v6 }
 0xe7d   : > { %v3396_v60 = vpop.f32.mrf.mxu0 }
 0xe7e   : > { %v3397_v63 = vadd.f32 %v3396_v60, %v7311_v25 }
 0xe7f   : > { %v6354_v1 = vpop.f32.mrf.mxu0 }
 0xe80   : > { %v3403_v3 = vsel %vm947_vm3, %v3397_v63, -inf }
 0xe81   : > { %3404 = vmax.xlane.f32.xlu0 %v3403_v3  ;;  %v3399_v4 = vpop.f32.mrf.mxu0 }
 0xe82   : > { %v3400_v5 = vadd.f32 %v3399_v4, %v7311_v25  ;;  %v6769_v25 = vld [vmem:[%s8597_s4 + $0xa8] sm:$0xff]  }
 0xe83   : > { %v6355_v7 = vpop.f32.mrf.mxu0  ;;  %6387 = vmatpush3.bf16.msra.mxu1 %v6769_v25 }
 0xe84   : > { %v3406_v10 = vsel %vm947_vm3, %v3400_v5, -inf  ;;  %6388 = vmatprep.subr.bf16.mxu1 %v6979_v6 }
 0xe85   : > { %2941 = vadd.xlane.f32.xlu0 %v2940_v9  ;;  %3407 = vmax.xlane.f32.xlu1 %v3406_v10 }
 0xe87   : > { %6389 = vmatpush3.bf16.msra.mxu1 %v6770_v61 }
 0xe88   : > { %6390 = vmatprep.subr.bf16.mxu1 %v6979_v6 }
 0xe89   : > { %2944 = vadd.xlane.f32.xlu1 %v2943_v11 }
 0xe8b   : > { %6391 = vmatpush3.bf16.msra.mxu1 %v6771_v0 }
 0xe8c   : > { %6392 = vmatprep.subr.bf16.mxu1 %v6979_v6 }
 0xe8f   : > { %6393 = vmatpush3.bf16.msra.mxu1 %v6772_v13 }
 0xe90   : > { %6394 = vmatprep.subr.bf16.mxu1 %v6979_v6 }
 0xe93   : > { %6395 = vmatpush3.bf16.msra.mxu1 %v6773_v28 }
 0xe94   : > { %6396 = vmatprep.subr.bf16.mxu1 %v6979_v6 }
 0xe97   : > { %6397 = vmatpush3.bf16.msra.mxu1 %v6774_v14 }
 0xe98   : > { %6422 = vmatprep.subr.bf16.mxu1 %v6979_v6 }
 0xf0a   : > { %v3405_v29 = vpop.xlane.xlu0 %3404 }
 0xf0b   : > { %v3409_v16 = vmax.f32 %v3405_v29, -1e+30 }
 0xf0d   : > { %v3417_v17 = vsub.f32 %v3397_v63, %v3409_v16  ;;  %v3411_v56 = vsub.f32 -1e+30, %v3409_v16 }
 0xf0e   : > { %v2942_v19 = vpop.xlane.xlu0 %2941  ;;  %v3408_v20 = vpop.xlane.xlu1 %3407 }
 0xf0f   : > { %v3419_v21 = vmul.f32 1.442695, %v3417_v17  ;;  %v2946_v15 = vadd.f32 %v2942_v19, %v8071_v33  ;;  %v3410_v23 = vmax.f32 %v3408_v20, -1e+30  ;;  %v3413_v58 = vmul.f32 1.442695, %v3411_v56 }
 0xf10   : > { %v6798_v56 = vld [vmem:[%s8600_s7 + $0x180] sm:$0xff]  }
 0xf11   : > { %v3418_v30 = vsub.f32 %v3400_v5, %v3410_v23  ;;  %6887 = vpow2.f32 %v3419_v21  ;;  %v3412_v57 = vsub.f32 -1e+30, %v3410_v23  ;;  %v5420_v21 = vld [vmem:[%s8598_s5 + $0x1] ss:$0 sm:$0xff] }
 0xf12   : > { %v2945_v32 = vpop.xlane.xlu1 %2944  ;;  %6889 = vrcp.f32 %v2946_v15 }
 0xf13   : > { %v3421_v34 = vmul.f32 1.442695, %v3418_v30  ;;  %v2947_v35 = vadd.f32 %v2945_v32, %v8076_v37  ;;  %v3415_v59 = vmul.f32 1.442695, %v3412_v57 }
 0xf15   : > { %6891 = vpow2.f32 %v3421_v34 }
 0xf16   : > { %6893 = vrcp.f32 %v2947_v35 }
 0xf17   : > { %6895 = vpow2.f32 %v3413_v58 }
 0xf18   : > { %6897 = vpow2.f32 %v3415_v59 }
 0xf1e   : > { %v6888_v36 = vpop.eup %6887 }
 0xf1f   : > { %v6890_v38 = vpop.eup %6889  ;;  %v3425_v40 = vsel %vm947_vm3, %v6888_v36, 0.0 }
 0xf20   : > { %3426 = vadd.xlane.f32.xlu0 %v3425_v40  ;;  %v2997_v41 = vmul.f32 %v6890_v38, %v8074_v51  ;;  %v6775_v51 = vld [vmem:[%s8597_s4 + $0xf8] sm:$0xff]  }
 0xf22   : > { %v6892_v42 = vpop.eup %6891 }
 0xf23   : > { %v6894_v43 = vpop.eup %6893  ;;  %v3428_v33 = vsel %vm947_vm3, %v6892_v42, 0.0  ;;  %v3433_v44 = vpack.c.bf16 %v6892_v42, %v6888_v36 }
 0xf24   : > { %3429 = vadd.xlane.f32.xlu1 %v3428_v33  ;;  %v2998_v45 = vmul.f32 %v6894_v43, %v8079_v39  ;;  %v6777_v39 = vld [vmem:[%s8597_s4 + $0xe8] sm:$0xff]   ;;  %v6896_v47 = vpop.eup %6895  ;;  %v6784_v43 = vld [vmem:[%s8600_s7 + $0x1f0] sm:$0xff]  }
 0xf25   : > { %6359 = vmatmul.mubr.msk.bf16.vlgmr.msra.gmra.mxu0 %vm947_vm3, %v3433_v44  ;;  %v6898_v62 = vpop.eup %6897  ;;  %v3423_v63 = vmul.f32 0.0, %v6896_v47  ;;  %v6786_v33 = vld [vmem:[%s8600_s7 + $0x1e8] sm:$0xff]   ;;  %v6787_v44 = vld [vmem:[%s8600_s7 + $0x1b0] sm:$0xff]  }
 0xf26   : > { %v2999_v37 = vpack.c.bf16 %v2998_v45, %v2997_v41  ;;  %6378 = vmatprep.mubr.msk.bf16.mxu0 %vm6980_vm1, %v6979_v6  ;;  %6363 = vmatpush3.bf16.msra.mxu0 %v6775_v51  ;;  %v3424_v3 = vmul.f32 0.0, %v6898_v62  ;;  %v6788_v45 = vld [vmem:[%s8600_s7 + $0x1e0] sm:$0xff]   ;;  %v6790_v51 = vld [vmem:[%s8600_s7 + $0x1d8] sm:$0xff]  }
 0xf27   : > { %6364 = vmatprep.subr.bf16.mxu0 %v6979_v6 }
 0xf28   : > { %6399 = vmatmul.mubr.bf16.vlgmr.msra.gmra.mxu1 %v2999_v37  ;;  %v6789_v37 = vld [vmem:[%s8600_s7 + $0x1a8] sm:$0xff]  }
 0xf29   : > { %6438 = vmatprep.mubr.msk.bf16.mxu1 %vm6980_vm1, %v6979_v6 }
 0xf2a   : > { %6365 = vmatpush3.bf16.msra.mxu0 %v6776_v46  ;;  %v6791_v46 = vld [vmem:[%s8600_s7 + $0x1a0] sm:$0xff]  }
 0xf2b   : > { %6366 = vmatprep.subr.bf16.mxu0 %v6979_v6 }
 0xf2e   : > { %6367 = vmatpush3.bf16.msra.mxu0 %v6777_v39  ;;  %v6792_v39 = vld [vmem:[%s8600_s7 + $0x1d0] sm:$0xff]  }
 0xf2f   : > { %6368 = vmatprep.subr.bf16.mxu0 %v6979_v6 }
 0xf32   : > { %6369 = vmatpush3.bf16.msra.mxu0 %v6778_v50  ;;  %v6793_v50 = vld [vmem:[%s8600_s7 + $0x198] sm:$0xff]  }
 0xf33   : > { %6370 = vmatprep.subr.bf16.mxu0 %v6979_v6 }
 0xf36   : > { %6371 = vmatpush3.bf16.msra.mxu0 %v6779_v52  ;;  %v6794_v52 = vld [vmem:[%s8600_s7 + $0x1c8] sm:$0xff]  }
 0xf37   : > { %6372 = vmatprep.subr.bf16.mxu0 %v6979_v6 }
 0xf3a   : > { %6373 = vmatpush3.bf16.msra.mxu0 %v6780_v53  ;;  %v6795_v53 = vld [vmem:[%s8600_s7 + $0x190] sm:$0xff]  }
 0xf3b   : > { %6374 = vmatprep.subr.bf16.mxu0 %v6979_v6 }
 0xf3e   : > { %6375 = vmatpush3.bf16.msra.mxu0 %v6781_v54  ;;  %v6796_v54 = vld [vmem:[%s8600_s7 + $0x1c0] sm:$0xff]  }
 0xf3f   : > { %6376 = vmatprep.subr.bf16.mxu0 %v6979_v6 }
 0xf42   : > { %6377 = vmatpush3.bf16.msra.mxu0 %v6782_v55  ;;  %v6797_v55 = vld [vmem:[%s8600_s7 + $0x188] sm:$0xff]  }
 0xf43   : > { %6402 = vmatprep.subr.bf16.mxu0 %v6979_v6 }
 0xfa9   : > { %v3427_v60 = vpop.xlane.xlu0 %3426 }
 0xfaa   : > { %v3431_v4 = vadd.f32 %v3427_v60, %v3423_v63 }
 0xfac   : > { %6899 = vrcp.f32 %v3431_v4 }
 0xfad   : > { %v3430_v1 = vpop.xlane.xlu1 %3429 }
 0xfae   : > { %v3432_v5 = vadd.f32 %v3430_v1, %v3424_v3 }
 0xfb0   : > { %6901 = vrcp.f32 %v3432_v5 }
 0xfb9   : > { %v6900_v25 = vpop.eup %6899 }
 0xfbd   : > { %v6902_v13 = vpop.eup %6901 }
 0xfe5   : > { %v3471_v7 = vpop.f32.mrf.mxu0 }
 0xfe6   : > { %v3478_v10 = vadd.f32 %v3471_v7, %v3423_v63 }
 0xfe7   : > { %v6360_v9 = vpop.f32.mrf.mxu0 }
 0xfe8   : > { %v3673_v11 = vpop.f32.mrf.mxu1  ;;  %v3482_v14 = vmul.f32 %v6900_v25, %v3478_v10  ;;  %v5423_v25 = vld [vmem:[%s8599_s6 + $0x4] ss:$0 sm:$0xff] }
 0xfe9   : > { %v3474_v12 = vpop.f32.mrf.mxu0 }
 0xfea   : > { %v3479_v61 = vadd.f32 %v3474_v12, %v3424_v3  ;;  %v6400_v0 = vpop.f32.mrf.mxu1 }
 0xfeb   : > { %v6361_v28 = vpop.f32.mrf.mxu0  ;;  %v5424_v0 = vld [vmem:[%s8599_s6 + $0x5] ss:$0 sm:$0xff] }
 0xfec   : > { %v3483_v29 = vmul.f32 %v6902_v13, %v3479_v61  ;;  %v3676_v16 = vpop.f32.mrf.mxu1 }
 0xfee   : > { %v3484_v17 = vpack.c.bf16 %v3483_v29, %v3482_v14  ;;  %v6401_v19 = vpop.f32.mrf.mxu1 }
 0xff0   : > { %6379 = vmatmul.mubr.bf16.vlgmr.msra.gmra.mxu0 %v3484_v17 }
 0xff1   : > { %6418 = vmatprep.mubr.msk.bf16.mxu0 %vm6980_vm1, %v6979_v6 }
0x10b0   : > { %v3584_v20 = vpop.f32.mrf.mxu0 }
0x10b1   : > { %v3674_v15 = vadd.f32 %v3673_v11, %v3584_v20 }
0x10b2   : > { %v6380_v23 = vpop.f32.mrf.mxu0 }
0x10b3   : > { %v3688_v30 = vadd.f32 %v5420_v21, %v3674_v15  ;;  %v6799_v15 = vld [vmem:[%s8600_s7 + $0x238] sm:$0xff]  }
0x10b4   : > { %v3587_v32 = vpop.f32.mrf.mxu0 }
0x10b5   : > { %v3677_v34 = vadd.f32 %v3676_v16, %v3587_v32  ;;  %v8179_v35 = vadd.f32 %v3688_v30, %v7873_v48  ;;  %v6783_v48 = vld [vmem:[%s8600_s7 + $0x1f8] sm:$0xff]  }
0x10b6   : > { %v6381_v36 = vpop.f32.mrf.mxu0  ;;  %6403 = vmatpush3.bf16.msra.mxu0 %v6783_v48  ;;  %v6804_v48 = vld [vmem:[%s8600_s7 + $0x210] sm:$0xff]  }
0x10b7   : > { %v3689_v38 = vadd.f32 %v5420_v21, %v3677_v34  ;;  %3696 = vadd.xlane.f32.xlu0 %v8179_v35  ;;  %v3702_v40 = vmul.f32 %v8179_v35, %v8179_v35  ;;  %6404 = vmatprep.subr.bf16.mxu0 %v6979_v6 }
0x10b9   : > { %v8185_v41 = vadd.f32 %v3689_v38, %v7875_v49  ;;  %v6785_v49 = vld [vmem:[%s8600_s7 + $0x1b8] sm:$0xff]   ;;  %v6800_v38 = vld [vmem:[%s8600_s7 + $0x230] sm:$0xff]  }
0x10ba   : > { %6405 = vmatpush3.bf16.msra.mxu0 %v6784_v43  ;;  %6423 = vmatpush3.bf16.msra.mxu1 %v6785_v49  ;;  %v6805_v43 = vld [vmem:[%s8600_s7 + $0x208] sm:$0xff]  }
0x10bb   : > { %3704 = vadd.xlane.f32.xlu0 %v3702_v40  ;;  %3698 = vadd.xlane.f32.xlu1 %v8185_v41  ;;  %v3703_v42 = vmul.f32 %v8185_v41, %v8185_v41  ;;  %v6801_v40 = vld [vmem:[%s8600_s7 + $0x228] sm:$0xff]  }
0x10bc   : > { %6406 = vmatprep.subr.bf16.mxu0 %v6979_v6  ;;  %6424 = vmatprep.subr.bf16.mxu1 %v6979_v6 }
0x10be   : > { %6407 = vmatpush3.bf16.msra.mxu0 %v6786_v33  ;;  %6425 = vmatpush3.bf16.msra.mxu1 %v6787_v44  ;;  %v6806_v44 = vld [vmem:[%s8600_s7 + $0x200] sm:$0xff]  }
0x10bf   : > { %3706 = vadd.xlane.f32.xlu1 %v3703_v42  ;;  %6408 = vmatprep.subr.bf16.mxu0 %v6979_v6  ;;  %v6803_v42 = vld [vmem:[%s8600_s7 + $0x218] sm:$0xff]  }
0x10c0   : > { %6426 = vmatprep.subr.bf16.mxu1 %v6979_v6 }
0x10c2   : > { %6409 = vmatpush3.bf16.msra.mxu0 %v6788_v45  ;;  %6427 = vmatpush3.bf16.msra.mxu1 %v6789_v37 }
0x10c3   : > { %6410 = vmatprep.subr.bf16.mxu0 %v6979_v6  ;;  %6428 = vmatprep.subr.bf16.mxu1 %v6979_v6 }
0x10c6   : > { %6411 = vmatpush3.bf16.msra.mxu0 %v6790_v51  ;;  %6429 = vmatpush3.bf16.msra.mxu1 %v6791_v46  ;;  %v6807_v46 = vld [vmem:[%s8600_s7 + $0x2b8] sm:$0xff]  }
0x10c7   : > { %6412 = vmatprep.subr.bf16.mxu0 %v6979_v6  ;;  %6430 = vmatprep.subr.bf16.mxu1 %v6979_v6 }
0x10ca   : > { %6413 = vmatpush3.bf16.msra.mxu0 %v6792_v39  ;;  %6431 = vmatpush3.bf16.msra.mxu1 %v6793_v50  ;;  %v6809_v39 = vld [vmem:[%s8600_s7 + $0x278] sm:$0xff]   ;;  %v6808_v50 = vld [vmem:[%s8600_s7 + $0x2b0] sm:$0xff]  }
0x10cb   : > { %6414 = vmatprep.subr.bf16.mxu0 %v6979_v6  ;;  %6432 = vmatprep.subr.bf16.mxu1 %v6979_v6 }
0x10ce   : > { %6415 = vmatpush3.bf16.msra.mxu0 %v6794_v52  ;;  %6433 = vmatpush3.bf16.msra.mxu1 %v6795_v53  ;;  %v6811_v52 = vld [vmem:[%s8600_s7 + $0x270] sm:$0xff]   ;;  %v6810_v53 = vld [vmem:[%s8600_s7 + $0x2a8] sm:$0xff]  }
0x10cf   : > { %6416 = vmatprep.subr.bf16.mxu0 %v6979_v6  ;;  %6434 = vmatprep.subr.bf16.mxu1 %v6979_v6 }
0x10d2   : > { %6417 = vmatpush3.bf16.msra.mxu0 %v6796_v54  ;;  %6435 = vmatpush3.bf16.msra.mxu1 %v6797_v55  ;;  %v6813_v54 = vld [vmem:[%s8600_s7 + $0x268] sm:$0xff]   ;;  %v6812_v55 = vld [vmem:[%s8600_s7 + $0x2a0] sm:$0xff]  }
0x10d3   : > { %6436 = vmatprep.subr.bf16.mxu1 %v6979_v6  ;;  %6442 = vmatprep.subr.bf16.mxu0 %v6979_v6 }
0x10d6   : > { %6437 = vmatpush3.bf16.msra.mxu1 %v6798_v56  ;;  %v6815_v56 = vld [vmem:[%s8600_s7 + $0x260] sm:$0xff]  }
0x10d7   : > { %6462 = vmatprep.subr.bf16.mxu1 %v6979_v6 }
0x1140   : > { %v3697_v57 = vpop.xlane.xlu0 %3696 }
0x1141   : > { %v3700_v58 = vmul.f32 0.25, %v3697_v57  ;;  %v6814_v57 = vld [vmem:[%s8600_s7 + $0x298] sm:$0xff]  }
0x1143   : > { %v3710_v62 = vmul.f32 %v3700_v58, %v3700_v58  ;;  %v3714_v11 = vsub.f32 %v8179_v35, %v3700_v58  ;;  %v6816_v58 = vld [vmem:[%s8600_s7 + $0x290] sm:$0xff]  }
0x1144   : > { %v3705_v59 = vpop.xlane.xlu0 %3704  ;;  %v3699_v47 = vpop.xlane.xlu1 %3698 }
0x1145   : > { %v3708_v60 = vmul.f32 0.25, %v3705_v59  ;;  %v3701_v63 = vmul.f32 0.25, %v3699_v47  ;;  %v6817_v59 = vld [vmem:[%s8600_s7 + $0x258] sm:$0xff]   ;;  %v6818_v47 = vld [vmem:[%s8600_s7 + $0x288] sm:$0xff]  }
0x1147   : > { %v3712_v1 = vsub.f32 %v3708_v60, %v3710_v62  ;;  %v3711_v5 = vmul.f32 %v3701_v63, %v3701_v63  ;;  %v3715_v13 = vsub.f32 %v8185_v41, %v3701_v63  ;;  %v6802_v41 = vld [vmem:[%s8600_s7 + $0x220] sm:$0xff]   ;;  %v6819_v62 = vld [vmem:[%s8600_s7 + $0x250] sm:$0xff]   ;;  %v6821_v63 = vld [vmem:[%s8600_s7 + $0x248] sm:$0xff]  }
0x1148   : > { %v3707_v3 = vpop.xlane.xlu1 %3706  ;;  %v6820_v60 = vld [vmem:[%s8600_s7 + $0x280] sm:$0xff]  }
0x1149   : > { %v3716_v4 = vadd.f32 1e-05, %v3712_v1  ;;  %v3709_v7 = vmul.f32 0.25, %v3707_v3  ;;  %v6822_v1 = vld [vmem:[%s8600_s7 + $0x240] sm:$0xff]  }
0x114b   : > { %6903 = vrsqrt.f32 %v3716_v4  ;;  %v3713_v9 = vsub.f32 %v3709_v7, %v3711_v5 }
0x114d   : > { %v3717_v10 = vadd.f32 1e-05, %v3713_v9 }
0x114f   : > { %6905 = vrsqrt.f32 %v3717_v10 }
0x1158   : > { %v6904_v12 = vpop.eup %6903 }
0x1159   : > { %v3720_v61 = vmul.f32 %v6904_v12, %v3714_v11 }
0x115b   : > { %v3728_v28 = vmul.f32 %v5423_v25, %v3720_v61 }
0x115c   : > { %v6906_v14 = vpop.eup %6905 }
0x115d   : > { %v3721_v29 = vmul.f32 %v6906_v14, %v3715_v13  ;;  %v8262_v16 = vadd.f32 %v5424_v0, %v3728_v28 }
0x115f   : > { %v3729_v17 = vmul.f32 %v5423_v25, %v3721_v29  ;;  %v3738_v20 = vmul.f32 %v8262_v16, %v7197_v26 }
0x1161   : > { %v8264_v19 = vadd.f32 %v5424_v0, %v3729_v17  ;;  %v3740_v23 = vrot.slane %v3738_v20, 7  ;;  %v3960_v33 = vrot.slane %v3738_v20, 1  ;;  %v5504_v0 = vld [vmem:[%s8601_s8 + $0x2] ss:$0 sm:$0xff] }
0x1163   : > { %v3739_v21 = vmul.f32 %v8264_v19, %v7192_v22 }
0x1165   : > { %v3741_v30 = vrot.slane %v3739_v21, 7  ;;  %v3764_v32 = vpack.c.bf16 %v3739_v21, %v3738_v20  ;;  %v3961_v49 = vrot.slane %v3739_v21, 1 }
0x1167   : > { %6419 = vmatmul.mubr.bf16.vlgmr.msra.gmra.mxu0 %v3764_v32  ;;  %v3742_v34 = vsel %vm1769_vm4, %v3740_v23, %v3741_v30  ;;  %v3743_v35 = vsel %vm1769_vm4, %v3741_v30, %v3740_v23  ;;  %v3962_v45 = vsel %vm1999_vm8, %v3960_v33, %v3961_v49  ;;  %v3963_v37 = vsel %vm1999_vm8, %v3961_v49, %v3960_v33  ;;  %v6825_v49 = vld [vmem:[%s8600_s7 + $0x2e8] sm:$0xff]   ;;  %v6826_v33 = vld [vmem:[%s8600_s7 + $0x2e0] sm:$0xff]  }
0x1168   : > { %6443 = vmatpush3.bf16.msra.mxu0 %v6799_v15  ;;  %v5474_v36 = vpack.c.bf16 %v3742_v34, %v3743_v35  ;;  %6458 = vmatprep.mubr.msk.bf16.mxu0 %vm6980_vm1, %v6979_v6  ;;  %v5501_v51 = vpack.c.bf16 %v3963_v37, %v3962_v45  ;;  %v6823_v35 = vld [vmem:[%s8600_s7 + $0x2f8] sm:$0xff]   ;;  %v6829_v45 = vld [vmem:[%s8600_s7 + $0x2c8] sm:$0xff]  }
0x1169   : > { %6444 = vmatprep.subr.bf16.mxu0 %v6979_v6 }
0x116a   : > { %6439 = vmatmul.mubr.msk.bf16.vlgmr.msra.gmra.mxu1 %vm7611_vm7, %v5474_v36 }
0x116b   : > { %6478 = vmatprep.mubr.msk.bf16.mxu1 %vm6980_vm1, %v6979_v6  ;;  %6463 = vmatpush3.bf16.msra.mxu1 %v6807_v46  ;;  %v6830_v46 = vld [vmem:[%s8600_s7 + $0x2c0] sm:$0xff]  }
0x116c   : > { %6445 = vmatpush3.bf16.msra.mxu0 %v6800_v38  ;;  %6464 = vmatprep.subr.bf16.mxu1 %v6979_v6 }
0x116d   : > { %6446 = vmatprep.subr.bf16.mxu0 %v6979_v6 }
0x116f   : > { %6465 = vmatpush3.bf16.msra.mxu1 %v6808_v50 }
0x1170   : > { %6447 = vmatpush3.bf16.msra.mxu0 %v6801_v40  ;;  %6466 = vmatprep.subr.bf16.mxu1 %v6979_v6 }
0x1171   : > { %6448 = vmatprep.subr.bf16.mxu0 %v6979_v6 }
0x1173   : > { %6467 = vmatpush3.bf16.msra.mxu1 %v6810_v53 }
0x1174   : > { %6449 = vmatpush3.bf16.msra.mxu0 %v6802_v41  ;;  %6468 = vmatprep.subr.bf16.mxu1 %v6979_v6 }
0x1175   : > { %6450 = vmatprep.subr.bf16.mxu0 %v6979_v6 }
0x1177   : > { %6469 = vmatpush3.bf16.msra.mxu1 %v6812_v55 }
0x1178   : > { %6451 = vmatpush3.bf16.msra.mxu0 %v6803_v42  ;;  %6470 = vmatprep.subr.bf16.mxu1 %v6979_v6 }
0x1179   : > { %6452 = vmatprep.subr.bf16.mxu0 %v6979_v6 }
0x117b   : > { %6471 = vmatpush3.bf16.msra.mxu1 %v6814_v57 }
0x117c   : > { %6453 = vmatpush3.bf16.msra.mxu0 %v6804_v48  ;;  %6472 = vmatprep.subr.bf16.mxu1 %v6979_v6 }
0x117d   : > { %6454 = vmatprep.subr.bf16.mxu0 %v6979_v6 }
0x117f   : > { %6473 = vmatpush3.bf16.msra.mxu1 %v6816_v58 }
0x1180   : > { %6455 = vmatpush3.bf16.msra.mxu0 %v6805_v43  ;;  %6474 = vmatprep.subr.bf16.mxu1 %v6979_v6  ;;  %v6824_v43 = vld [vmem:[%s8600_s7 + $0x2f0] sm:$0xff]  }
0x1181   : > { %6456 = vmatprep.subr.bf16.mxu0 %v6979_v6 }
0x1183   : > { %6475 = vmatpush3.bf16.msra.mxu1 %v6818_v47 }
0x1184   : > { %6457 = vmatpush3.bf16.msra.mxu0 %v6806_v44  ;;  %6476 = vmatprep.subr.bf16.mxu1 %v6979_v6  ;;  %v6828_v44 = vld [vmem:[%s8600_s7 + $0x2d0] sm:$0xff]  }
0x1185   : > { %6482 = vmatprep.subr.bf16.mxu0 %v6979_v6 }
0x1187   : > { %6459 = vmatmul.mubr.msk.bf16.vlgmr.msra.gmra.mxu0 %vm7656_vm10, %v5501_v51  ;;  %6477 = vmatpush3.bf16.msra.mxu1 %v6820_v60  ;;  %v5584_v60 = vld [vmem:[%s8601_s8 + $0x3] ss:$0 sm:$0xff] }
0x1188   : > { %6498 = vmatprep.mubr.msk.bf16.mxu0 %vm6980_vm1, %v6979_v6  ;;  %6483 = vmatpush3.bf16.msra.mxu0 %v6809_v39 }
0x1189   : > { %6484 = vmatprep.subr.bf16.mxu0 %v6979_v6  ;;  %6502 = vmatprep.subr.bf16.mxu1 %v6979_v6 }
0x118c   : > { %6485 = vmatpush3.bf16.msra.mxu0 %v6811_v52 }
0x118d   : > { %6486 = vmatprep.subr.bf16.mxu0 %v6979_v6 }
0x1190   : > { %6487 = vmatpush3.bf16.msra.mxu0 %v6813_v54 }
0x1191   : > { %6488 = vmatprep.subr.bf16.mxu0 %v6979_v6 }
0x1194   : > { %6489 = vmatpush3.bf16.msra.mxu0 %v6815_v56 }
0x1195   : > { %6490 = vmatprep.subr.bf16.mxu0 %v6979_v6 }
0x1198   : > { %6491 = vmatpush3.bf16.msra.mxu0 %v6817_v59 }
0x1199   : > { %6492 = vmatprep.subr.bf16.mxu0 %v6979_v6 }
0x119c   : > { %6493 = vmatpush3.bf16.msra.mxu0 %v6819_v62 }
0x119d   : > { %6494 = vmatprep.subr.bf16.mxu0 %v6979_v6 }
0x11a0   : > { %6495 = vmatpush3.bf16.msra.mxu0 %v6821_v63 }
0x11a1   : > { %6496 = vmatprep.subr.bf16.mxu0 %v6979_v6 }
0x11a4   : > { %6497 = vmatpush3.bf16.msra.mxu0 %v6822_v1 }
0x11a5   : > { %6522 = vmatprep.subr.bf16.mxu0 %v6979_v6 }
0x1227   : > { %v3864_v3 = vpop.f32.mrf.mxu0 }
0x1229   : > { %v6420_v4 = vpop.f32.mrf.mxu0 }
0x122a   : > { %v3953_v5 = vpop.f32.mrf.mxu1 }
0x122b   : > { %v3867_v7 = vpop.f32.mrf.mxu0  ;;  %v3954_v25 = vadd.f32 %v3953_v5, %v3864_v3 }
0x122c   : > { %v6440_v9 = vpop.f32.mrf.mxu1 }
0x122d   : > { %v6421_v10 = vpop.f32.mrf.mxu0 }
0x122e   : > { %v3956_v11 = vpop.f32.mrf.mxu1 }
0x122f   : > { %v3957_v14 = vadd.f32 %v3956_v11, %v3867_v7 }
0x1230   : > { %v6441_v12 = vpop.f32.mrf.mxu1 }
0x1247   : > { %v4066_v61 = vpop.f32.mrf.mxu0 }
0x1248   : > { %v4073_v13 = vadd.f32 %v4066_v61, %v3954_v25 }
0x1249   : > { %v6460_v28 = vpop.f32.mrf.mxu0 }
0x124a   : > { %v4083_v29 = vadd.f32 %v5504_v0, %v4073_v13  ;;  %v6832_v13 = vld [vmem:[%s8602_s9 + $0x78] sm:$0xff]   ;;  %v6834_v28 = vld [vmem:[%s8602_s9 + $0x70] sm:$0xff]  }
0x124b   : > { %v4069_v17 = vpop.f32.mrf.mxu0 }
0x124c   : > { %v4085_v20 = vmax.f32 %v4083_v29, 0.0  ;;  %v4074_v21 = vadd.f32 %v4069_v17, %v3957_v14  ;;  %v6835_v14 = vld [vmem:[%s8602_s9 + $0x28] sm:$0xff]   ;;  %v6837_v17 = vld [vmem:[%s8602_s9 + $0x20] sm:$0xff]  }
0x124d   : > { %v6461_v15 = vpop.f32.mrf.mxu0  ;;  %v6836_v29 = vld [vmem:[%s8602_s9 + $0x68] sm:$0xff]  }
0x124e   : > { %v4084_v23 = vadd.f32 %v5504_v0, %v4074_v21  ;;  %v4087_v30 = vmul.f32 %v4085_v20, %v7197_v26  ;;  %v6838_v20 = vld [vmem:[%s8602_s9 + $0x60] sm:$0xff]   ;;  %v6839_v21 = vld [vmem:[%s8602_s9 + $0x18] sm:$0xff]  }
0x124f   : > { %v6840_v15 = vld [vmem:[%s8602_s9 + $0x58] sm:$0xff]  }
0x1250   : > { %v4086_v32 = vmax.f32 %v4084_v23, 0.0  ;;  %v4089_v36 = vrot.slane %v4087_v30, 7  ;;  %v4309_v51 = vrot.slane %v4087_v30, 1  ;;  %v6841_v23 = vld [vmem:[%s8602_s9 + $0x10] sm:$0xff]  }
0x1252   : > { %v4088_v34 = vmul.f32 %v4086_v32, %v7192_v22  ;;  %v6843_v32 = vld [vmem:[%s8602_s9 + $0x8] sm:$0xff]  }
0x1254   : > { %v4090_v38 = vrot.slane %v4088_v34, 7  ;;  %v4113_v40 = vpack.c.bf16 %v4088_v34, %v4087_v30  ;;  %v4310_v37 = vrot.slane %v4088_v34, 1  ;;  %v6842_v30 = vld [vmem:[%s8602_s9 + $0x50] sm:$0xff]   ;;  %v6844_v34 = vld [vmem:[%s8602_s9 + $0x48] sm:$0xff]  }
0x1256   : > { %6479 = vmatmul.mubr.bf16.vlgmr.msra.gmra.mxu1 %v4113_v40  ;;  %v4091_v41 = vsel %vm1769_vm4, %v4089_v36, %v4090_v38  ;;  %v4092_v42 = vsel %vm1769_vm4, %v4090_v38, %v4089_v36  ;;  %v4311_v39 = vsel %vm1999_vm8, %v4309_v51, %v4310_v37  ;;  %v4312_v50 = vsel %vm1999_vm8, %v4310_v37, %v4309_v51  ;;  %v6846_v36 = vld [vmem:[%s8602_s9 + $0x40] sm:$0xff]  }
0x1257   : > { %6503 = vmatpush3.bf16.msra.mxu1 %v6823_v35  ;;  %v5554_v48 = vpack.c.bf16 %v4091_v41, %v4092_v42  ;;  %6518 = vmatprep.mubr.msk.bf16.mxu1 %vm6980_vm1, %v6979_v6  ;;  %v5581_v52 = vpack.c.bf16 %v4312_v50, %v4311_v39  ;;  %v6845_v35 = vld [vmem:[%s8602_s9] sm:$0xff]   ;;  %v505_v38 = vrot.slane %v7114_v2, 4 }
0x1258   : > { %6504 = vmatprep.subr.bf16.mxu1 %v6979_v6  ;;  %v5587_v50 = vld [vmem:[%s8599_s6 + $0x6] ss:$0 sm:$0xff] }
0x1259   : > { %6499 = vmatmul.mubr.msk.bf16.vlgmr.msra.gmra.mxu0 %vm7611_vm7, %v5554_v48 }
0x125a   : > { %6538 = vmatprep.mubr.msk.bf16.mxu0 %vm6980_vm1, %v6979_v6 }
0x125b   : > { %6505 = vmatpush3.bf16.msra.mxu1 %v6824_v43 }
0x125c   : > { %6506 = vmatprep.subr.bf16.mxu1 %v6979_v6 }
0x125f   : > { %6507 = vmatpush3.bf16.msra.mxu1 %v6825_v49 }
0x1260   : > { %6508 = vmatprep.subr.bf16.mxu1 %v6979_v6 }
0x1263   : > { %6509 = vmatpush3.bf16.msra.mxu1 %v6826_v33 }
0x1264   : > { %6510 = vmatprep.subr.bf16.mxu1 %v6979_v6 }
0x1267   : > { %6511 = vmatpush3.bf16.msra.mxu1 %v6827_v8 }
0x1268   : > { %6512 = vmatprep.subr.bf16.mxu1 %v6979_v6 }
0x126b   : > { %6513 = vmatpush3.bf16.msra.mxu1 %v6828_v44 }
0x126c   : > { %6514 = vmatprep.subr.bf16.mxu1 %v6979_v6 }
0x126f   : > { %6515 = vmatpush3.bf16.msra.mxu1 %v6829_v45 }
0x1270   : > { %6516 = vmatprep.subr.bf16.mxu1 %v6979_v6 }
0x1273   : > { %6517 = vmatpush3.bf16.msra.mxu1 %v6830_v46 }
0x1274   : > { %6542 = vmatprep.subr.bf16.mxu1 %v6979_v6 }
0x1276   : > { %6519 = vmatmul.mubr.msk.bf16.vlgmr.msra.gmra.mxu1 %vm7656_vm10, %v5581_v52 }
0x1277   : > { %6558 = vmatprep.mubr.msk.bf16.mxu1 %vm6980_vm1, %v6979_v6  ;;  %6543 = vmatpush3.bf16.msra.mxu1 %v6832_v13 }
0x1278   : > { %6544 = vmatprep.subr.bf16.mxu1 %v6979_v6 }
0x127b   : > { %6545 = vmatpush3.bf16.msra.mxu1 %v6834_v28 }
0x127c   : > { %6546 = vmatprep.subr.bf16.mxu1 %v6979_v6 }
0x127f   : > { %6547 = vmatpush3.bf16.msra.mxu1 %v6836_v29 }
0x1280   : > { %6548 = vmatprep.subr.bf16.mxu1 %v6979_v6 }
0x1283   : > { %6549 = vmatpush3.bf16.msra.mxu1 %v6838_v20 }
0x1284   : > { %6550 = vmatprep.subr.bf16.mxu1 %v6979_v6 }
0x1287   : > { %6551 = vmatpush3.bf16.msra.mxu1 %v6840_v15 }
0x1288   : > { %6552 = vmatprep.subr.bf16.mxu1 %v6979_v6 }
0x128b   : > { %6553 = vmatpush3.bf16.msra.mxu1 %v6842_v30 }
0x128c   : > { %6554 = vmatprep.subr.bf16.mxu1 %v6979_v6 }
0x128f   : > { %6555 = vmatpush3.bf16.msra.mxu1 %v6844_v34 }
0x1290   : > { %6556 = vmatprep.subr.bf16.mxu1 %v6979_v6 }
0x1293   : > { %6557 = vmatpush3.bf16.msra.mxu1 %v6846_v36 }
0x1316   : > { %v4213_v53 = vpop.f32.mrf.mxu1 }
0x1318   : > { %v6480_v54 = vpop.f32.mrf.mxu1 }
0x1319   : > { %v4302_v55 = vpop.f32.mrf.mxu0 }
0x131a   : > { %v4216_v56 = vpop.f32.mrf.mxu1  ;;  %v4303_v18 = vadd.f32 %v4302_v55, %v4213_v53  ;;  %v5588_v53 = vld [vmem:[%s8599_s6 + $0x7] ss:$0 sm:$0xff] }
0x131b   : > { %v6500_v57 = vpop.f32.mrf.mxu0 }
0x131c   : > { %v6481_v58 = vpop.f32.mrf.mxu1 }
0x131d   : > { %v4305_v59 = vpop.f32.mrf.mxu0 }
0x131e   : > { %v4306_v1 = vadd.f32 %v4305_v59, %v4216_v56 }
0x131f   : > { %v6501_v47 = vpop.f32.mrf.mxu0 }
0x1336   : > { %v4415_v62 = vpop.f32.mrf.mxu1 }
0x1337   : > { %v4422_v63 = vadd.f32 %v4415_v62, %v4303_v18 }
0x1338   : > { %v6520_v31 = vpop.f32.mrf.mxu1 }
0x1339   : > { %v4432_v3 = vadd.f32 %v5584_v60, %v4422_v63 }
0x133a   : > { %v4418_v4 = vpop.f32.mrf.mxu1 }
0x133b   : > { %v4434_v5 = vmul.f32 %v4432_v3, %v7197_v26  ;;  %v4423_v7 = vadd.f32 %v4418_v4, %v4306_v1  ;;  %v5615_v3 = vld [vmem:[%s8603_s10 + $0x1] ss:$0 sm:$0xff] }
0x133c   : > { %v6521_v9 = vpop.f32.mrf.mxu1 }
0x133d   : > { %v4433_v10 = vadd.f32 %v5584_v60, %v4423_v7  ;;  %v8444_v11 = vadd.f32 %v4434_v5, %v8262_v16  ;;  %v6831_v16 = vld [vmem:[%s8602_s9 + $0x38] sm:$0xff]  }
0x133e   : > { %6523 = vmatpush3.bf16.msra.mxu0 %v6831_v16 }
0x133f   : > { %v4435_v12 = vmul.f32 %v4433_v10, %v7192_v22  ;;  %4442 = vadd.xlane.f32.xlu0 %v8444_v11  ;;  %v4448_v25 = vmul.f32 %v8444_v11, %v8444_v11  ;;  %6524 = vmatprep.subr.bf16.mxu0 %v6979_v6 }
0x1341   : > { %v8451_v61 = vadd.f32 %v4435_v12, %v8264_v19  ;;  %v6833_v19 = vld [vmem:[%s8602_s9 + $0x30] sm:$0xff]  }
0x1342   : > { %6525 = vmatpush3.bf16.msra.mxu0 %v6833_v19 }
0x1343   : > { %4450 = vadd.xlane.f32.xlu0 %v4448_v25  ;;  %4444 = vadd.xlane.f32.xlu1 %v8451_v61  ;;  %v4449_v0 = vmul.f32 %v8451_v61, %v8451_v61 }
0x1344   : > { %6526 = vmatprep.subr.bf16.mxu0 %v6979_v6 }
0x1346   : > { %6527 = vmatpush3.bf16.msra.mxu0 %v6835_v14 }
0x1347   : > { %4452 = vadd.xlane.f32.xlu1 %v4449_v0  ;;  %6528 = vmatprep.subr.bf16.mxu0 %v6979_v6 }
0x134a   : > { %6529 = vmatpush3.bf16.msra.mxu0 %v6837_v17 }
0x134b   : > { %6530 = vmatprep.subr.bf16.mxu0 %v6979_v6 }
0x134e   : > { %6531 = vmatpush3.bf16.msra.mxu0 %v6839_v21 }
0x134f   : > { %6532 = vmatprep.subr.bf16.mxu0 %v6979_v6 }
0x1352   : > { %6533 = vmatpush3.bf16.msra.mxu0 %v6841_v23 }
0x1353   : > { %6534 = vmatprep.subr.bf16.mxu0 %v6979_v6 }
0x1356   : > { %6535 = vmatpush3.bf16.msra.mxu0 %v6843_v32  ;;  %v5589_v32 = vld [vmem:[%s8603_s10] ss:$0 sm:$0xff] }
0x1357   : > { %6536 = vmatprep.subr.bf16.mxu0 %v6979_v6 }
0x135a   : > { %6537 = vmatpush3.bf16.msra.mxu0 %v6845_v35 }
0x1370   : > { %507 = vxpose.xlu0.b32.start.end [1/1] (short) (narrow) %v505_v38, 16 }
0x13c8   : > { %v4443_v40 = vpop.xlane.xlu0 %4442 }
0x13c9   : > { %v4446_v41 = vmul.f32 0.25, %v4443_v40 }
0x13cb   : > { %v4456_v43 = vmul.f32 %v4446_v41, %v4446_v41  ;;  %v4460_v2 = vsub.f32 %v8444_v11, %v4446_v41 }
0x13cc   : > { %v4451_v42 = vpop.xlane.xlu0 %4450  ;;  %v4445_v48 = vpop.xlane.xlu1 %4444 }
0x13cd   : > { %v4454_v49 = vmul.f32 0.25, %v4451_v42  ;;  %v4447_v33 = vmul.f32 0.25, %v4445_v48 }
0x13cf   : > { %v4458_v8 = vsub.f32 %v4454_v49, %v4456_v43  ;;  %v4457_v37 = vmul.f32 %v4447_v33, %v4447_v33  ;;  %v4461_v54 = vsub.f32 %v8451_v61, %v4447_v33 }
0x13d0   : > { %v4453_v44 = vpop.xlane.xlu1 %4452 }
0x13d1   : > { %v4462_v45 = vadd.f32 1e-05, %v4458_v8  ;;  %v4455_v51 = vmul.f32 0.25, %v4453_v44 }
0x13d3   : > { %6907 = vrsqrt.f32 %v4462_v45  ;;  %v4459_v46 = vsub.f32 %v4455_v51, %v4457_v37 }
0x13d5   : > { %v4463_v6 = vadd.f32 1e-05, %v4459_v46 }
0x13d7   : > { %6909 = vrsqrt.f32 %v4463_v6 }
0x13e0   : > { %v6908_v39 = vpop.eup %6907 }
0x13e1   : > { %v4466_v52 = vmul.f32 %v6908_v39, %v4460_v2 }
0x13e3   : > { %v4474_v55 = vmul.f32 %v5587_v50, %v4466_v52 }
0x13e4   : > { %v6910_v56 = vpop.eup %6909 }
0x13e5   : > { %v4467_v57 = vmul.f32 %v6910_v56, %v4461_v54  ;;  %v4482_v58 = vadd.f32 %v5588_v53, %v4474_v55 }
0x13e7   : > { %v4475_v59 = vmul.f32 %v5587_v50, %v4467_v57  ;;  %v4484_v18 = vmul.f32 %v4482_v58, %v7197_v26 }
0x13e9   : > { %v4483_v47 = vadd.f32 %v5588_v53, %v4475_v59  ;;  %v4486_v60 = vadd.f32 %v4484_v18, %v7195_v24 }
0x13eb   : > { %v4485_v62 = vmul.f32 %v4483_v47, %v7192_v22 }
0x13ec   : > { %v523_v21 = vpop.trf.xlu0 }
0x13ed   : > { %v4487_v63 = vadd.f32 %v4485_v62, %v7200_v27  ;;  %v539_v23 = vsel %vm501_vm2, %v523_v21, 0.0 }
0x13ef   : > { %v4488_v31 = vpack.c.bf16 %v4487_v63, %v4486_v60 }
0x13f0   : > { %v524_v30 = vpop.trf.xlu0 }
0x13f1   : > { %6539 = vmatmul.mubr.bf16.vlgmr.msra.gmra.mxu0 %v4488_v31  ;;  %6559 = vmatmul.mubr.bf16.vlgmr.msra.gmra.mxu1 %v4488_v31  ;;  %v540_v36 = vsel %vm501_vm2, %v524_v30, 0.0 }
0x14b1   : > { %v4594_v1 = vpop.f32.mrf.mxu0  ;;  %v4710_v4 = vpop.f32.mrf.mxu1 }
0x14b2   : > { %v4711_v9 = vadd.f32 %v5615_v3, %v4710_v4  ;;  %v4595_v38 = vadd.f32 %v5589_v32, %v4594_v1 }
0x14b3   : > { %v6540_v5 = vpop.f32.mrf.mxu0  ;;  %v6560_v7 = vpop.f32.mrf.mxu1 }
0x14b4   : > { %v4717_v24 = vmul.f32 %v4711_v9, %v7197_v26  ;;  %v4601_v42 = vmul.f32 %v4595_v38, %v7197_v26 }
0x14b5   : > { %v4597_v10 = vpop.f32.mrf.mxu0  ;;  %v4713_v11 = vpop.f32.mrf.mxu1 }
0x14b6   : > { %v4714_v12 = vadd.f32 %v5615_v3, %v4713_v11  ;;  %v4719_v17 = vmul.f32 1.442695, %v4717_v24  ;;  %v4598_v48 = vadd.f32 %v5589_v32, %v4597_v10 }
0x14b7   : > { %v6541_v25 = vpop.f32.mrf.mxu0  ;;  %v6561_v61 = vpop.f32.mrf.mxu1 }
0x14b8   : > { %v4718_v27 = vmul.f32 %v4714_v12, %v7192_v22  ;;  %6911 = vpow2.f32 %v4719_v17  ;;  %v4602_v33 = vmul.f32 %v4598_v48, %v7192_v22 }
0x14ba   : > { %v4764_v0 = vadd.f32 %v4718_v27, %v4717_v24  ;;  %v4721_v20 = vmul.f32 1.442695, %v4718_v27 }
0x14bc   : > { %v4765_v16 = vrot.slane %v4764_v0, 4  ;;  %6913 = vpow2.f32 %v4721_v20 }
0x14be   : > { %v4766_v13 = vadd.f32 %v4765_v16, %v4764_v0 }
0x14c0   : > { %v4767_v19 = vrot.slane %v4766_v13, 2 }
0x14c2   : > { %v4768_v28 = vadd.f32 %v4767_v19, %v4766_v13 }
0x14c4   : > { %v4769_v14 = vrot.slane %v4768_v28, 1 }
0x14c5   : > { %v6912_v15 = vpop.eup %6911 }
0x14c6   : > { %v4770_v29 = vadd.f32 %v4769_v14, %v4768_v28  ;;  %v4723_v34 = vmul.f32 %v6912_v15, %v539_v23 }
0x14c8   : > { %4771 = vadd.xlane.f32.xlu1 %v4770_v29  ;;  %v4725_v40 = vmul.f32 %v4723_v34, %v7197_v26 }
0x14c9   : > { %v6914_v35 = vpop.eup %6913 }
0x14ca   : > { %v4724_v41 = vmul.f32 %v6914_v35, %v540_v36  ;;  %v4727_v43 = vadd.f32 %v4725_v40, %v4601_v42 }
0x14cc   : > { %v4726_v49 = vmul.f32 %v4724_v41, %v7192_v22 }
0x14ce   : > { %v4728_v8 = vadd.f32 %v4726_v49, %v4602_v33 }
0x14fb   : > { %4729 = vxpose.xlu1.b32.start [1/2] (short) (narrow) %v4727_v43, 8 }
0x14ff   : > { %4730 = vxpose.xlu1.b32.end [2/2] (short) (narrow) %v4728_v8, 8 }
0x1551   : > { %v4772_v44 = vpop.xlane.xlu1 %4771 }
0x1552   : > { %4774 = vst.msk [vmem:[%s431_s26] sm:$0x1] %vm4773_vm11, %v4772_v44 }
0x1577   : > { %v4745_v22 = vpop.trf.xlu1 }
0x1578   : > { %4763 = vst.msk [vmem:[%s7116_s23 + $0x4] sm:$0xf] %vm4761_vm0, %v4745_v22 }
0x1579   : > { %6929 = shalt.err (!%p6926_p3)
}
0x157a   : > { %s6930_s23 = scalar_lea.hbm %s8554_s17, 128  ;;  %s6934_s26 = scalar_lea.hbm %s8604_s11, 256 }
0x157b   : > { %p6931_p4 = scmp.ne.s32.totalorder %s8554_s17, %s6930_s23  ;;  %p6935_p9 = scmp.lt.s32.totalorder %s8554_s17, %s8604_s11 }
0x157c   : > { %p6936_p10 = scmp.lt.s32.totalorder %s6934_s26, %s6930_s23 }
0x157d   : > { %p6932_p7 = pnand %p6931_p4, %p7086_p5 }
0x157e   : > { %p6937_p11 = por %p6936_p10, %p6935_p9 }
0x157f   : > { %p6933_p8 = pneg %p6932_p7 }
0x1581   : > { %p6938_p12 = pnand %p6937_p11, %p6933_p8 }
0x1583   : > { %6941 = shalt.err (!%p6938_p12)
}
0x1584   : > { %6562 = dma.vmem_to_hbm [thread:$0]  (%p7086_p5), %s4793_s18, 128, %s8554_s17, %s4776_s20  }
0x1585 PF: > { %p6568_p13 = scmp.ge.s32.totalorder %s6976_s24, 2  ;;  %s4807_s0 = sand.u32 1, %s6964_s21  }
0x1586   : > { %s4808_s16 = scalar_lea.sflag [#allocation3], %s4807_s0 }
0x1587   : > { %p6565_p0 = pnand %p6568_p13, %p7090_p6 }
0x1589   : > { %p6566_p1 = pneg %p6565_p0 }
0x158b   : > { %6959 = dma.done.wait (%p6566_p1), %s4808_s16, 128  }
0x158c   : > { %6961 = vsyncadd (%p6566_p1), %s4808_s16, 4294967168  ;;  %s8619_s15 = sld [smem:[#allocation5_spill]]  ;;  %p23_p2 = scmp.ge.s32.totalorder %s7073_s27, 4  }
0x158d   : > { %s8620_s23 = sld [smem:[#allocation6_spill]]  ;;  %s8621_s21 = smov %s6968_s22 }
0x158e   : > { %s8623_s24 = smov %s7073_s27  ;;  %25 = sbr.rel (!%p23_p2) target bundleno = 6 (0x6), region = 163 }
0x1592   : > { %s8622_s22 = smov %s8619_s15 }
0x1593   :  { %4819 = vsyncpa [#allocation3], 1 }
0x1594   :  { %4821 = vsyncpa [#allocation3 + $0x1], 1 }

</bundles_post_ra>
